<compile_context>
chip_gen: v7x
topology: tpu7x:2x2x1
jax: 0.10.0
libtpu: 0.0.40
codegen_flags: <defaults>
</compile_context>

<pallas_src>
import functools

import jax
import jax.numpy as jnp
from jax.experimental import pallas as pl
from jax.experimental.pallas import tpu as pltpu

LANE = 128                      # lane-dense GEMM output width (conv1/conv2/head)
F_FLAT = 7 * 7 * 64             # 3136: hidden_layer in_features
HEAD_K_TILES = 4                # reduction-grid steps over the flattened features
_HEAD_TK = -(-F_FLAT // (HEAD_K_TILES * 128)) * 128    # 896 (7*128)
F_PAD = HEAD_K_TILES * _HEAD_TK                        # 3584 (zero-padded features)


# ----------------------------------------------------------------------------
# Pallas kernels
# ----------------------------------------------------------------------------
def _gemm_relu_kernel(a_ref, w_ref, o_ref, acc_ref, *, relu, n_k):
    """out = relu_maybe(A @ W), reduction grid over K (axis 1 of the grid)."""
    k = pl.program_id(1)

    @pl.when(k == 0)
    def _():
        acc_ref[...] = jnp.zeros_like(acc_ref)

    a = a_ref[...]
    if a.dtype != w_ref.dtype:          # skip cast when activations already bf16
        a = a.astype(w_ref.dtype)
    acc_ref[...] += jnp.dot(a, w_ref[...], preferred_element_type=jnp.float32)

    @pl.when(k == n_k - 1)
    def _():
        acc = acc_ref[...]
        if relu:                        # ReLU on the f32 accumulator (v5e-safe)
            acc = jnp.maximum(acc, 0.0)
        o_ref[...] = acc.astype(o_ref.dtype)


def pallas_gemm(a, w, *, relu=False, m_tiles=1, k_tiles=1, out_dtype=jnp.bfloat16):
    """out = relu_maybe(a @ w).  a: [M, K] bf16/f32, w: [K, N] bf16.

    Grid = (m_tiles, k_tiles): M split into 'parallel' blocks, K into an
    'arbitrary' reduction with an f32 VMEM accumulator. Tiling constraints are
    asserted loudly instead of silently falling back."""
    M, K = a.shape
    K2, N = w.shape
    assert K == K2, (K, K2)
    assert M % m_tiles == 0, (M, m_tiles)
    assert K % k_tiles == 0, (K, k_tiles)
    tm, tk = M // m_tiles, K // k_tiles
    assert m_tiles == 1 or tm % 8 == 0, ("M tile must be a multiple of 8", M, m_tiles)
    assert k_tiles == 1 or tk % 128 == 0, ("K tile must be a multiple of 128", K, k_tiles)
    return pl.pallas_call(
        functools.partial(_gemm_relu_kernel, relu=relu, n_k=k_tiles),
        out_shape=jax.ShapeDtypeStruct((M, N), out_dtype),
        grid_spec=pltpu.PrefetchScalarGridSpec(
            num_scalar_prefetch=0,
            grid=(m_tiles, k_tiles),
            in_specs=[pl.BlockSpec((tm, tk), lambda i, k: (i, k)),
                      pl.BlockSpec((tk, N), lambda i, k: (k, 0))],
            out_specs=pl.BlockSpec((tm, N), lambda i, k: (i, 0)),
            scratch_shapes=[pltpu.VMEM((tm, N), jnp.float32)],
        ),
        compiler_params=pltpu.CompilerParams(
            dimension_semantics=("parallel", "arbitrary")),
    )(a, w)


def _mlp_head_kernel(x_ref, wh_ref, wo_ref, o_ref, acc_ref, *, n_k):
    """hidden: F->512 (+ReLU) accumulated over K chunks; output: 512->Np on the
    last step. Intermediate never leaves VMEM; one launch for the whole head."""
    k = pl.program_id(0)

    @pl.when(k == 0)
    def _():
        acc_ref[...] = jnp.zeros_like(acc_ref)

    x = x_ref[...]
    if x.dtype != wh_ref.dtype:
        x = x.astype(wh_ref.dtype)
    acc_ref[...] += jnp.dot(x, wh_ref[...], preferred_element_type=jnp.float32)

    @pl.when(k == n_k - 1)
    def _():
        hid = jnp.maximum(acc_ref[...], 0.0).astype(wo_ref.dtype)   # ReLU on f32 acc
        o_ref[...] = jnp.dot(hid, wo_ref[...],
                             preferred_element_type=jnp.float32).astype(o_ref.dtype)


def pallas_mlp_head(x, wh, wo, *, k_tiles=HEAD_K_TILES):
    """Fused hidden(ReLU) + output linear with a K-reduction pipeline.
    x:[B,F_pad] bf16, wh:[F_pad,512] bf16, wo:[512,Np] bf16 -> [B,Np] f32."""
    B, F = x.shape
    F2, H = wh.shape
    H2, Np = wo.shape
    assert F == F2 and H == H2, (F, F2, H, H2)
    assert F % k_tiles == 0 and (F // k_tiles) % 128 == 0, (F, k_tiles)
    tk = F // k_tiles
    return pl.pallas_call(
        functools.partial(_mlp_head_kernel, n_k=k_tiles),
        out_shape=jax.ShapeDtypeStruct((B, Np), jnp.float32),
        grid_spec=pltpu.PrefetchScalarGridSpec(
            num_scalar_prefetch=0,
            grid=(k_tiles,),
            in_specs=[pl.BlockSpec((B, tk), lambda k: (0, k)),
                      pl.BlockSpec((tk, H), lambda k: (k, 0)),
                      pl.BlockSpec((H, Np), lambda k: (0, 0))],
            out_specs=pl.BlockSpec((B, Np), lambda k: (0, 0)),
            scratch_shapes=[pltpu.VMEM((B, H), jnp.float32)],
        ),
        compiler_params=pltpu.CompilerParams(
            dimension_semantics=("arbitrary",)),
    )(x, wh, wo)


# ----------------------------------------------------------------------------
# Plain-JAX glue: im2col patch extraction (NHWC input), no transposes.
# ----------------------------------------------------------------------------
def im2col(x, k, s):
    """x: [B, H, W, C] -> patches [B*OH*OW, k*k*C] in (kh, kw, C) feature order
    (conv weights are pre-permuted at init to match), plus output spatial dims."""
    B, H, W, C = x.shape
    oh = (H - k) // s + 1
    ow = (W - k) // s + 1
    cols = [x[:, ki:ki + s * oh:s, kj:kj + s * ow:s, :]
            for ki in range(k) for kj in range(k)]
    p = jnp.concatenate(cols, axis=-1)               # [B, oh, ow, k*k*C]
    return p.reshape(B * oh * ow, k * k * C), (B, oh, ow)


# ----------------------------------------------------------------------------
# One-time weight prep (synthetic params — shapes/orders match the nn.Module)
# ----------------------------------------------------------------------------
def _conv_w_to_mat(w_pt, c_in_pad, n_out_pad):
    """PyTorch conv weight [O, C, kh, kw] -> GEMM weight [kh*kw*c_in_pad, n_out_pad]
    with rows in (kh, kw, C) order, zero rows for padded input channels and
    zero columns for padded (lane-dense) output channels."""
    O, C, k, _ = w_pt.shape
    w = jnp.zeros((O, c_in_pad, k, k), w_pt.dtype).at[:, :C].set(w_pt)
    w = jnp.transpose(w, (2, 3, 1, 0)).reshape(k * k * c_in_pad, O)
    return jnp.pad(w, ((0, 0), (0, n_out_pad - O)))


def init_params(key, action_n):
    k1, k2, k3, k4, k5 = jax.random.split(key, 5)
    scale = 0.05
    # PyTorch-layout weights (what the nn.Module would hold); bias=False throughout.
    w1_pt = jax.random.normal(k1, (32, 4, 8, 8), jnp.float32) * scale
    w2_pt = jax.random.normal(k2, (64, 32, 4, 4), jnp.float32) * scale
    w3_pt = jax.random.normal(k3, (64, 64, 3, 3), jnp.float32) * scale
    wh_pt = jax.random.normal(k4, (512, F_FLAT), jnp.float32) * scale
    wo_pt = jax.random.normal(k5, (action_n, 512), jnp.float32) * scale

    # One-time layout plumbing (removed from the per-forward hot path):
    # Only the GEMM *output* (N) side is lane-padded; the K side uses the real
    # input-channel counts (activations are sliced back before im2col).
    w1 = _conv_w_to_mat(w1_pt, 4, LANE)      # [256,  128]  out 32 -> 128 lanes
    w2 = _conv_w_to_mat(w2_pt, 32, LANE)     # [512,  128]  K = 4*4*32 (no zero K rows)
    w3 = _conv_w_to_mat(w3_pt, 64, 64)       # [576,   64]  N kept 64: feeds 3136-flatten
    # hidden weight rows permuted from PyTorch (C,H,W) flatten to NHWC (H,W,C) flatten,
    # then zero-padded to F_PAD rows so the head's K-reduction tiles are 128-aligned.
    wh = jnp.transpose(wh_pt.reshape(512, 64, 7, 7),
                       (2, 3, 1, 0)).reshape(F_FLAT, 512)              # [3136, 512]
    wh = jnp.pad(wh, ((0, F_PAD - F_FLAT), (0, 0)))                    # [3584, 512]
    wo = jnp.pad(wo_pt.T, ((0, 0), (0, LANE - action_n)))              # [512, 128]

    bf16 = lambda t: t.astype(jnp.bfloat16)
    return {"w1": bf16(w1), "w2": bf16(w2), "w3": bf16(w3),
            "w_hidden": bf16(wh), "w_out": bf16(wo)}


# ----------------------------------------------------------------------------
# Forward pass (semantics of FunctionApproximation.forward, bias=False)
# ----------------------------------------------------------------------------
def function_approximation_forward(x_nchw, params, action_n):
    # Single input transpose + cast to bf16 (halves all im2col / activation bytes;
    # MXU math is bf16 x bf16 with f32 accumulation either way).
    x = jnp.transpose(x_nchw, (0, 2, 3, 1)).astype(jnp.bfloat16)    # NCHW -> NHWC
    # conv1: 4->32 (out lanes padded to 128), k=8, s=4, ReLU. M=800 -> 4 M-tiles
    # (DMA/compute overlap on v5e/v6e; 2 tiles per TensorCore on v7x).
    p, (B, oh, ow) = im2col(x, 8, 4)                                # [800, 256]
    h = pallas_gemm(p, params["w1"], relu=True, m_tiles=4)          # [800, 128] bf16
    h = h[:, :32].reshape(B, oh, ow, 32)                            # drop pad lanes
    # conv2: 32->64 (out lanes padded to 128), k=4, s=2, ReLU. K=512 -> 2x256 reduction.
    p, (B, oh, ow) = im2col(h, 4, 2)                                # [162, 512]
    h = pallas_gemm(p, params["w2"], relu=True, k_tiles=2)          # [162, 128] bf16
    h = h[:, :64].reshape(B, oh, ow, 64)                            # drop pad lanes
    # conv3: 64->64, k=3, s=1, ReLU (N stays 64 on purpose: padding it would
    # double the dominant 3.2 MB hidden-weight DMA).
    p, (B, oh, ow) = im2col(h, 3, 1)                                # [98, 576]
    h = pallas_gemm(p, params["w3"], relu=True)                     # [98, 64] bf16
    # NHWC flatten is a pure row-major reshape (wh rows were permuted at init to
    # match PyTorch's (C,H,W) view-flatten); zero-pad features to F_PAD so the
    # head's K-reduction chunks are 128-lane aligned.
    h = h.reshape(B, oh * ow * 64)                                  # [B, 3136]
    h = jnp.pad(h, ((0, 0), (0, F_PAD - F_FLAT)))                   # [B, 3584]
    # fused hidden(ReLU) + output head, pipelined over 4 feature chunks.
    out = pallas_mlp_head(h, params["w_hidden"], params["w_out"])   # [B, 128] f32
    return out[:, :action_n]
    # TODO(synk): im2col patch extraction + the single NCHW->NHWC transpose stay as
    # XLA glue; fusing the kh*kw tap reduction into the GEMM grid (never
    # materializing patch matrices in HBM) was judged too lowering-fragile.


if __name__ == "__main__":
    ACTION_N = 6
    B = 2
    key = jax.random.PRNGKey(0)
    k_params, k_input = jax.random.split(key)

    params = init_params(k_params, ACTION_N)
    x = jax.random.uniform(k_input, (B, 4, 84, 84), jnp.float32)

    fwd = jax.jit(functools.partial(function_approximation_forward,
                                    action_n=ACTION_N))
    out = jax.block_until_ready(fwd(x, params))

    assert out.shape == (B, ACTION_N), out.shape
    assert bool(jnp.all(jnp.isfinite(out)))
    print("KERNEL_OK")
</pallas_src>

<mosaic_0001>
module attributes {stable_mosaic.version = 11 : i64} {
  func.func @_gemm_relu_kernel(%arg0: i32, %arg1: i32, %arg2: memref<200x256xbf16, #tpu.memory_space<vmem>>, %arg3: memref<256x128xbf16, #tpu.memory_space<vmem>>, %arg4: memref<200x128xbf16, #tpu.memory_space<vmem>>, %arg5: memref<200x128xf32, #tpu.memory_space<vmem>>) attributes {dimension_semantics = [#tpu.dimension_semantics<parallel>, #tpu.dimension_semantics<arbitrary>], iteration_bounds = array<i64: 4, 1>, scalar_prefetch = 0 : i64, scratch_operands = 1 : i64, tpu.core_type = #tpu.core_type<tc>, window_params = [{transform_indices = @transform_0, window_bounds = array<i64: 200, 256>}, {transform_indices = @transform_1, window_bounds = array<i64: 256, 128>}, {transform_indices = @transform_2, window_bounds = array<i64: 200, 128>}]} {
    %c0_i32 = arith.constant 0 : i32
    %0 = arith.cmpi eq, %arg1, %c0_i32 : i32
    %1 = arith.extui %0 : i1 to i32
    %c0_i32_0 = arith.constant 0 : i32
    %2 = arith.cmpi ne, %1, %c0_i32_0 : i32
    scf.if %2 {
      %cst_10 = arith.constant 0.000000e+00 : f32
      %12 = vector.broadcast %cst_10 : f32 to vector<200x128xf32>
      %c0_11 = arith.constant 0 : index
      %c0_12 = arith.constant 0 : index
      %13 = vector.load %arg5[%c0_11, %c0_12] : memref<200x128xf32, #tpu.memory_space<vmem>>, vector<200x128xf32>
      tpu.vector_store %arg5[%c0_11, %c0_12], %12 {strides = array<i32>} : memref<200x128xf32, #tpu.memory_space<vmem>>, vector<200x128xf32>,
    } else {
    }
    %c0 = arith.constant 0 : index
    %c0_1 = arith.constant 0 : index
    %3 = vector.load %arg2[%c0, %c0_1] : memref<200x256xbf16, #tpu.memory_space<vmem>>, vector<200x256xbf16>
    %c0_2 = arith.constant 0 : index
    %c0_3 = arith.constant 0 : index
    %4 = vector.load %arg5[%c0_2, %c0_3] : memref<200x128xf32, #tpu.memory_space<vmem>>, vector<200x128xf32>
    %c0_4 = arith.constant 0 : index
    %c0_5 = arith.constant 0 : index
    %5 = vector.load %arg3[%c0_4, %c0_5] : memref<256x128xbf16, #tpu.memory_space<vmem>>, vector<256x128xbf16>
    %cst = arith.constant dense<0.000000e+00> : vector<200x128xf32>
    %6 = tpu.matmul %3, %5, %cst {dimension_numbers = #tpu.dot_dimension_numbers<[1], [0], [0], [1], [0, 0, 1, 1], [], []>} : vector<200x256xbf16>, vector<256x128xbf16>, vector<200x128xf32> -> vector<200x128xf32>
    %7 = arith.addf %4, %6 : vector<200x128xf32>
    %c0_6 = arith.constant 0 : index
    %c0_7 = arith.constant 0 : index
    %8 = vector.load %arg5[%c0_6, %c0_7] : memref<200x128xf32, #tpu.memory_space<vmem>>, vector<200x128xf32>
    tpu.vector_store %arg5[%c0_6, %c0_7], %7 {strides = array<i32>} : memref<200x128xf32, #tpu.memory_space<vmem>>, vector<200x128xf32>,
    %c0_i32_8 = arith.constant 0 : i32
    %9 = arith.cmpi eq, %arg1, %c0_i32_8 : i32
    %10 = arith.extui %9 : i1 to i32
    %c0_i32_9 = arith.constant 0 : i32
    %11 = arith.cmpi ne, %10, %c0_i32_9 : i32
    scf.if %11 {
      %c0_10 = arith.constant 0 : index
      %c0_11 = arith.constant 0 : index
      %12 = vector.load %arg5[%c0_10, %c0_11] : memref<200x128xf32, #tpu.memory_space<vmem>>, vector<200x128xf32>
      %cst_12 = arith.constant 0.000000e+00 : f32
      %13 = vector.broadcast %cst_12 : f32 to vector<200x128xf32>
      %14 = arith.maximumf %12, %13 : vector<200x128xf32>
      %15 = arith.truncf %14 : vector<200x128xf32> to vector<200x128xbf16>
      %c0_13 = arith.constant 0 : index
      %c0_14 = arith.constant 0 : index
      %16 = vector.load %arg4[%c0_13, %c0_14] : memref<200x128xbf16, #tpu.memory_space<vmem>>, vector<200x128xbf16>
      tpu.vector_store %arg4[%c0_13, %c0_14], %15 {strides = array<i32>} : memref<200x128xbf16, #tpu.memory_space<vmem>>, vector<200x128xbf16>,
    } else {
    }
    return
  }
  func.func @transform_0(%arg0: i32, %arg1: i32) -> (i32, i32) {
    %c0_i32 = arith.constant 0 : i32
    return %arg0, %arg1 : i32, i32
  }
  func.func @transform_1(%arg0: i32, %arg1: i32) -> (i32, i32) {
    %c0_i32 = arith.constant 0 : i32
    %c0_i32_0 = arith.constant 0 : i32
    return %arg1, %c0_i32 : i32, i32
  }
  func.func @transform_2(%arg0: i32, %arg1: i32) -> (i32, i32) {
    %c0_i32 = arith.constant 0 : i32
    %c0_i32_0 = arith.constant 0 : i32
    return %arg0, %c0_i32 : i32, i32
  }
}

module attributes {stable_mosaic.version = 11 : i64} {
  func.func @_gemm_relu_kernel(%arg0: i32, %arg1: i32, %arg2: memref<162x256xbf16, #tpu.memory_space<vmem>>, %arg3: memref<256x128xbf16, #tpu.memory_space<vmem>>, %arg4: memref<162x128xbf16, #tpu.memory_space<vmem>>, %arg5: memref<162x128xf32, #tpu.memory_space<vmem>>) attributes {dimension_semantics = [#tpu.dimension_semantics<parallel>, #tpu.dimension_semantics<arbitrary>], iteration_bounds = array<i64: 1, 2>, scalar_prefetch = 0 : i64, scratch_operands = 1 : i64, tpu.core_type = #tpu.core_type<tc>, window_params = [{transform_indices = @transform_0, window_bounds = array<i64: 162, 256>}, {transform_indices = @transform_1, window_bounds = array<i64: 256, 128>}, {transform_indices = @transform_2, window_bounds = array<i64: 162, 128>}]} {
    %c0_i32 = arith.constant 0 : i32
    %0 = arith.cmpi eq, %arg1, %c0_i32 : i32
    %1 = arith.extui %0 : i1 to i32
    %c0_i32_0 = arith.constant 0 : i32
    %2 = arith.cmpi ne, %1, %c0_i32_0 : i32
    scf.if %2 {
      %cst_9 = arith.constant 0.000000e+00 : f32
      %12 = vector.broadcast %cst_9 : f32 to vector<162x128xf32>
      %c0_10 = arith.constant 0 : index
      %c0_11 = arith.constant 0 : index
      %13 = vector.load %arg5[%c0_10, %c0_11] : memref<162x128xf32, #tpu.memory_space<vmem>>, vector<162x128xf32>
      tpu.vector_store %arg5[%c0_10, %c0_11], %12 {strides = array<i32>} : memref<162x128xf32, #tpu.memory_space<vmem>>, vector<162x128xf32>,
    } else {
    }
    %c0 = arith.constant 0 : index
    %c0_1 = arith.constant 0 : index
    %3 = vector.load %arg2[%c0, %c0_1] : memref<162x256xbf16, #tpu.memory_space<vmem>>, vector<162x256xbf16>
    %c0_2 = arith.constant 0 : index
    %c0_3 = arith.constant 0 : index
    %4 = vector.load %arg5[%c0_2, %c0_3] : memref<162x128xf32, #tpu.memory_space<vmem>>, vector<162x128xf32>
    %c0_4 = arith.constant 0 : index
    %c0_5 = arith.constant 0 : index
    %5 = vector.load %arg3[%c0_4, %c0_5] : memref<256x128xbf16, #tpu.memory_space<vmem>>, vector<256x128xbf16>
    %cst = arith.constant dense<0.000000e+00> : vector<162x128xf32>
    %6 = tpu.matmul %3, %5, %cst {dimension_numbers = #tpu.dot_dimension_numbers<[1], [0], [0], [1], [0, 0, 1, 1], [], []>} : vector<162x256xbf16>, vector<256x128xbf16>, vector<162x128xf32> -> vector<162x128xf32>
    %7 = arith.addf %4, %6 : vector<162x128xf32>
    %c0_6 = arith.constant 0 : index
    %c0_7 = arith.constant 0 : index
    %8 = vector.load %arg5[%c0_6, %c0_7] : memref<162x128xf32, #tpu.memory_space<vmem>>, vector<162x128xf32>
    tpu.vector_store %arg5[%c0_6, %c0_7], %7 {strides = array<i32>} : memref<162x128xf32, #tpu.memory_space<vmem>>, vector<162x128xf32>,
    %c1_i32 = arith.constant 1 : i32
    %9 = arith.cmpi eq, %arg1, %c1_i32 : i32
    %10 = arith.extui %9 : i1 to i32
    %c0_i32_8 = arith.constant 0 : i32
    %11 = arith.cmpi ne, %10, %c0_i32_8 : i32
    scf.if %11 {
      %c0_9 = arith.constant 0 : index
      %c0_10 = arith.constant 0 : index
      %12 = vector.load %arg5[%c0_9, %c0_10] : memref<162x128xf32, #tpu.memory_space<vmem>>, vector<162x128xf32>
      %cst_11 = arith.constant 0.000000e+00 : f32
      %13 = vector.broadcast %cst_11 : f32 to vector<162x128xf32>
      %14 = arith.maximumf %12, %13 : vector<162x128xf32>
      %15 = arith.truncf %14 : vector<162x128xf32> to vector<162x128xbf16>
      %c0_12 = arith.constant 0 : index
      %c0_13 = arith.constant 0 : index
      %16 = vector.load %arg4[%c0_12, %c0_13] : memref<162x128xbf16, #tpu.memory_space<vmem>>, vector<162x128xbf16>
      tpu.vector_store %arg4[%c0_12, %c0_13], %15 {strides = array<i32>} : memref<162x128xbf16, #tpu.memory_space<vmem>>, vector<162x128xbf16>,
    } else {
    }
    return
  }
  func.func @transform_0(%arg0: i32, %arg1: i32) -> (i32, i32) {
    %c0_i32 = arith.constant 0 : i32
    return %arg0, %arg1 : i32, i32
  }
  func.func @transform_1(%arg0: i32, %arg1: i32) -> (i32, i32) {
    %c0_i32 = arith.constant 0 : i32
    %c0_i32_0 = arith.constant 0 : i32
    return %arg1, %c0_i32 : i32, i32
  }
  func.func @transform_2(%arg0: i32, %arg1: i32) -> (i32, i32) {
    %c0_i32 = arith.constant 0 : i32
    %c0_i32_0 = arith.constant 0 : i32
    return %arg0, %c0_i32 : i32, i32
  }
}

module attributes {stable_mosaic.version = 11 : i64} {
  func.func @_gemm_relu_kernel(%arg0: i32, %arg1: i32, %arg2: memref<98x576xbf16, #tpu.memory_space<vmem>>, %arg3: memref<576x64xbf16, #tpu.memory_space<vmem>>, %arg4: memref<98x64xbf16, #tpu.memory_space<vmem>>, %arg5: memref<98x64xf32, #tpu.memory_space<vmem>>) attributes {dimension_semantics = [#tpu.dimension_semantics<parallel>, #tpu.dimension_semantics<arbitrary>], iteration_bounds = array<i64: 1, 1>, scalar_prefetch = 0 : i64, scratch_operands = 1 : i64, tpu.core_type = #tpu.core_type<tc>, window_params = [{transform_indices = @transform_0, window_bounds = array<i64: 98, 576>}, {transform_indices = @transform_1, window_bounds = array<i64: 576, 64>}, {transform_indices = @transform_2, window_bounds = array<i64: 98, 64>}]} {
    %c0_i32 = arith.constant 0 : i32
    %0 = arith.cmpi eq, %arg1, %c0_i32 : i32
    %1 = arith.extui %0 : i1 to i32
    %c0_i32_0 = arith.constant 0 : i32
    %2 = arith.cmpi ne, %1, %c0_i32_0 : i32
    scf.if %2 {
      %cst_10 = arith.constant 0.000000e+00 : f32
      %12 = vector.broadcast %cst_10 : f32 to vector<98x64xf32>
      %c0_11 = arith.constant 0 : index
      %c0_12 = arith.constant 0 : index
      %13 = vector.load %arg5[%c0_11, %c0_12] : memref<98x64xf32, #tpu.memory_space<vmem>>, vector<98x64xf32>
      tpu.vector_store %arg5[%c0_11, %c0_12], %12 {strides = array<i32>} : memref<98x64xf32, #tpu.memory_space<vmem>>, vector<98x64xf32>,
    } else {
    }
    %c0 = arith.constant 0 : index
    %c0_1 = arith.constant 0 : index
    %3 = vector.load %arg2[%c0, %c0_1] : memref<98x576xbf16, #tpu.memory_space<vmem>>, vector<98x576xbf16>
    %c0_2 = arith.constant 0 : index
    %c0_3 = arith.constant 0 : index
    %4 = vector.load %arg5[%c0_2, %c0_3] : memref<98x64xf32, #tpu.memory_space<vmem>>, vector<98x64xf32>
    %c0_4 = arith.constant 0 : index
    %c0_5 = arith.constant 0 : index
    %5 = vector.load %arg3[%c0_4, %c0_5] : memref<576x64xbf16, #tpu.memory_space<vmem>>, vector<576x64xbf16>
    %cst = arith.constant dense<0.000000e+00> : vector<98x64xf32>
    %6 = tpu.matmul %3, %5, %cst {dimension_numbers = #tpu.dot_dimension_numbers<[1], [0], [0], [1], [0, 0, 1, 1], [], []>} : vector<98x576xbf16>, vector<576x64xbf16>, vector<98x64xf32> -> vector<98x64xf32>
    %7 = arith.addf %4, %6 : vector<98x64xf32>
    %c0_6 = arith.constant 0 : index
    %c0_7 = arith.constant 0 : index
    %8 = vector.load %arg5[%c0_6, %c0_7] : memref<98x64xf32, #tpu.memory_space<vmem>>, vector<98x64xf32>
    tpu.vector_store %arg5[%c0_6, %c0_7], %7 {strides = array<i32>} : memref<98x64xf32, #tpu.memory_space<vmem>>, vector<98x64xf32>,
    %c0_i32_8 = arith.constant 0 : i32
    %9 = arith.cmpi eq, %arg1, %c0_i32_8 : i32
    %10 = arith.extui %9 : i1 to i32
    %c0_i32_9 = arith.constant 0 : i32
    %11 = arith.cmpi ne, %10, %c0_i32_9 : i32
    scf.if %11 {
      %c0_10 = arith.constant 0 : index
      %c0_11 = arith.constant 0 : index
      %12 = vector.load %arg5[%c0_10, %c0_11] : memref<98x64xf32, #tpu.memory_space<vmem>>, vector<98x64xf32>
      %cst_12 = arith.constant 0.000000e+00 : f32
      %13 = vector.broadcast %cst_12 : f32 to vector<98x64xf32>
      %14 = arith.maximumf %12, %13 : vector<98x64xf32>
      %15 = arith.truncf %14 : vector<98x64xf32> to vector<98x64xbf16>
      %c0_13 = arith.constant 0 : index
      %c0_14 = arith.constant 0 : index
      %16 = vector.load %arg4[%c0_13, %c0_14] : memref<98x64xbf16, #tpu.memory_space<vmem>>, vector<98x64xbf16>
      tpu.vector_store %arg4[%c0_13, %c0_14], %15 {strides = array<i32>} : memref<98x64xbf16, #tpu.memory_space<vmem>>, vector<98x64xbf16>,
    } else {
    }
    return
  }
  func.func @transform_0(%arg0: i32, %arg1: i32) -> (i32, i32) {
    %c0_i32 = arith.constant 0 : i32
    return %arg0, %arg1 : i32, i32
  }
  func.func @transform_1(%arg0: i32, %arg1: i32) -> (i32, i32) {
    %c0_i32 = arith.constant 0 : i32
    %c0_i32_0 = arith.constant 0 : i32
    return %arg1, %c0_i32 : i32, i32
  }
  func.func @transform_2(%arg0: i32, %arg1: i32) -> (i32, i32) {
    %c0_i32 = arith.constant 0 : i32
    %c0_i32_0 = arith.constant 0 : i32
    return %arg0, %c0_i32 : i32, i32
  }
}

module attributes {stable_mosaic.version = 11 : i64} {
  func.func @_mlp_head_kernel(%arg0: i32, %arg1: memref<2x896xbf16, #tpu.memory_space<vmem>>, %arg2: memref<896x512xbf16, #tpu.memory_space<vmem>>, %arg3: memref<512x128xbf16, #tpu.memory_space<vmem>>, %arg4: memref<2x128xf32, #tpu.memory_space<vmem>>, %arg5: memref<2x512xf32, #tpu.memory_space<vmem>>) attributes {dimension_semantics = [#tpu.dimension_semantics<arbitrary>], iteration_bounds = array<i64: 4>, scalar_prefetch = 0 : i64, scratch_operands = 1 : i64, tpu.core_type = #tpu.core_type<tc>, window_params = [{transform_indices = @transform_0, window_bounds = array<i64: 2, 896>}, {transform_indices = @transform_1, window_bounds = array<i64: 896, 512>}, {pipeline_mode = #tpu.pipeline_mode<synchronous>, transform_indices = @transform_2, window_bounds = array<i64: 512, 128>}, {pipeline_mode = #tpu.pipeline_mode<synchronous>, transform_indices = @transform_3, window_bounds = array<i64: 2, 128>}]} {
    %c0_i32 = arith.constant 0 : i32
    %0 = arith.cmpi eq, %arg0, %c0_i32 : i32
    %1 = arith.extui %0 : i1 to i32
    %c0_i32_0 = arith.constant 0 : i32
    %2 = arith.cmpi ne, %1, %c0_i32_0 : i32
    scf.if %2 {
      %cst_9 = arith.constant 0.000000e+00 : f32
      %12 = vector.broadcast %cst_9 : f32 to vector<2x512xf32>
      %c0_10 = arith.constant 0 : index
      %c0_11 = arith.constant 0 : index
      %13 = vector.load %arg5[%c0_10, %c0_11] : memref<2x512xf32, #tpu.memory_space<vmem>>, vector<2x512xf32>
      tpu.vector_store %arg5[%c0_10, %c0_11], %12 {strides = array<i32>} : memref<2x512xf32, #tpu.memory_space<vmem>>, vector<2x512xf32>,
    } else {
    }
    %c0 = arith.constant 0 : index
    %c0_1 = arith.constant 0 : index
    %3 = vector.load %arg1[%c0, %c0_1] : memref<2x896xbf16, #tpu.memory_space<vmem>>, vector<2x896xbf16>
    %c0_2 = arith.constant 0 : index
    %c0_3 = arith.constant 0 : index
    %4 = vector.load %arg5[%c0_2, %c0_3] : memref<2x512xf32, #tpu.memory_space<vmem>>, vector<2x512xf32>
    %c0_4 = arith.constant 0 : index
    %c0_5 = arith.constant 0 : index
    %5 = vector.load %arg2[%c0_4, %c0_5] : memref<896x512xbf16, #tpu.memory_space<vmem>>, vector<896x512xbf16>
    %cst = arith.constant dense<0.000000e+00> : vector<2x512xf32>
    %6 = tpu.matmul %3, %5, %cst {dimension_numbers = #tpu.dot_dimension_numbers<[1], [0], [0], [1], [0, 0, 1, 1], [], []>} : vector<2x896xbf16>, vector<896x512xbf16>, vector<2x512xf32> -> vector<2x512xf32>
    %7 = arith.addf %4, %6 : vector<2x512xf32>
    %c0_6 = arith.constant 0 : index
    %c0_7 = arith.constant 0 : index
    %8 = vector.load %arg5[%c0_6, %c0_7] : memref<2x512xf32, #tpu.memory_space<vmem>>, vector<2x512xf32>
    tpu.vector_store %arg5[%c0_6, %c0_7], %7 {strides = array<i32>} : memref<2x512xf32, #tpu.memory_space<vmem>>, vector<2x512xf32>,
    %c3_i32 = arith.constant 3 : i32
    %9 = arith.cmpi eq, %arg0, %c3_i32 : i32
    %10 = arith.extui %9 : i1 to i32
    %c0_i32_8 = arith.constant 0 : i32
    %11 = arith.cmpi ne, %10, %c0_i32_8 : i32
    scf.if %11 {
      %c0_9 = arith.constant 0 : index
      %c0_10 = arith.constant 0 : index
      %12 = vector.load %arg5[%c0_9, %c0_10] : memref<2x512xf32, #tpu.memory_space<vmem>>, vector<2x512xf32>
      %cst_11 = arith.constant 0.000000e+00 : f32
      %13 = vector.broadcast %cst_11 : f32 to vector<2x512xf32>
      %14 = arith.maximumf %12, %13 : vector<2x512xf32>
      %15 = arith.truncf %14 : vector<2x512xf32> to vector<2x512xbf16>
      %c0_12 = arith.constant 0 : index
      %c0_13 = arith.constant 0 : index
      %16 = vector.load %arg3[%c0_12, %c0_13] : memref<512x128xbf16, #tpu.memory_space<vmem>>, vector<512x128xbf16>
      %cst_14 = arith.constant dense<0.000000e+00> : vector<2x128xf32>
      %17 = tpu.matmul %15, %16, %cst_14 {dimension_numbers = #tpu.dot_dimension_numbers<[1], [0], [0], [1], [0, 0, 1, 1], [], []>} : vector<2x512xbf16>, vector<512x128xbf16>, vector<2x128xf32> -> vector<2x128xf32>
      %c0_15 = arith.constant 0 : index
      %c0_16 = arith.constant 0 : index
      %18 = vector.load %arg4[%c0_15, %c0_16] : memref<2x128xf32, #tpu.memory_space<vmem>>, vector<2x128xf32>
      tpu.vector_store %arg4[%c0_15, %c0_16], %17 {strides = array<i32>} : memref<2x128xf32, #tpu.memory_space<vmem>>, vector<2x128xf32>,
    } else {
    }
    return
  }
  func.func @transform_0(%arg0: i32) -> (i32, i32) {
    %c0_i32 = arith.constant 0 : i32
    %c0_i32_0 = arith.constant 0 : i32
    return %c0_i32, %arg0 : i32, i32
  }
  func.func @transform_1(%arg0: i32) -> (i32, i32) {
    %c0_i32 = arith.constant 0 : i32
    %c0_i32_0 = arith.constant 0 : i32
    return %arg0, %c0_i32 : i32, i32
  }
  func.func @transform_2(%arg0: i32) -> (i32, i32) {
    %c0_i32 = arith.constant 0 : i32
    %c0_i32_0 = arith.constant 0 : i32
    %c0_i32_1 = arith.constant 0 : i32
    return %c0_i32, %c0_i32_0 : i32, i32
  }
  func.func @transform_3(%arg0: i32) -> (i32, i32) {
    %c0_i32 = arith.constant 0 : i32
    %c0_i32_0 = arith.constant 0 : i32
    %c0_i32_1 = arith.constant 0 : i32
    return %c0_i32, %c0_i32_0 : i32, i32
  }
}

</mosaic_0001>

<bundles_post_ra>
// kernel: function_approximation_forward.4
= control target key start
LH: loop header
LB: loop body
LE: loop exit
PB: predicated region body
PF: predicated region fallthrough
CT: control target
= control target key end

     0   :  { %s1388_s9 = smov 0   ;;  %s1390_s10 = smov 0   ;;  %s1515_s0 = inlined_call_operand.vmem [shape: bf16[800,256], index: 0, kind: input, shape index: {}]   ;;  %s1516_s1 = inlined_call_operand.vmem [shape: bf16[256,128], index: 1, kind: input, shape index: {}]   ;;  %s1517_s2 = inlined_call_operand.vmem [shape: bf16[800,128], index: 2, kind: output, shape index: {}]  }
   0x1   :  { %s1392_s11 = smov 0  }
   0x2 LB: > { %s24_s12 = sadd.s32 1, %s1367_s10  ;;  %p991_p0 = scmp.ge.s32.totalorder %s1371_s11, 1  ;;  %s1371_s11 = sphi %s1392_s11, %s12_s11   ;;  %s1367_s10 = sphi %s1390_s10, %s1519_s10   ;;  %s1363_s9 = sphi %s1388_s9, %s1518_s9  }
   0x3   : > { %p26_p1 = scmp.ge.s32.totalorder %s24_s12, 4  ;;  %p144_p2 = scmp.lt.s32.totalorder %s1371_s11, 5 }
   0x5   : > { %s1521_s12 = smov (%p26_p1, %s24_s12), 0  ;;  %p145_p3 = pnand %p991_p0, %p144_p2 }
   0x6   : > { %v1295_v0 = vld [vmem:[%s1516_s1 + $0x40] sm:$0xff] (!%p145_p3)   ;;  %s176_s15 = smul.u32 (!%p145_p3), 25, %s1363_s9  ;;  %v1297_v2 = vld [vmem:[%s1516_s1 + $0x48] sm:$0xff] (!%p145_p3)   ;;  %v1299_v4 = vld [vmem:[%s1516_s1 + $0x50] sm:$0xff] (!%p145_p3)  }
   0x7   : > { %148 = sbr.rel (%p145_p3) target bundleno = 309 (0x135), region = 28  ;;  %v1296_v1 = vld [vmem:[%s1516_s1] sm:$0xff] (!%p145_p3)   ;;  %1161 = vmatprep.subr.bf16.mxu0 (!%p145_p3), %v1295_v0  ;;  %1255 = vmatprep.subr.bf16.mxu1 (!%p145_p3), %v1295_v0  ;;  %v1298_v3 = vld [vmem:[%s1516_s1 + $0x8] sm:$0xff] (!%p145_p3)   ;;  %v1300_v5 = vld [vmem:[%s1516_s1 + $0x10] sm:$0xff] (!%p145_p3)  }
   0x8   : > { %1162 = vmatpush3.bf16.msra.mxu0 (!%p145_p3), %v1296_v1  ;;  %1263 = vmatpush3.bf16.msra.mxu1 (!%p145_p3), %v1296_v1  ;;  %p178_p4 = scmp.lt.s32.totalorder (!%p145_p3), %s176_s15, 99  ;;  %v1301_v6 = vld [vmem:[%s1516_s1 + $0x58] sm:$0xff] (!%p145_p3)   ;;  %v1303_v8 = vld [vmem:[%s1516_s1 + $0x60] sm:$0xff] (!%p145_p3)   ;;  %v1305_v10 = vld [vmem:[%s1516_s1 + $0x68] sm:$0xff] (!%p145_p3)  }
   0x9   : > { %1163 = vmatprep.subr.bf16.mxu0 (!%p145_p3), %v1297_v2  ;;  %1256 = vmatprep.subr.bf16.mxu1 (!%p145_p3), %v1297_v2  ;;  %v1302_v7 = vld [vmem:[%s1516_s1 + $0x18] sm:$0xff] (!%p145_p3)   ;;  %v1304_v9 = vld [vmem:[%s1516_s1 + $0x20] sm:$0xff] (!%p145_p3)   ;;  %v1306_v13 = vld [vmem:[%s1516_s1 + $0x28] sm:$0xff] (!%p145_p3)  }
   0xa   : > { %v1307_v14 = vld [vmem:[%s1516_s1 + $0x70] sm:$0xff] (!%p145_p3)   ;;  %v1309_v16 = vld [vmem:[%s1516_s1 + $0x78] sm:$0xff] (!%p145_p3)  }
   0xb   : > { %v1308_v15 = vld [vmem:[%s1516_s1 + $0x30] sm:$0xff] (!%p145_p3)   ;;  %v1310_v17 = vld [vmem:[%s1516_s1 + $0x38] sm:$0xff] (!%p145_p3)  }
   0xc   : > { %1164 = vmatpush3.bf16.msra.mxu0 (!%p145_p3), %v1298_v3  ;;  %1264 = vmatpush3.bf16.msra.mxu1 (!%p145_p3), %v1298_v3 }
   0xd   : > { %1165 = vmatprep.subr.bf16.mxu0 (!%p145_p3), %v1299_v4  ;;  %1257 = vmatprep.subr.bf16.mxu1 (!%p145_p3), %v1299_v4 }
   0xe   : > { %s1523_s15 = smov (!%p178_p4, %s176_s15), 99 }
   0xf   : > { %s1064_s30 = sshll.u32 %s1523_s15, 3  ;;  %s994_s26 = sshll.u32 %s1523_s15, 2 }
  0x10   : > { %1166 = vmatpush3.bf16.msra.mxu0 %v1300_v5  ;;  %1265 = vmatpush3.bf16.msra.mxu1 %v1300_v5  ;;  %s1439_s7 = scalar_lea.vmem %s1515_s0, %s1064_s30  ;;  %s1491_s29 = scalar_lea.vmem %s1517_s2, %s994_s26 }
  0x11   : > { %1167 = vmatprep.subr.bf16.mxu0 %v1301_v6  ;;  %1258 = vmatprep.subr.bf16.mxu1 %v1301_v6  ;;  %v1313_v11 = vld [vmem:[%s1439_s7 + $0x4] ss:$8 sps:$4 sm:$0xff]   ;;  %v1316_v12 = vld [vmem:[%s1439_s7 + $0x74] ss:$8 sps:$4 sm:$0xff]   ;;  %v1311_v18 = vld [vmem:[%s1439_s7] ss:$8 sps:$4 sm:$0xff]  }
  0x12   : > { %567 = vmatprep.mubr.bf16.mxu0 %v1313_v11  ;;  %623 = vmatprep.mubr.bf16.mxu1 %v1316_v12  ;;  %v1314_v19 = vld [vmem:[%s1439_s7 + $0x70] ss:$8 sps:$4 sm:$0xff]   ;;  %v1317_v20 = vld [vmem:[%s1439_s7 + $0x14] ss:$8 sps:$4 sm:$0xff]   ;;  %v1320_v21 = vld [vmem:[%s1439_s7 + $0x84] ss:$8 sps:$4 sm:$0xff]  }
  0x13   : > { %v1319_v22 = vld [vmem:[%s1439_s7 + $0x10] ss:$8 sps:$4 sm:$0xff]   ;;  %v1324_v23 = vld [vmem:[%s1439_s7 + $0x80] ss:$8 sps:$4 sm:$0xff]   ;;  %v1322_v24 = vld [vmem:[%s1439_s7 + $0x24] ss:$8 sps:$4 sm:$0xff]  }
  0x14   : > { %1168 = vmatpush3.bf16.msra.mxu0 %v1302_v7  ;;  %1266 = vmatpush3.bf16.msra.mxu1 %v1302_v7  ;;  %v1326_v25 = vld [vmem:[%s1439_s7 + $0x94] ss:$8 sps:$4 sm:$0xff]   ;;  %v1325_v26 = vld [vmem:[%s1439_s7 + $0x20] ss:$8 sps:$4 sm:$0xff]   ;;  %v1330_v27 = vld [vmem:[%s1439_s7 + $0x90] ss:$8 sps:$4 sm:$0xff]  }
  0x15   : > { %1169 = vmatprep.subr.bf16.mxu0 %v1303_v8  ;;  %1259 = vmatprep.subr.bf16.mxu1 %v1303_v8  ;;  %v1328_v28 = vld [vmem:[%s1439_s7 + $0x34] ss:$8 sps:$4 sm:$0xff]   ;;  %v1332_v29 = vld [vmem:[%s1439_s7 + $0xa4] ss:$8 sps:$4 sm:$0xff]   ;;  %v1331_v30 = vld [vmem:[%s1439_s7 + $0x30] ss:$8 sps:$4 sm:$0xff]  }
  0x16   : > { %v1336_v31 = vld [vmem:[%s1439_s7 + $0xa0] ss:$8 sps:$4 sm:$0xff]   ;;  %v1334_v32 = vld [vmem:[%s1439_s7 + $0x44] ss:$8 sps:$4 sm:$0xff]   ;;  %v1338_v33 = vld [vmem:[%s1439_s7 + $0xb4] ss:$8 sps:$4 sm:$0xff]  }
  0x17   : > { %v254_v34 = vld [vmem:[%s1439_s7 + $0xc0] sm:$0xff]  ;;  %v1342_v36 = vld [vmem:[%s1439_s7 + $0xb0] ss:$8 sps:$4 sm:$0xff]   ;;  %v1340_v37 = vld [vmem:[%s1439_s7 + $0x54] ss:$8 sps:$4 sm:$0xff]  }
  0x18   : > { %1170 = vmatpush3.bf16.msra.mxu0 %v1304_v9  ;;  %1267 = vmatpush3.bf16.msra.mxu1 %v1304_v9  ;;  %v1337_v35 = vld [vmem:[%s1439_s7 + $0x40] ss:$8 sps:$4 sm:$0xff]   ;;  %v1020_v38 = vcombine.high %v254_v34, %v254_v34  ;;  %v1343_v39 = vld [vmem:[%s1439_s7 + $0x50] ss:$8 sps:$4 sm:$0xff]   ;;  %v1019_v40 = vcombine.low %v254_v34, %v254_v34  ;;  %v1345_v41 = vld [vmem:[%s1439_s7 + $0x64] ss:$8 sps:$4 sm:$0xff]  }
  0x19   : > { %1171 = vmatprep.subr.bf16.mxu0 %v1305_v10  ;;  %1260 = vmatprep.subr.bf16.mxu1 %v1305_v10  ;;  %v1348_v42 = vld [vmem:[%s1439_s7 + $0x60] ss:$8 sps:$4 sm:$0xff]  }
  0x1c   : > { %1172 = vmatpush3.bf16.msra.mxu0 %v1306_v13  ;;  %1268 = vmatpush3.bf16.msra.mxu1 %v1306_v13 }
  0x1d   : > { %1173 = vmatprep.subr.bf16.mxu0 %v1307_v14  ;;  %1261 = vmatprep.subr.bf16.mxu1 %v1307_v14 }
  0x20   : > { %1174 = vmatpush3.bf16.msra.mxu0 %v1308_v15  ;;  %1269 = vmatpush3.bf16.msra.mxu1 %v1308_v15 }
  0x21   : > { %1175 = vmatprep.subr.bf16.mxu0 %v1309_v16  ;;  %1262 = vmatprep.subr.bf16.mxu1 %v1309_v16 }
  0x24   : > { %1176 = vmatpush3.bf16.msra.mxu0 %v1310_v17  ;;  %1270 = vmatpush3.bf16.msra.mxu1 %v1310_v17 }
  0x27   : > { %568 = vmatmul.mubr.bf16.vlgmr.msra.gmra.mrb[0].mxu0 %v1311_v18  ;;  %624 = vmatmul.mubr.bf16.vlgmr.msra.gmra.mrb[0].mxu1 %v1314_v19 }
  0x28   : > { %575 = vmatprep.mubr.bf16.mxu0 %v1317_v20  ;;  %631 = vmatprep.mubr.bf16.mxu1 %v1320_v21 }
  0x2f   : > { %576 = vmatmul.mubr.bf16.gmra.mrb[4].mxu0 %v1319_v22  ;;  %632 = vmatmul.mubr.bf16.gmra.mrb[4].mxu1 %v1324_v23 }
  0x30   : > { %583 = vmatprep.mubr.bf16.mxu0 %v1322_v24  ;;  %639 = vmatprep.mubr.bf16.mxu1 %v1326_v25 }
  0x37   : > { %584 = vmatmul.mubr.bf16.gmra.mrb[8].mxu0 %v1325_v26  ;;  %640 = vmatmul.mubr.bf16.gmra.mrb[8].mxu1 %v1330_v27 }
  0x38   : > { %591 = vmatprep.mubr.bf16.mxu0 %v1328_v28  ;;  %647 = vmatprep.mubr.bf16.mxu1 %v1332_v29 }
  0x3f   : > { %592 = vmatmul.mubr.bf16.gmra.mrb[12].mxu0 %v1331_v30  ;;  %648 = vmatmul.mubr.bf16.gmra.mrb[12].mxu1 %v1336_v31 }
  0x40   : > { %599 = vmatprep.mubr.bf16.mxu0 %v1334_v32  ;;  %655 = vmatprep.mubr.bf16.mxu1 %v1338_v33 }
  0x47   : > { %600 = vmatmul.mubr.bf16.gmra.mrb[16].mxu0 %v1337_v35  ;;  %656 = vmatmul.mubr.bf16.gmra.mrb[16].mxu1 %v1342_v36 }
  0x48   : > { %607 = vmatprep.mubr.bf16.mxu0 %v1340_v37  ;;  %663 = vmatprep.mubr.bf16.mxu1 %v1020_v38 }
  0x4f   : > { %608 = vmatmul.mubr.bf16.gmra.mrb[20].mxu0 %v1343_v39  ;;  %664 = vmatmul.mubr.bf16.gmra.mrb[20].mxu1 %v1019_v40 }
  0x50   : > { %615 = vmatprep.mubr.bf16.mxu0 %v1345_v41 }
  0x57   : > { %616 = vmatmul.mubr.bf16.gmra.mrb[24].mxu0 %v1348_v42 }
  0xfa   : > { %v1177_v43 = vpop.f32.mrb[0].mxu0  ;;  %v1219_v44 = vpop.f32.mrb[0].mxu1 }
  0xfb   : > { %v1178_v45 = vpop.f32.mrb[1].mxu0  ;;  %v1220_v46 = vpop.f32.mrb[1].mxu1 }
  0xfc   : > { %v1179_v47 = vadd.f32 %v1178_v45, %v1177_v43  ;;  %v1180_v48 = vpop.f32.mrb[2].mxu0  ;;  %v1221_v49 = vadd.f32 %v1220_v46, %v1219_v44  ;;  %v1222_v50 = vpop.f32.mrb[2].mxu1 }
  0xfd   : > { %v1181_v51 = vpop.f32.mrb[3].mxu0  ;;  %v1223_v52 = vpop.f32.mrb[3].mxu1 }
  0xfe   : > { %v1182_v53 = vadd.f32 %v1181_v51, %v1180_v48  ;;  %v763_v54 = vmax.f32 %v1221_v49, 0.0  ;;  %v1224_v55 = vadd.f32 %v1223_v52, %v1222_v50  ;;  %v749_v56 = vmax.f32 %v1179_v47, 0.0 }
 0x100   : > { %v750_v57 = vmax.f32 %v1182_v53, 0.0  ;;  %v764_v58 = vmax.f32 %v1224_v55, 0.0 }
 0x102   : > { %v1093_v59 = vpack.c.bf16 %v750_v57, %v749_v56  ;;  %v1183_v60 = vpop.f32.mrb[4].mxu0  ;;  %v1128_v61 = vpack.c.bf16 %v764_v58, %v763_v54  ;;  %v1225_v62 = vpop.f32.mrb[4].mxu1 }
 0x103   : > { %v1184_v63 = vpop.f32.mrb[5].mxu0  ;;  %v1226_v0 = vpop.f32.mrb[5].mxu1 }
 0x104   : > { %1094 = vst [vmem:[%s1491_s29] sm:$0xff] %v1093_v59   ;;  %v1185_v1 = vadd.f32 %v1184_v63, %v1183_v60  ;;  %v1186_v2 = vpop.f32.mrb[6].mxu0  ;;  %1156 = vst [vmem:[%s1491_s29 + $0x38] sm:$0xff] %v1128_v61   ;;  %v1227_v3 = vadd.f32 %v1226_v0, %v1225_v62  ;;  %v1228_v4 = vpop.f32.mrb[6].mxu1 }
 0x105   : > { %v1187_v5 = vpop.f32.mrb[7].mxu0  ;;  %v1229_v6 = vpop.f32.mrb[7].mxu1 }
 0x106   : > { %v1188_v7 = vadd.f32 %v1187_v5, %v1186_v2  ;;  %v765_v8 = vmax.f32 %v1227_v3, 0.0  ;;  %v1230_v9 = vadd.f32 %v1229_v6, %v1228_v4  ;;  %v751_v10 = vmax.f32 %v1185_v1, 0.0 }
 0x108   : > { %v752_v11 = vmax.f32 %v1188_v7, 0.0  ;;  %v766_v12 = vmax.f32 %v1230_v9, 0.0 }
 0x10a   : > { %v1098_v13 = vpack.c.bf16 %v752_v11, %v751_v10  ;;  %v1189_v14 = vpop.f32.mrb[8].mxu0  ;;  %v1133_v15 = vpack.c.bf16 %v766_v12, %v765_v8  ;;  %v1231_v16 = vpop.f32.mrb[8].mxu1 }
 0x10b   : > { %v1190_v17 = vpop.f32.mrb[9].mxu0  ;;  %v1232_v18 = vpop.f32.mrb[9].mxu1 }
 0x10c   : > { %1150 = vst [vmem:[%s1491_s29 + $0x8] sm:$0xff] %v1098_v13   ;;  %v1191_v19 = vadd.f32 %v1190_v17, %v1189_v14  ;;  %v1192_v20 = vpop.f32.mrb[10].mxu0  ;;  %1157 = vst [vmem:[%s1491_s29 + $0x40] sm:$0xff] %v1133_v15   ;;  %v1233_v21 = vadd.f32 %v1232_v18, %v1231_v16  ;;  %v1234_v22 = vpop.f32.mrb[10].mxu1 }
 0x10d   : > { %v1193_v23 = vpop.f32.mrb[11].mxu0  ;;  %v1235_v24 = vpop.f32.mrb[11].mxu1 }
 0x10e   : > { %v1194_v25 = vadd.f32 %v1193_v23, %v1192_v20  ;;  %v767_v26 = vmax.f32 %v1233_v21, 0.0  ;;  %v1236_v27 = vadd.f32 %v1235_v24, %v1234_v22  ;;  %v753_v28 = vmax.f32 %v1191_v19, 0.0 }
 0x110   : > { %v754_v29 = vmax.f32 %v1194_v25, 0.0  ;;  %v768_v30 = vmax.f32 %v1236_v27, 0.0 }
 0x112   : > { %v1103_v31 = vpack.c.bf16 %v754_v29, %v753_v28  ;;  %v1195_v32 = vpop.f32.mrb[12].mxu0  ;;  %v1138_v33 = vpack.c.bf16 %v768_v30, %v767_v26  ;;  %v1237_v34 = vpop.f32.mrb[12].mxu1 }
 0x113   : > { %v1196_v35 = vpop.f32.mrb[13].mxu0  ;;  %v1238_v36 = vpop.f32.mrb[13].mxu1 }
 0x114   : > { %1151 = vst [vmem:[%s1491_s29 + $0x10] sm:$0xff] %v1103_v31   ;;  %v1197_v37 = vadd.f32 %v1196_v35, %v1195_v32  ;;  %v1198_v38 = vpop.f32.mrb[14].mxu0  ;;  %1158 = vst [vmem:[%s1491_s29 + $0x48] sm:$0xff] %v1138_v33   ;;  %v1239_v39 = vadd.f32 %v1238_v36, %v1237_v34  ;;  %v1240_v40 = vpop.f32.mrb[14].mxu1 }
 0x115   : > { %v1199_v41 = vpop.f32.mrb[15].mxu0  ;;  %v1241_v42 = vpop.f32.mrb[15].mxu1 }
 0x116   : > { %v1200_v43 = vadd.f32 %v1199_v41, %v1198_v38  ;;  %v769_v44 = vmax.f32 %v1239_v39, 0.0  ;;  %v1242_v45 = vadd.f32 %v1241_v42, %v1240_v40  ;;  %v755_v46 = vmax.f32 %v1197_v37, 0.0 }
 0x118   : > { %v756_v47 = vmax.f32 %v1200_v43, 0.0  ;;  %v770_v48 = vmax.f32 %v1242_v45, 0.0 }
 0x11a   : > { %v1108_v49 = vpack.c.bf16 %v756_v47, %v755_v46  ;;  %v1201_v50 = vpop.f32.mrb[16].mxu0  ;;  %v1143_v51 = vpack.c.bf16 %v770_v48, %v769_v44  ;;  %v1243_v52 = vpop.f32.mrb[16].mxu1 }
 0x11b   : > { %v1202_v53 = vpop.f32.mrb[17].mxu0  ;;  %v1244_v54 = vpop.f32.mrb[17].mxu1 }
 0x11c   : > { %1152 = vst [vmem:[%s1491_s29 + $0x18] sm:$0xff] %v1108_v49   ;;  %v1203_v55 = vadd.f32 %v1202_v53, %v1201_v50  ;;  %v1204_v56 = vpop.f32.mrb[18].mxu0  ;;  %1159 = vst [vmem:[%s1491_s29 + $0x50] sm:$0xff] %v1143_v51   ;;  %v1245_v57 = vadd.f32 %v1244_v54, %v1243_v52  ;;  %v1246_v58 = vpop.f32.mrb[18].mxu1 }
 0x11d   : > { %v1205_v59 = vpop.f32.mrb[19].mxu0  ;;  %v1247_v60 = vpop.f32.mrb[19].mxu1 }
 0x11e   : > { %v1206_v61 = vadd.f32 %v1205_v59, %v1204_v56  ;;  %v771_v62 = vmax.f32 %v1245_v57, 0.0  ;;  %v1248_v63 = vadd.f32 %v1247_v60, %v1246_v58  ;;  %v757_v0 = vmax.f32 %v1203_v55, 0.0 }
 0x120   : > { %v758_v1 = vmax.f32 %v1206_v61, 0.0  ;;  %v772_v2 = vmax.f32 %v1248_v63, 0.0 }
 0x122   : > { %v1113_v3 = vpack.c.bf16 %v758_v1, %v757_v0  ;;  %v1207_v4 = vpop.f32.mrb[20].mxu0  ;;  %v1148_v5 = vpack.c.bf16 %v772_v2, %v771_v62  ;;  %v1249_v6 = vpop.f32.mrb[20].mxu1 }
 0x123   : > { %v1208_v7 = vpop.f32.mrb[21].mxu0  ;;  %v1250_v8 = vpop.f32.mrb[21].mxu1 }
 0x124   : > { %1153 = vst [vmem:[%s1491_s29 + $0x20] sm:$0xff] %v1113_v3   ;;  %v1209_v9 = vadd.f32 %v1208_v7, %v1207_v4  ;;  %v1210_v10 = vpop.f32.mrb[22].mxu0  ;;  %1160 = vst [vmem:[%s1491_s29 + $0x58] sm:$0xff] %v1148_v5   ;;  %v1251_v11 = vadd.f32 %v1250_v8, %v1249_v6  ;;  %v1252_v12 = vpop.f32.mrb[22].mxu1 }
 0x125   : > { %v1211_v13 = vpop.f32.mrb[23].mxu0  ;;  %v1253_v14 = vpop.f32.mrb[23].mxu1 }
 0x126   : > { %v1212_v15 = vadd.f32 %v1211_v13, %v1210_v10  ;;  %v773_v16 = vmax.f32 %v1251_v11, 0.0  ;;  %v759_v17 = vmax.f32 %v1209_v9, 0.0 }
 0x128   : > { %v760_v18 = vmax.f32 %v1212_v15, 0.0  ;;  %v1089_v19 = vpack.c.bf16 %v773_v16, %v773_v16 }
 0x12a   : > { %v1118_v20 = vpack.c.bf16 %v760_v18, %v759_v17  ;;  %v1213_v21 = vpop.f32.mrb[24].mxu0  ;;  %899 = vst [vmem:[%s1491_s29 + $0x60] sm:$0xf] %v1089_v19 }
 0x12b   : > { %v1214_v22 = vpop.f32.mrb[25].mxu0 }
 0x12c   : > { %1154 = vst [vmem:[%s1491_s29 + $0x28] sm:$0xff] %v1118_v20   ;;  %v1215_v23 = vadd.f32 %v1214_v22, %v1213_v21  ;;  %v1216_v24 = vpop.f32.mrb[26].mxu0 }
 0x12d   : > { %v1217_v25 = vpop.f32.mrb[27].mxu0 }
 0x12e   : > { %v1218_v26 = vadd.f32 %v1217_v25, %v1216_v24  ;;  %v761_v27 = vmax.f32 %v1215_v23, 0.0 }
 0x130   : > { %v762_v28 = vmax.f32 %v1218_v26, 0.0 }
 0x132   : > { %v1123_v29 = vpack.c.bf16 %v762_v28, %v761_v27 }
 0x134   : > { %1155 = vst [vmem:[%s1491_s29 + $0x30] sm:$0xff] %v1123_v29  }
 0x135 PF: > { %s12_s11 = sadd.s32 1, %s1371_s11   ;;  %s1518_s9 = smov %s1367_s10 }
 0x136   : > { %p9_p5 = scmp.ge.s32.totalorder %s12_s11, 6   ;;  %s1519_s10 = smov %s1521_s12 }
 0x138   :  { %11 = sbr.rel (!%p9_p5) target bundleno = 2 (0x2), region = 69 }

// kernel: function_approximation_forward.5
= control target key start
LH: loop header
LB: loop body
LE: loop exit
PB: predicated region body
PF: predicated region fallthrough
CT: control target
= control target key end

     0   :  { %s1400_s9 = smov 0   ;;  %s1402_s10 = smov 0   ;;  %s1587_s0 = inlined_call_operand.vmem [shape: bf16[162,512], index: 0, kind: input, shape index: {}]   ;;  %s1588_s1 = inlined_call_operand.vmem [shape: bf16[512,128], index: 1, kind: input, shape index: {}]   ;;  %s1589_s2 = inlined_call_operand.vmem [shape: bf16[162,128], index: 2, kind: output, shape index: {}]  }
   0x1   :  { %s1404_s11 = smov 0   ;;  %s1406_s12 = smov 0  }
   0x2   :  { %s1408_s13 = smov 0  }
   0x3 LB: > { %s21_s14 = sadd.s32 1, %s1378_s12  ;;  %p40_p1 = scmp.ne.s32.totalorder %s1370_s10, %s1366_s9  ;;  %s1382_s13 = sphi %s1408_s13, %s12_s13   ;;  %s1378_s12 = sphi %s1406_s12, %s1593_s12   ;;  %s1374_s11 = sphi %s1404_s11, %s1592_s11   ;;  %s1370_s10 = sphi %s1402_s10, %s1591_s10   ;;  %s1366_s9 = sphi %s1400_s9, %s1590_s9  }
   0x4   : > { %p22_p0 = scmp.ge.s32.totalorder %s21_s14, 2  ;;  %p41_p2 = scmp.eq.s32.totalorder %s1382_s13, 0 }
   0x5   : > { %s33_s16 = sadd.s32 1, %s1370_s10  ;;  %p1003_p5 = scmp.ge.s32.totalorder %s1382_s13, 2 }
   0x6   : > { %s1595_s14 = smov (%p22_p0, %s21_s14), 0  ;;  %p42_p3 = por %p41_p2, %p40_p1 }
   0x7   : > { %s29_s15 = ssub.s32 %s1378_s12, %s1595_s14  ;;  %118 = sbr.rel (%p1003_p5) target bundleno = 29 (0x1d), region = 16 }
   0x8   : > { %p31_p4 = scmp.eq.s32.totalorder %s29_s15, 0 }
   0xa   : > { %s1435_s17 = scalar_select %p31_p4, %s1370_s10, %s33_s16  }
   0xe   : > { %121 = sbr.rel (!%p42_p3) target bundleno = 29 (0x1d), region = 20  ;;  %s123_s18 = sand.u32 (%p42_p3), 1, %s1370_s10  }
   0xf   : > { %s1074_s19 = sshll.u32 (%p42_p3), %s1378_s12, 3  ;;  %s1253_s20 = smul.u32 (%p42_p3), 168, %s123_s18 }
  0x10   : > { %s1443_s23 = scalar_lea.vmem (%p42_p3), %s1587_s0, %s1074_s19 }
  0x11   : > { %v199_v0 = vld [vmem:[%s1443_s23] sm:$0xff] (%p42_p3)  ;;  %v201_v1 = vld [vmem:[%s1443_s23 + $0x10] sm:$0xff] (%p42_p3)  ;;  %s1451_s24 = scalar_lea.vmem (%p42_p3), [#allocation3], %s1253_s20 }
  0x12   : > { %v203_v2 = vld [vmem:[%s1443_s23 + $0x20] sm:$0xff] (%p42_p3)  ;;  %v205_v3 = vld [vmem:[%s1443_s23 + $0x30] sm:$0xff] (%p42_p3)  ;;  %200 = vst [vmem:[%s1451_s24] sm:$0xff] (%p42_p3), %v199_v0  ;;  %202 = vst [vmem:[%s1451_s24 + $0x8] sm:$0xff] (%p42_p3), %v201_v1 }
  0x13   : > { %v207_v4 = vld [vmem:[%s1443_s23 + $0x40] sm:$0xff] (%p42_p3)  ;;  %v209_v5 = vld [vmem:[%s1443_s23 + $0x50] sm:$0xff] (%p42_p3)  ;;  %204 = vst [vmem:[%s1451_s24 + $0x10] sm:$0xff] (%p42_p3), %v203_v2  ;;  %206 = vst [vmem:[%s1451_s24 + $0x18] sm:$0xff] (%p42_p3), %v205_v3 }
  0x14   : > { %208 = vst [vmem:[%s1451_s24 + $0x20] sm:$0xff] (%p42_p3), %v207_v4  ;;  %210 = vst [vmem:[%s1451_s24 + $0x28] sm:$0xff] (%p42_p3), %v209_v5  ;;  %v211_v6 = vld [vmem:[%s1443_s23 + $0x60] sm:$0xff] (%p42_p3)  ;;  %v213_v7 = vld [vmem:[%s1443_s23 + $0x70] sm:$0xff] (%p42_p3) }
  0x15   : > { %v215_v8 = vld [vmem:[%s1443_s23 + $0x80] sm:$0xff]  ;;  %212 = vst [vmem:[%s1451_s24 + $0x30] sm:$0xff] %v211_v6  ;;  %214 = vst [vmem:[%s1451_s24 + $0x38] sm:$0xff] %v213_v7  ;;  %v217_v9 = vld [vmem:[%s1443_s23 + $0x90] sm:$0xff] }
  0x16   : > { %216 = vst [vmem:[%s1451_s24 + $0x40] sm:$0xff] %v215_v8  ;;  %v219_v10 = vld [vmem:[%s1443_s23 + $0xa0] sm:$0xff]  ;;  %v221_v11 = vld [vmem:[%s1443_s23 + $0xb0] sm:$0xff]  ;;  %218 = vst [vmem:[%s1451_s24 + $0x48] sm:$0xff] %v217_v9 }
  0x17   : > { %220 = vst [vmem:[%s1451_s24 + $0x50] sm:$0xff] %v219_v10  ;;  %222 = vst [vmem:[%s1451_s24 + $0x58] sm:$0xff] %v221_v11  ;;  %v223_v12 = vld [vmem:[%s1443_s23 + $0xc0] sm:$0xff]  ;;  %v225_v13 = vld [vmem:[%s1443_s23 + $0xd0] sm:$0xff] }
  0x18   : > { %v227_v14 = vld [vmem:[%s1443_s23 + $0xe0] sm:$0xff]  ;;  %224 = vst [vmem:[%s1451_s24 + $0x60] sm:$0xff] %v223_v12  ;;  %226 = vst [vmem:[%s1451_s24 + $0x68] sm:$0xff] %v225_v13  ;;  %v229_v15 = vld [vmem:[%s1443_s23 + $0xf0] sm:$0xff] }
  0x19   : > { %228 = vst [vmem:[%s1451_s24 + $0x70] sm:$0xff] %v227_v14  ;;  %v231_v16 = vld [vmem:[%s1443_s23 + $0x100] sm:$0xff]  ;;  %v233_v17 = vld [vmem:[%s1443_s23 + $0x110] sm:$0xff]  ;;  %230 = vst [vmem:[%s1451_s24 + $0x78] sm:$0xff] %v229_v15 }
  0x1a   : > { %232 = vst [vmem:[%s1451_s24 + $0x80] sm:$0xff] %v231_v16  ;;  %234 = vst [vmem:[%s1451_s24 + $0x88] sm:$0xff] %v233_v17  ;;  %v235_v18 = vld [vmem:[%s1443_s23 + $0x120] sm:$0xff]  ;;  %v237_v19 = vld [vmem:[%s1443_s23 + $0x130] sm:$0xff] }
  0x1b   : > { %v239_v20 = vld [vmem:[%s1443_s23 + $0x140] sm:$0xff]  ;;  %236 = vst [vmem:[%s1451_s24 + $0x90] sm:$0xff] %v235_v18  ;;  %238 = vst [vmem:[%s1451_s24 + $0x98] sm:$0xff] %v237_v19 }
  0x1c   : > { %240 = vst [vmem:[%s1451_s24 + $0xa0] sm:$0xff] %v239_v20 }
  0x1d PF: > { %p1006_p6 = scmp.ge.s32.totalorder %s1382_s13, 1  ;;  %p254_p7 = scmp.lt.s32.totalorder %s1382_s13, 3 }
  0x1f   : > { %p255_p8 = pnand %p1006_p6, %p254_p7 }
  0x20   : > { %s261_s25 = sand.u32 (!%p255_p8), 1, %s1366_s9   ;;  %s1007_s26 = sshll.u32 (!%p255_p8), %s1374_s11, 5 }
  0x21   : > { %258 = sbr.rel (%p255_p8) target bundleno = 358 (0x166), region = 62  ;;  %p290_p9 = scmp.lt.s32.totalorder (!%p255_p8), %s1007_s26, 63 }
  0x22   : > { %s1254_s27 = smul.u32 (!%p255_p8), 168, %s261_s25  ;;  %p1009_p10 = scmp.ne.s32.totalorder (!%p255_p8), %s1374_s11, 0 }
  0x24   : > { %s1498_s4 = scalar_lea.vmem (!%p255_p8), [#allocation3], %s1254_s27 }
  0x28   : > { %s1597_s26 = smov (!%p290_p9, %s1007_s26), 63  ;;  %305 = sbr.rel (%p1009_p10) target bundleno = 53 (0x35), region = 70 }
  0x29   : > { %s1008_s28 = sshll.u32 %s1597_s26, 2  ;;  %v1384_v21 = vmov (!%p1009_p10), 0.0  }
  0x2a   : > { %s1496_s3 = scalar_lea.vmem %s1588_s1, %s1008_s28  ;;  %306 = vst [vmem:[#allocation2] sm:$0xff] (!%p1009_p10), %v1384_v21  ;;  %307 = vst [vmem:[#allocation2 + $0x8] sm:$0xff] (!%p1009_p10), %v1384_v21 }
  0x2b   : > { %308 = vst [vmem:[#allocation2 + $0x10] sm:$0xff] (!%p1009_p10), %v1384_v21  ;;  %309 = vst [vmem:[#allocation2 + $0x18] sm:$0xff] (!%p1009_p10), %v1384_v21 }
  0x2c   : > { %310 = vst [vmem:[#allocation2 + $0x20] sm:$0xff] (!%p1009_p10), %v1384_v21  ;;  %311 = vst [vmem:[#allocation2 + $0x28] sm:$0xff] (!%p1009_p10), %v1384_v21 }
  0x2d   : > { %312 = vst [vmem:[#allocation2 + $0x30] sm:$0xff] (!%p1009_p10), %v1384_v21  ;;  %313 = vst [vmem:[#allocation2 + $0x38] sm:$0xff] (!%p1009_p10), %v1384_v21 }
  0x2e   : > { %314 = vst [vmem:[#allocation2 + $0x40] sm:$0xff] (!%p1009_p10), %v1384_v21  ;;  %315 = vst [vmem:[#allocation2 + $0x48] sm:$0xff] (!%p1009_p10), %v1384_v21 }
  0x2f   : > { %316 = vst [vmem:[#allocation2 + $0x50] sm:$0xff] %v1384_v21  ;;  %317 = vst [vmem:[#allocation2 + $0x58] sm:$0xff] %v1384_v21 }
  0x30   : > { %318 = vst [vmem:[#allocation2 + $0x60] sm:$0xff] %v1384_v21  ;;  %319 = vst [vmem:[#allocation2 + $0x68] sm:$0xff] %v1384_v21 }
  0x31   : > { %320 = vst [vmem:[#allocation2 + $0x70] sm:$0xff] %v1384_v21  ;;  %321 = vst [vmem:[#allocation2 + $0x78] sm:$0xff] %v1384_v21 }
  0x32   : > { %322 = vst [vmem:[#allocation2 + $0x80] sm:$0xff] %v1384_v21  ;;  %323 = vst [vmem:[#allocation2 + $0x88] sm:$0xff] %v1384_v21 }
  0x33   : > { %324 = vst [vmem:[#allocation2 + $0x90] sm:$0xff] %v1384_v21  ;;  %325 = vst [vmem:[#allocation2 + $0x98] sm:$0xff] %v1384_v21 }
  0x34   : > { %326 = vst [vmem:[#allocation2 + $0xa0] sm:$0x3] %v1384_v21 }
  0x35 PF: > { %v1296_v22 = vld [vmem:[%s1496_s3 + $0x40] sm:$0xff]   ;;  %v1298_v24 = vld [vmem:[%s1496_s3 + $0x48] sm:$0xff]   ;;  %v1300_v26 = vld [vmem:[%s1496_s3 + $0x50] sm:$0xff]   ;;  %p1048_p11 = scmp.ne.s32.totalorder %s1374_s11, 1 }
  0x36   : > { %v1297_v23 = vld [vmem:[%s1496_s3] sm:$0xff]   ;;  %1155 = vmatprep.subr.bf16.mxu0 %v1296_v22  ;;  %1237 = vmatprep.subr.bf16.mxu1 %v1296_v22  ;;  %v1299_v25 = vld [vmem:[%s1496_s3 + $0x8] sm:$0xff]   ;;  %v1301_v27 = vld [vmem:[%s1496_s3 + $0x10] sm:$0xff]  }
  0x37   : > { %1156 = vmatpush3.bf16.msra.mxu0 %v1297_v23  ;;  %1245 = vmatpush3.bf16.msra.mxu1 %v1297_v23  ;;  %v1302_v28 = vld [vmem:[%s1496_s3 + $0x58] sm:$0xff]   ;;  %v1304_v30 = vld [vmem:[%s1496_s3 + $0x60] sm:$0xff]   ;;  %v1306_v32 = vld [vmem:[%s1496_s3 + $0x68] sm:$0xff]  }
  0x38   : > { %1157 = vmatprep.subr.bf16.mxu0 %v1298_v24  ;;  %1238 = vmatprep.subr.bf16.mxu1 %v1298_v24  ;;  %v1303_v29 = vld [vmem:[%s1496_s3 + $0x18] sm:$0xff]   ;;  %v1305_v31 = vld [vmem:[%s1496_s3 + $0x20] sm:$0xff]   ;;  %v1307_v35 = vld [vmem:[%s1496_s3 + $0x28] sm:$0xff]  }
  0x39   : > { %v1314_v33 = vld [vmem:[%s1498_s4 + $0x4] ss:$8 sps:$4 sm:$0xff]   ;;  %v1312_v40 = vld [vmem:[%s1498_s4] ss:$8 sps:$4 sm:$0xff]   ;;  %v1318_v42 = vld [vmem:[%s1498_s4 + $0x14] ss:$8 sps:$4 sm:$0xff]  }
  0x3a   : > { %v1317_v34 = vld [vmem:[%s1498_s4 + $0x64] ss:$8 sps:$4 sm:$0xff]   ;;  %636 = vmatprep.mubr.bf16.mxu0 %v1314_v33  ;;  %v1315_v41 = vld [vmem:[%s1498_s4 + $0x60] ss:$8 sps:$4 sm:$0xff]   ;;  %v1321_v43 = vld [vmem:[%s1498_s4 + $0x74] ss:$8 sps:$4 sm:$0xff]  }
  0x3b   : > { %1158 = vmatpush3.bf16.msra.mxu0 %v1299_v25  ;;  %1246 = vmatpush3.bf16.msra.mxu1 %v1299_v25  ;;  %v1308_v36 = vld [vmem:[%s1496_s3 + $0x70] sm:$0xff]   ;;  %v1310_v38 = vld [vmem:[%s1496_s3 + $0x78] sm:$0xff]   ;;  %v348_v63 = vld [vmem:[#allocation2] sm:$0xff] }
  0x3c   : > { %1159 = vmatprep.subr.bf16.mxu0 %v1300_v26  ;;  %1239 = vmatprep.subr.bf16.mxu1 %v1300_v26  ;;  %v1309_v37 = vld [vmem:[%s1496_s3 + $0x30] sm:$0xff]   ;;  %v1311_v39 = vld [vmem:[%s1496_s3 + $0x38] sm:$0xff]   ;;  %v360_v1 = vld [vmem:[#allocation2 + $0x60] sm:$0xff] }
  0x3d   : > { %684 = vmatprep.mubr.bf16.mxu1 %v1317_v34  ;;  %v1320_v44 = vld [vmem:[%s1498_s4 + $0x10] ss:$8 sps:$4 sm:$0xff]   ;;  %v1323_v46 = vld [vmem:[%s1498_s4 + $0x24] ss:$8 sps:$4 sm:$0xff]   ;;  %v1326_v48 = vld [vmem:[%s1498_s4 + $0x20] ss:$8 sps:$4 sm:$0xff]  }
  0x3e   : > { %v1325_v45 = vld [vmem:[%s1498_s4 + $0x70] ss:$8 sps:$4 sm:$0xff]   ;;  %v1327_v47 = vld [vmem:[%s1498_s4 + $0x84] ss:$8 sps:$4 sm:$0xff]   ;;  %v1331_v49 = vld [vmem:[%s1498_s4 + $0x80] ss:$8 sps:$4 sm:$0xff]  }
  0x3f   : > { %1160 = vmatpush3.bf16.msra.mxu0 %v1301_v27  ;;  %1247 = vmatpush3.bf16.msra.mxu1 %v1301_v27  ;;  %v1329_v50 = vld [vmem:[%s1498_s4 + $0x34] ss:$8 sps:$4 sm:$0xff]   ;;  %v347_v52 = vld [vmem:[%s1498_s4 + $0xa0] sm:$0x11]  ;;  %v1332_v53 = vld [vmem:[%s1498_s4 + $0x30] ss:$8 sps:$4 sm:$0xff]  }
  0x40   : > { %1161 = vmatprep.subr.bf16.mxu0 %v1302_v28  ;;  %1240 = vmatprep.subr.bf16.mxu1 %v1302_v28  ;;  %v1333_v51 = vld [vmem:[%s1498_s4 + $0x94] ss:$8 sps:$4 sm:$0xff]   ;;  %v1337_v54 = vld [vmem:[%s1498_s4 + $0x90] ss:$8 sps:$4 sm:$0xff]   ;;  %v1335_v55 = vld [vmem:[%s1498_s4 + $0x44] ss:$8 sps:$4 sm:$0xff]   ;;  %v1031_v56 = vcombine.high %v347_v52, %v347_v52  ;;  %v1030_v58 = vcombine.low %v347_v52, %v347_v52 }
  0x41   : > { %v1338_v57 = vld [vmem:[%s1498_s4 + $0x40] ss:$8 sps:$4 sm:$0xff]   ;;  %v1340_v59 = vld [vmem:[%s1498_s4 + $0x54] ss:$8 sps:$4 sm:$0xff]   ;;  %v1343_v60 = vld [vmem:[%s1498_s4 + $0x50] ss:$8 sps:$4 sm:$0xff]  }
  0x42   : > { %v349_v7 = vld [vmem:[#allocation2 + $0x8] sm:$0xff]  ;;  %v350_v19 = vld [vmem:[#allocation2 + $0x10] sm:$0xff]  ;;  %v351_v27 = vld [vmem:[#allocation2 + $0x18] sm:$0xff] }
  0x43   : > { %1162 = vmatpush3.bf16.msra.mxu0 %v1303_v29  ;;  %1248 = vmatpush3.bf16.msra.mxu1 %v1303_v29  ;;  %v361_v9 = vld [vmem:[#allocation2 + $0x68] sm:$0xff]  ;;  %v362_v21 = vld [vmem:[#allocation2 + $0x70] sm:$0xff]  ;;  %v363_v29 = vld [vmem:[#allocation2 + $0x78] sm:$0xff] }
  0x44   : > { %1163 = vmatprep.subr.bf16.mxu0 %v1304_v30  ;;  %1241 = vmatprep.subr.bf16.mxu1 %v1304_v30 }
  0x47   : > { %1164 = vmatpush3.bf16.msra.mxu0 %v1305_v31  ;;  %1249 = vmatpush3.bf16.msra.mxu1 %v1305_v31 }
  0x48   : > { %1165 = vmatprep.subr.bf16.mxu0 %v1306_v32  ;;  %1242 = vmatprep.subr.bf16.mxu1 %v1306_v32 }
  0x4b   : > { %1166 = vmatpush3.bf16.msra.mxu0 %v1307_v35  ;;  %1250 = vmatpush3.bf16.msra.mxu1 %v1307_v35 }
  0x4c   : > { %1167 = vmatprep.subr.bf16.mxu0 %v1308_v36  ;;  %1243 = vmatprep.subr.bf16.mxu1 %v1308_v36 }
  0x4f   : > { %1168 = vmatpush3.bf16.msra.mxu0 %v1309_v37  ;;  %1251 = vmatpush3.bf16.msra.mxu1 %v1309_v37 }
  0x50   : > { %1169 = vmatprep.subr.bf16.mxu0 %v1310_v38  ;;  %1244 = vmatprep.subr.bf16.mxu1 %v1310_v38 }
  0x53   : > { %1170 = vmatpush3.bf16.msra.mxu0 %v1311_v39  ;;  %1252 = vmatpush3.bf16.msra.mxu1 %v1311_v39  ;;  %v352_v39 = vld [vmem:[#allocation2 + $0x20] sm:$0xff] }
  0x56   : > { %637 = vmatmul.mubr.bf16.vlgmr.msra.gmra.mrb[0].mxu0 %v1312_v40  ;;  %685 = vmatmul.mubr.bf16.vlgmr.msra.gmra.mrb[0].mxu1 %v1315_v41  ;;  %v364_v41 = vld [vmem:[#allocation2 + $0x80] sm:$0xff] }
  0x57   : > { %644 = vmatprep.mubr.bf16.mxu0 %v1318_v42  ;;  %692 = vmatprep.mubr.bf16.mxu1 %v1321_v43 }
  0x5e   : > { %645 = vmatmul.mubr.bf16.gmra.mrb[4].mxu0 %v1320_v44  ;;  %693 = vmatmul.mubr.bf16.gmra.mrb[4].mxu1 %v1325_v45 }
  0x5f   : > { %652 = vmatprep.mubr.bf16.mxu0 %v1323_v46  ;;  %700 = vmatprep.mubr.bf16.mxu1 %v1327_v47  ;;  %v353_v47 = vld [vmem:[#allocation2 + $0x28] sm:$0xff] }
  0x66   : > { %653 = vmatmul.mubr.bf16.gmra.mrb[8].mxu0 %v1326_v48  ;;  %701 = vmatmul.mubr.bf16.gmra.mrb[8].mxu1 %v1331_v49  ;;  %v365_v49 = vld [vmem:[#allocation2 + $0x88] sm:$0xff] }
  0x67   : > { %660 = vmatprep.mubr.bf16.mxu0 %v1329_v50  ;;  %708 = vmatprep.mubr.bf16.mxu1 %v1333_v51 }
  0x6e   : > { %661 = vmatmul.mubr.bf16.gmra.mrb[12].mxu0 %v1332_v53  ;;  %709 = vmatmul.mubr.bf16.gmra.mrb[12].mxu1 %v1337_v54 }
  0x6f   : > { %668 = vmatprep.mubr.bf16.mxu0 %v1335_v55  ;;  %716 = vmatprep.mubr.bf16.mxu1 %v1031_v56 }
  0x76   : > { %669 = vmatmul.mubr.bf16.gmra.mrb[16].mxu0 %v1338_v57  ;;  %717 = vmatmul.mubr.bf16.gmra.mrb[16].mxu1 %v1030_v58 }
  0x77   : > { %676 = vmatprep.mubr.bf16.mxu0 %v1340_v59  ;;  %v354_v59 = vld [vmem:[#allocation2 + $0x30] sm:$0xff] }
  0x7e   : > { %677 = vmatmul.mubr.bf16.gmra.mrb[20].mxu0 %v1343_v60 }
 0x129   : > { %v1171_v61 = vpop.f32.mrb[0].mxu0  ;;  %v1207_v62 = vpop.f32.mrb[0].mxu1 }
 0x12a   : > { %v1172_v0 = vpop.f32.mrb[1].mxu0  ;;  %v1208_v2 = vpop.f32.mrb[1].mxu1 }
 0x12b   : > { %v1173_v3 = vadd.f32 %v1172_v0, %v1171_v61  ;;  %v1174_v4 = vpop.f32.mrb[2].mxu0  ;;  %v1209_v5 = vadd.f32 %v1208_v2, %v1207_v62  ;;  %v1210_v6 = vpop.f32.mrb[2].mxu1  ;;  %v366_v61 = vld [vmem:[#allocation2 + $0x90] sm:$0xff] }
 0x12c   : > { %v1175_v8 = vpop.f32.mrb[3].mxu0  ;;  %v1211_v10 = vpop.f32.mrb[3].mxu1 }
 0x12d   : > { %v724_v11 = vadd.f32 %v1173_v3, %v348_v63  ;;  %v1176_v12 = vadd.f32 %v1175_v8, %v1174_v4  ;;  %v736_v13 = vadd.f32 %v1209_v5, %v360_v1  ;;  %v1212_v14 = vadd.f32 %v1211_v10, %v1210_v6  ;;  %v355_v3 = vld [vmem:[#allocation2 + $0x38] sm:$0xff] }
 0x12e   : > { %v367_v5 = vld [vmem:[#allocation2 + $0x98] sm:$0xff] }
 0x12f   : > { %745 = vst [vmem:[#allocation2] sm:$0xff] %v724_v11  ;;  %v725_v15 = vadd.f32 %v1176_v12, %v349_v7  ;;  %757 = vst [vmem:[#allocation2 + $0x60] sm:$0xff] %v736_v13  ;;  %v737_v16 = vadd.f32 %v1212_v14, %v361_v9 }
 0x131   : > { %746 = vst [vmem:[#allocation2 + $0x8] sm:$0xff] %v725_v15  ;;  %v1177_v17 = vpop.f32.mrb[4].mxu0  ;;  %758 = vst [vmem:[#allocation2 + $0x68] sm:$0xff] %v737_v16  ;;  %v1213_v18 = vpop.f32.mrb[4].mxu1  ;;  %v356_v15 = vld [vmem:[#allocation2 + $0x40] sm:$0xff] }
 0x132   : > { %v1178_v20 = vpop.f32.mrb[5].mxu0  ;;  %v1214_v22 = vpop.f32.mrb[5].mxu1 }
 0x133   : > { %v1179_v23 = vadd.f32 %v1178_v20, %v1177_v17  ;;  %v1180_v24 = vpop.f32.mrb[6].mxu0  ;;  %v1215_v25 = vadd.f32 %v1214_v22, %v1213_v18  ;;  %v1216_v26 = vpop.f32.mrb[6].mxu1  ;;  %v368_v17 = vld [vmem:[#allocation2 + $0xa0] sm:$0x3] }
 0x134   : > { %v1181_v28 = vpop.f32.mrb[7].mxu0  ;;  %v1217_v30 = vpop.f32.mrb[7].mxu1 }
 0x135   : > { %v726_v31 = vadd.f32 %v1179_v23, %v350_v19  ;;  %v1182_v32 = vadd.f32 %v1181_v28, %v1180_v24  ;;  %v738_v33 = vadd.f32 %v1215_v25, %v362_v21  ;;  %v1218_v34 = vadd.f32 %v1217_v30, %v1216_v26  ;;  %v357_v23 = vld [vmem:[#allocation2 + $0x48] sm:$0xff] }
 0x137   : > { %747 = vst [vmem:[#allocation2 + $0x10] sm:$0xff] %v726_v31  ;;  %v727_v35 = vadd.f32 %v1182_v32, %v351_v27  ;;  %759 = vst [vmem:[#allocation2 + $0x70] sm:$0xff] %v738_v33  ;;  %v739_v36 = vadd.f32 %v1218_v34, %v363_v29  ;;  %v358_v31 = vld [vmem:[#allocation2 + $0x50] sm:$0xff] }
 0x139   : > { %748 = vst [vmem:[#allocation2 + $0x18] sm:$0xff] %v727_v35  ;;  %v1183_v37 = vpop.f32.mrb[8].mxu0  ;;  %760 = vst [vmem:[#allocation2 + $0x78] sm:$0xff] %v739_v36  ;;  %v1219_v38 = vpop.f32.mrb[8].mxu1  ;;  %v359_v35 = vld [vmem:[#allocation2 + $0x58] sm:$0xff] }
 0x13a   : > { %v1184_v40 = vpop.f32.mrb[9].mxu0  ;;  %v1220_v42 = vpop.f32.mrb[9].mxu1 }
 0x13b   : > { %v1185_v43 = vadd.f32 %v1184_v40, %v1183_v37  ;;  %v1186_v44 = vpop.f32.mrb[10].mxu0  ;;  %v1221_v45 = vadd.f32 %v1220_v42, %v1219_v38  ;;  %v1222_v46 = vpop.f32.mrb[10].mxu1  ;;  %v770_v40 = vld [vmem:[#allocation2] sm:$0xff] (!%p1048_p11) }
 0x13c   : > { %v1187_v48 = vpop.f32.mrb[11].mxu0  ;;  %v1223_v50 = vpop.f32.mrb[11].mxu1 }
 0x13d   : > { %v728_v51 = vadd.f32 %v1185_v43, %v352_v39  ;;  %v1188_v52 = vadd.f32 %v1187_v48, %v1186_v44  ;;  %v740_v53 = vadd.f32 %v1221_v45, %v364_v41  ;;  %v1224_v54 = vadd.f32 %v1223_v50, %v1222_v46  ;;  %v771_v41 = vld [vmem:[#allocation2 + $0x8] sm:$0xff] (!%p1048_p11) }
 0x13e   : > { %v772_v42 = vld [vmem:[#allocation2 + $0x10] sm:$0xff] (!%p1048_p11)  ;;  %v791_v43 = vmax.f32 (!%p1048_p11), %v770_v40, 0.0  ;;  %v792_v44 = vmax.f32 (!%p1048_p11), %v771_v41, 0.0 }
 0x13f   : > { %749 = vst [vmem:[#allocation2 + $0x20] sm:$0xff] %v728_v51  ;;  %v729_v55 = vadd.f32 %v1188_v52, %v353_v47  ;;  %761 = vst [vmem:[#allocation2 + $0x80] sm:$0xff] %v740_v53  ;;  %v741_v56 = vadd.f32 %v1224_v54, %v365_v49  ;;  %v793_v46 = vmax.f32 (!%p1048_p11), %v772_v42, 0.0 }
 0x140   : > { %v773_v45 = vld [vmem:[#allocation2 + $0x18] sm:$0xff] (!%p1048_p11) }
 0x141   : > { %750 = vst [vmem:[#allocation2 + $0x28] sm:$0xff] %v729_v55  ;;  %v1189_v57 = vpop.f32.mrb[12].mxu0  ;;  %762 = vst [vmem:[#allocation2 + $0x88] sm:$0xff] %v741_v56  ;;  %v1225_v58 = vpop.f32.mrb[12].mxu1  ;;  %v794_v49 = vmax.f32 (!%p1048_p11), %v773_v45, 0.0  ;;  %v1099_v55 = vpack.c.bf16 (!%p1048_p11), %v792_v44, %v791_v43 }
 0x142   : > { %v1190_v60 = vpop.f32.mrb[13].mxu0  ;;  %v1226_v62 = vpop.f32.mrb[13].mxu1 }
 0x143   : > { %v1191_v63 = vadd.f32 %v1190_v60, %v1189_v57  ;;  %v1192_v0 = vpop.f32.mrb[14].mxu0  ;;  %v1227_v1 = vadd.f32 %v1226_v62, %v1225_v58  ;;  %v1228_v2 = vpop.f32.mrb[14].mxu1  ;;  %v1104_v62 = vpack.c.bf16 (!%p1048_p11), %v794_v49, %v793_v46  ;;  %1100 = vst [vmem:[%s1589_s2] sm:$0xff] (!%p1048_p11), %v1099_v55  }
 0x144   : > { %v1193_v4 = vpop.f32.mrb[15].mxu0  ;;  %v1229_v6 = vpop.f32.mrb[15].mxu1 }
 0x145   : > { %v730_v7 = vadd.f32 %v1191_v63, %v354_v59  ;;  %v1194_v8 = vadd.f32 %v1193_v4, %v1192_v0  ;;  %v742_v9 = vadd.f32 %v1227_v1, %v366_v61  ;;  %v1230_v10 = vadd.f32 %v1229_v6, %v1228_v2  ;;  %v782_v2 = vld [vmem:[#allocation2 + $0x60] sm:$0xff] (!%p1048_p11)  ;;  %v784_v4 = vld [vmem:[#allocation2 + $0x70] sm:$0xff] (!%p1048_p11)  ;;  %1146 = vst [vmem:[%s1589_s2 + $0x8] sm:$0xff] (!%p1048_p11), %v1104_v62  }
 0x146   : > { %v774_v47 = vld [vmem:[#allocation2 + $0x20] sm:$0xff] (!%p1048_p11) }
 0x147   : > { %751 = vst [vmem:[#allocation2 + $0x30] sm:$0xff] %v730_v7  ;;  %v731_v11 = vadd.f32 %v1194_v8, %v355_v3  ;;  %763 = vst [vmem:[#allocation2 + $0x90] sm:$0xff] %v742_v9  ;;  %v743_v12 = vadd.f32 %v1230_v10, %v367_v5  ;;  %v795_v50 = vmax.f32 (!%p1048_p11), %v774_v47, 0.0  ;;  %v783_v3 = vld [vmem:[#allocation2 + $0x68] sm:$0xff] (!%p1048_p11)  ;;  %v803_v7 = vmax.f32 (!%p1048_p11), %v782_v2, 0.0  ;;  %v785_v9 = vld [vmem:[#allocation2 + $0x78] sm:$0xff] (!%p1048_p11) }
 0x148   : > { %v775_v48 = vld [vmem:[#allocation2 + $0x28] sm:$0xff] (!%p1048_p11)  ;;  %v804_v8 = vmax.f32 (!%p1048_p11), %v783_v3, 0.0  ;;  %v786_v10 = vld [vmem:[#allocation2 + $0x80] sm:$0xff] (!%p1048_p11) }
 0x149   : > { %752 = vst [vmem:[#allocation2 + $0x38] sm:$0xff] %v731_v11  ;;  %v1195_v13 = vpop.f32.mrb[16].mxu0  ;;  %764 = vst [vmem:[#allocation2 + $0x98] sm:$0xff] %v743_v12  ;;  %v1231_v14 = vpop.f32.mrb[16].mxu1  ;;  %v796_v51 = vmax.f32 (!%p1048_p11), %v775_v48, 0.0  ;;  %v787_v11 = vld [vmem:[#allocation2 + $0x88] sm:$0xff] (!%p1048_p11) }
 0x14a   : > { %v1196_v16 = vpop.f32.mrb[17].mxu0  ;;  %v1232_v18 = vpop.f32.mrb[17].mxu1 }
 0x14b   : > { %v1197_v19 = vadd.f32 %v1196_v16, %v1195_v13  ;;  %v1198_v20 = vpop.f32.mrb[18].mxu0  ;;  %v1233_v21 = vadd.f32 %v1232_v18, %v1231_v14  ;;  %v1234_v22 = vpop.f32.mrb[18].mxu1  ;;  %v1109_v63 = vpack.c.bf16 (!%p1048_p11), %v796_v51, %v795_v50  ;;  %v805_v13 = vmax.f32 (!%p1048_p11), %v784_v4, 0.0 }
 0x14c   : > { %v1199_v24 = vpop.f32.mrb[19].mxu0  ;;  %v1235_v25 = vpop.f32.mrb[19].mxu1  ;;  %v806_v14 = vmax.f32 (!%p1048_p11), %v785_v9, 0.0 }
 0x14d   : > { %v732_v26 = vadd.f32 %v1197_v19, %v356_v15  ;;  %v1200_v27 = vadd.f32 %v1199_v24, %v1198_v20  ;;  %v744_v28 = vadd.f32 %v1233_v21, %v368_v17  ;;  %1147 = vst [vmem:[%s1589_s2 + $0x10] sm:$0xff] (!%p1048_p11), %v1109_v63   ;;  %v807_v15 = vmax.f32 (!%p1048_p11), %v786_v10, 0.0 }
 0x14e   : > { %v776_v52 = vld [vmem:[#allocation2 + $0x30] sm:$0xff] (!%p1048_p11)  ;;  %v1129_v19 = vpack.c.bf16 (!%p1048_p11), %v804_v8, %v803_v7  ;;  %v808_v20 = vmax.f32 (!%p1048_p11), %v787_v11, 0.0 }
 0x14f   : > { %753 = vst [vmem:[#allocation2 + $0x40] sm:$0xff] %v732_v26  ;;  %v733_v29 = vadd.f32 %v1200_v27, %v357_v23  ;;  %765 = vst [vmem:[#allocation2 + $0xa0] sm:$0x3] %v744_v28  ;;  %v797_v56 = vmax.f32 (!%p1048_p11), %v776_v52, 0.0  ;;  %v788_v16 = vld [vmem:[#allocation2 + $0x90] sm:$0xff] (!%p1048_p11)  ;;  %v1134_v23 = vpack.c.bf16 (!%p1048_p11), %v806_v14, %v805_v13 }
 0x150   : > { %v777_v53 = vld [vmem:[#allocation2 + $0x38] sm:$0xff] (!%p1048_p11)  ;;  %v809_v21 = vmax.f32 (!%p1048_p11), %v788_v16, 0.0  ;;  %1151 = vst [vmem:[%s1589_s2 + $0x30] sm:$0xff] (!%p1048_p11), %v1129_v19   ;;  %v1139_v26 = vpack.c.bf16 (!%p1048_p11), %v808_v20, %v807_v15 }
 0x151   : > { %754 = vst [vmem:[#allocation2 + $0x48] sm:$0xff] %v733_v29  ;;  %v1201_v30 = vpop.f32.mrb[20].mxu0  ;;  %v798_v57 = vmax.f32 (!%p1048_p11), %v777_v53, 0.0  ;;  %v789_v17 = vld [vmem:[#allocation2 + $0x98] sm:$0xff] (!%p1048_p11)  ;;  %1152 = vst [vmem:[%s1589_s2 + $0x38] sm:$0xff] (!%p1048_p11), %v1134_v23  }
 0x152   : > { %v1202_v32 = vpop.f32.mrb[21].mxu0  ;;  %v810_v24 = vmax.f32 (!%p1048_p11), %v789_v17, 0.0  ;;  %1153 = vst [vmem:[%s1589_s2 + $0x40] sm:$0xff] (!%p1048_p11), %v1139_v26  }
 0x153   : > { %v1203_v33 = vadd.f32 %v1202_v32, %v1201_v30  ;;  %v1204_v34 = vpop.f32.mrb[22].mxu0  ;;  %769 = sbr.rel (%p1048_p11) target bundleno = 358 (0x166), region = 74  ;;  %v1114_v5 = vpack.c.bf16 (!%p1048_p11), %v798_v57, %v797_v56 }
 0x154   : > { %v1205_v36 = vpop.f32.mrb[23].mxu0  ;;  %v1144_v27 = vpack.c.bf16 (!%p1048_p11), %v810_v24, %v809_v21 }
 0x155   : > { %v734_v37 = vadd.f32 %v1203_v33, %v358_v31  ;;  %v1206_v38 = vadd.f32 %v1205_v36, %v1204_v34  ;;  %1148 = vst [vmem:[%s1589_s2 + $0x18] sm:$0xff] (!%p1048_p11), %v1114_v5  }
 0x156   : > { %v778_v54 = vld [vmem:[#allocation2 + $0x40] sm:$0xff] (!%p1048_p11)  ;;  %1154 = vst [vmem:[%s1589_s2 + $0x48] sm:$0xff] (!%p1048_p11), %v1144_v27  }
 0x157   : > { %755 = vst [vmem:[#allocation2 + $0x50] sm:$0xff] %v734_v37  ;;  %v735_v39 = vadd.f32 %v1206_v38, %v359_v35  ;;  %v799_v59 = vmax.f32 (!%p1048_p11), %v778_v54, 0.0  ;;  %v790_v22 = vld [vmem:[#allocation2 + $0xa0] sm:$0x3] (!%p1048_p11) }
 0x158   : > { %v779_v58 = vld [vmem:[#allocation2 + $0x48] sm:$0xff] (!%p1048_p11)  ;;  %v811_v25 = vmax.f32 (!%p1048_p11), %v790_v22, 0.0 }
 0x159   : > { %756 = vst [vmem:[#allocation2 + $0x58] sm:$0xff] %v735_v39  ;;  %v800_v0 = vmax.f32 (!%p1048_p11), %v779_v58, 0.0 }
 0x15a   : > { %v1095_v28 = vpack.c.bf16 %v811_v25, %v811_v25 }
 0x15b   : > { %v1119_v12 = vpack.c.bf16 %v800_v0, %v799_v59 }
 0x15c   : > { %917 = vst [vmem:[%s1589_s2 + $0x50] sm:$0x1] %v1095_v28 }
 0x15d   : > { %1149 = vst [vmem:[%s1589_s2 + $0x20] sm:$0xff] %v1119_v12  }
 0x15e   : > { %v780_v60 = vld [vmem:[#allocation2 + $0x50] sm:$0xff] }
 0x15f   : > { %v801_v1 = vmax.f32 %v780_v60, 0.0 }
 0x160   : > { %v781_v61 = vld [vmem:[#allocation2 + $0x58] sm:$0xff] }
 0x161   : > { %v802_v6 = vmax.f32 %v781_v61, 0.0 }
 0x163   : > { %v1124_v18 = vpack.c.bf16 %v802_v6, %v801_v1 }
 0x165   : > { %1150 = vst [vmem:[%s1589_s2 + $0x28] sm:$0xff] %v1124_v18  }
 0x166 PF: > { %s12_s13 = sadd.s32 1, %s1382_s13   ;;  %s1590_s9 = smov %s1370_s10 }
 0x167   : > { %p9_p12 = scmp.ge.s32.totalorder %s12_s13, 4   ;;  %s1591_s10 = smov %s1435_s17 }
 0x168   : > { %s1592_s11 = smov %s1378_s12  ;;  %s1593_s12 = smov %s1595_s14 }
 0x169   :  { %11 = sbr.rel (!%p9_p12) target bundleno = 3 (0x3), region = 112 }

// kernel: function_approximation_forward.6
= control target key start
LH: loop header
LB: loop body
LE: loop exit
PB: predicated region body
PF: predicated region fallthrough
CT: control target
= control target key end

     0   :  { %vm16_vm0 = vcmask 523264   ;;  %v1312_v1 = vmov 0.0   ;;  %vm1313_vm1 = vmmov 0   ;;  %vm29_vm2 = vcmask 517120   ;;  %s1682_s1 = inlined_call_operand.vmem [shape: bf16[576,64], index: 1, kind: input, shape index: {}]   ;;  %s1683_s0 = inlined_call_operand.vmem [shape: bf16[98,576], index: 0, kind: input, shape index: {}]   ;;  %s1684_s2 = inlined_call_operand.vmem [shape: bf16[98,64], index: 2, kind: output, shape index: {}]  }
   0x1   :  { %v1229_v0 = vld [vmem:[%s1682_s1 + $0x40] sm:$0xff]   ;;  %17 = vst.msk [vmem:[#allocation2] sm:$0xff] %vm16_vm0, %v1312_v1  ;;  %18 = vst.msk [vmem:[#allocation2 + $0x8] sm:$0xff] %vm16_vm0, %v1312_v1  ;;  %v1233_v5 = vld [vmem:[%s1682_s1 + $0x48] sm:$0xff]   ;;  %vm933_vm3 = vcmask 519168   ;;  %vm946_vm4 = vcmask 516096  }
   0x2   :  { %19 = vst.msk [vmem:[#allocation2 + $0x10] sm:$0xff] %vm16_vm0, %v1312_v1  ;;  %20 = vst.msk [vmem:[#allocation2 + $0x18] sm:$0xff] %vm16_vm0, %v1312_v1  ;;  %v1230_v2 = vld [vmem:[%s1682_s1 + $0xc0] sm:$0xff]   ;;  %1056 = vmatprep.subr.bf16.mxu0 %v1229_v0  ;;  %v1234_v6 = vld [vmem:[%s1682_s1 + $0xc8] sm:$0xff]  }
   0x3   :  { %21 = vst.msk [vmem:[#allocation2 + $0x20] sm:$0xff] %vm16_vm0, %v1312_v1  ;;  %22 = vst.msk [vmem:[#allocation2 + $0x28] sm:$0xff] %vm16_vm0, %v1312_v1  ;;  %v1231_v3 = vld [vmem:[%s1682_s1] sm:$0xff]   ;;  %1114 = vmatprep.subr.bf16.mxu1 %v1230_v2  ;;  %v1235_v7 = vld [vmem:[%s1682_s1 + $0x8] sm:$0xff]  }
   0x4   :  { %23 = vst.msk [vmem:[#allocation2 + $0x30] sm:$0xff] %vm16_vm0, %v1312_v1  ;;  %24 = vst.msk [vmem:[#allocation2 + $0x38] sm:$0xff] %vm16_vm0, %v1312_v1  ;;  %v1232_v4 = vld [vmem:[%s1682_s1 + $0x80] sm:$0xff]   ;;  %1057 = vmatpush3.bf16.msra.mxu0 %v1231_v3  ;;  %v1236_v8 = vld [vmem:[%s1682_s1 + $0x88] sm:$0xff]  }
   0x5   :  { %25 = vst.msk [vmem:[#allocation2 + $0x40] sm:$0xff] %vm16_vm0, %v1312_v1  ;;  %26 = vst.msk [vmem:[#allocation2 + $0x48] sm:$0xff] %vm16_vm0, %v1312_v1  ;;  %1115 = vmatpush3.bf16.msra.mxu1 %v1232_v4  ;;  %1058 = vmatprep.subr.bf16.mxu0 %v1233_v5  ;;  %v1237_v9 = vld [vmem:[%s1682_s1 + $0x50] sm:$0xff]   ;;  %v1241_v13 = vld [vmem:[%s1682_s1 + $0x58] sm:$0xff]  }
   0x6   :  { %27 = vst.msk [vmem:[#allocation2 + $0x50] sm:$0xff] %vm16_vm0, %v1312_v1  ;;  %28 = vst.msk [vmem:[#allocation2 + $0x58] sm:$0xff] %vm16_vm0, %v1312_v1  ;;  %1116 = vmatprep.subr.bf16.mxu1 %v1234_v6  ;;  %v1238_v10 = vld [vmem:[%s1682_s1 + $0xd0] sm:$0xff]   ;;  %v1242_v14 = vld [vmem:[%s1682_s1 + $0xd8] sm:$0xff]  }
   0x7   :  { %v1239_v11 = vld [vmem:[%s1682_s1 + $0x10] sm:$0xff]   ;;  %v1243_v15 = vld [vmem:[%s1682_s1 + $0x18] sm:$0xff]   ;;  %v1245_v17 = vld [vmem:[%s1682_s1 + $0x60] sm:$0xff]   ;;  %30 = vst.msk [vmem:[#allocation2 + $0x60] sm:$0x3] %vm29_vm2, %v1312_v1 }
   0x8   :  { %1059 = vmatpush3.bf16.msra.mxu0 %v1235_v7  ;;  %v1240_v12 = vld [vmem:[%s1682_s1 + $0x90] sm:$0xff]   ;;  %v1244_v16 = vld [vmem:[%s1682_s1 + $0x98] sm:$0xff]   ;;  %v1246_v18 = vld [vmem:[%s1682_s1 + $0xe0] sm:$0xff]  }
   0x9   :  { %1117 = vmatpush3.bf16.msra.mxu1 %v1236_v8  ;;  %1060 = vmatprep.subr.bf16.mxu0 %v1237_v9  ;;  %v1247_v19 = vld [vmem:[%s1682_s1 + $0x20] sm:$0xff]   ;;  %v1249_v21 = vld [vmem:[%s1682_s1 + $0x68] sm:$0xff]   ;;  %v1253_v25 = vld [vmem:[%s1682_s1 + $0x70] sm:$0xff]  }
   0xa   :  { %1118 = vmatprep.subr.bf16.mxu1 %v1238_v10  ;;  %v1248_v20 = vld [vmem:[%s1682_s1 + $0xa0] sm:$0xff]   ;;  %v1250_v22 = vld [vmem:[%s1682_s1 + $0xe8] sm:$0xff]   ;;  %v1254_v26 = vld [vmem:[%s1682_s1 + $0xf0] sm:$0xff]  }
   0xb   :  { %v1251_v23 = vld [vmem:[%s1682_s1 + $0x28] sm:$0xff]   ;;  %v1255_v27 = vld [vmem:[%s1682_s1 + $0x30] sm:$0xff]   ;;  %v1257_v29 = vld [vmem:[%s1682_s1 + $0x78] sm:$0xff]  }
   0xc   :  { %1061 = vmatpush3.bf16.msra.mxu0 %v1239_v11  ;;  %v1252_v24 = vld [vmem:[%s1682_s1 + $0xa8] sm:$0xff]   ;;  %v1256_v28 = vld [vmem:[%s1682_s1 + $0xb0] sm:$0xff]   ;;  %v1258_v30 = vld [vmem:[%s1682_s1 + $0xf8] sm:$0xff]  }
   0xd   :  { %1119 = vmatpush3.bf16.msra.mxu1 %v1240_v12  ;;  %1062 = vmatprep.subr.bf16.mxu0 %v1241_v13  ;;  %v1259_v31 = vld [vmem:[%s1682_s1 + $0x38] sm:$0xff]   ;;  %v1261_v33 = vld [vmem:[%s1683_s0] ss:$20 sps:$4 sm:$0xff]   ;;  %v1273_v41 = vld [vmem:[%s1683_s0 + $0x30] ss:$20 sps:$4 sm:$0xff]  }
   0xe   :  { %1120 = vmatprep.subr.bf16.mxu1 %v1242_v14  ;;  %v1260_v32 = vld [vmem:[%s1682_s1 + $0xb8] sm:$0xff]   ;;  %v1266_v36 = vld [vmem:[%s1683_s0 + $0xc] ss:$20 sps:$4 sm:$0xff]   ;;  %v1270_v39 = vld [vmem:[%s1683_s0 + $0x34] ss:$20 sps:$4 sm:$0xff]  }
   0xf   :  { %v1263_v34 = vld [vmem:[%s1683_s0 + $0x4] ss:$20 sps:$4 sm:$0xff]   ;;  %v1264_v35 = vld [vmem:[%s1683_s0 + $0x8] ss:$20 sps:$4 sm:$0xff]   ;;  %680 = vmatprep.mubr.bf16.mxu1 %v1266_v36  ;;  %v1268_v38 = vld [vmem:[%s1683_s0 + $0x2c] ss:$20 sps:$4 sm:$0xff]  }
  0x10   :  { %1063 = vmatpush3.bf16.msra.mxu0 %v1243_v15  ;;  %592 = vmatprep.mubr.bf16.mxu0 %v1263_v34  ;;  %v1267_v37 = vld [vmem:[%s1682_s1 + $0x100] sm:$0xff]   ;;  %v1272_v40 = vld [vmem:[%s1683_s0 + $0x28] ss:$20 sps:$4 sm:$0xff]   ;;  %v1287_v45 = vld [vmem:[%s1682_s1 + $0x110] sm:$0xff]  }
  0x11   :  { %1121 = vmatpush3.bf16.msra.mxu1 %v1244_v16  ;;  %1064 = vmatprep.subr.bf16.mxu0 %v1245_v17  ;;  %v1274_v42 = vld [vmem:[%s1683_s0 + $0x54] ss:$20 sps:$4 sm:$0xff]   ;;  %v1276_v44 = vld [vmem:[%s1683_s0 + $0x5c] ss:$20 sps:$4 sm:$0xff]   ;;  %v1280_v47 = vld [vmem:[%s1683_s0 + $0x58] ss:$20 sps:$4 sm:$0xff]  }
  0x12   :  { %1122 = vmatprep.subr.bf16.mxu1 %v1246_v18  ;;  %v1278_v43 = vld [vmem:[%s1682_s1 + $0x108] sm:$0xff]   ;;  %v1279_v46 = vld [vmem:[%s1683_s0 + $0x50] ss:$20 sps:$4 sm:$0xff]   ;;  %v1300_v50 = vld [vmem:[%s1682_s1 + $0x118] sm:$0xff]  }
  0x13   :  { %v1281_v48 = vld [vmem:[%s1683_s0 + $0x7c] ss:$20 sps:$4 sm:$0xff]   ;;  %v1283_v49 = vld [vmem:[%s1683_s0 + $0x84] ss:$20 sps:$4 sm:$0xff]   ;;  %v1286_v52 = vld [vmem:[%s1683_s0 + $0x80] ss:$20 sps:$4 sm:$0xff]  }
  0x14   :  { %1065 = vmatpush3.bf16.msra.mxu0 %v1247_v19  ;;  %v1285_v51 = vld [vmem:[%s1683_s0 + $0x78] ss:$20 sps:$4 sm:$0xff]   ;;  %v1292_v55 = vld [vmem:[%s1683_s0 + $0xa0] ss:$20 sps:$4 sm:$0xff]   ;;  %v1293_v56 = vld [vmem:[%s1683_s0 + $0xa8] ss:$20 sps:$4 sm:$0xff]  }
  0x15   :  { %1123 = vmatpush3.bf16.msra.mxu1 %v1248_v20  ;;  %1066 = vmatprep.subr.bf16.mxu0 %v1249_v21  ;;  %v1288_v53 = vld [vmem:[%s1683_s0 + $0xa4] ss:$20 sps:$4 sm:$0xff]   ;;  %v1290_v54 = vld [vmem:[%s1683_s0 + $0xac] ss:$20 sps:$4 sm:$0xff]   ;;  %v1296_v58 = vld [vmem:[%s1683_s0 + $0xd4] ss:$20 sps:$4 sm:$0xff]  }
  0x16   :  { %1124 = vmatprep.subr.bf16.mxu1 %v1250_v22  ;;  %v1294_v57 = vld [vmem:[%s1683_s0 + $0xcc] ss:$20 sps:$4 sm:$0xff]   ;;  %v67_v59 = vld [vmem:[%s1683_s0 + $0xf0] sm:$0x11]  ;;  %v68_v60 = vld [vmem:[%s1683_s0 + $0xf8] sm:$0x11] }
  0x17   :  { %v1298_v61 = vld [vmem:[%s1683_s0 + $0xc8] ss:$20 sps:$4 sm:$0xff]   ;;  %v1299_v62 = vld [vmem:[%s1683_s0 + $0xd0] ss:$20 sps:$4 sm:$0xff]   ;;  %v983_v63 = vcombine.high %v67_v59, %v67_v59  ;;  %v985_v0 = vcombine.high %v68_v60, %v68_v60  ;;  %v982_v2 = vcombine.low %v67_v59, %v67_v59  ;;  %v984_v3 = vcombine.low %v68_v60, %v68_v60  ;;  %v1307_v6 = vld [vmem:[%s1683_s0 + $0x38] ss:$20 sps:$4 sm:$0xff]  }
  0x18   :  { %1067 = vmatpush3.bf16.msra.mxu0 %v1251_v23  ;;  %v1305_v4 = vld [vmem:[%s1683_s0 + $0x10] ss:$20 sps:$4 sm:$0xff]   ;;  %v1308_v7 = vld [vmem:[%s1683_s0 + $0xd8] ss:$20 sps:$4 sm:$0xff]   ;;  %v1309_v8 = vld [vmem:[%s1683_s0 + $0x60] ss:$20 sps:$4 sm:$0xff]  }
  0x19   :  { %1125 = vmatpush3.bf16.msra.mxu1 %v1252_v24  ;;  %1068 = vmatprep.subr.bf16.mxu0 %v1253_v25  ;;  %v1306_v5 = vld [vmem:[%s1683_s0 + $0xb0] ss:$20 sps:$4 sm:$0xff]   ;;  %v1310_v9 = vld [vmem:[%s1683_s0 + $0x100] ss:$0 sps:$4 sm:$0x11]  }
  0x1a   :  { %1126 = vmatprep.subr.bf16.mxu1 %v1254_v26  ;;  %v1311_v10 = vld [vmem:[%s1683_s0 + $0x88] ss:$20 sps:$4 sm:$0xff]  }
  0x1c   :  { %1069 = vmatpush3.bf16.msra.mxu0 %v1255_v27 }
  0x1d   :  { %1127 = vmatpush3.bf16.msra.mxu1 %v1256_v28  ;;  %1070 = vmatprep.subr.bf16.mxu0 %v1257_v29 }
  0x1e   :  { %1128 = vmatprep.subr.bf16.mxu1 %v1258_v30 }
  0x20   :  { %1071 = vmatpush3.bf16.msra.mxu0 %v1259_v31 }
  0x21   :  { %1129 = vmatpush3.bf16.msra.mxu1 %v1260_v32  ;;  %1183 = vmatprep.subr.bf16.mxu0 %v1312_v1 }
  0x22   :  { %1219 = vmatprep.subr.bf16.mxu1 %v1312_v1 }
  0x23   :  { %593 = vmatmul.mubr.bf16.vlgmr.msra.gmra.mrb[0].mxu0 %v1261_v33 }
  0x24   :  { %681 = vmatmul.mubr.bf16.vlgmr.msra.gmra.mrb[0].mxu1 %v1264_v35  ;;  %1184 = vmatpush3.bf16.msra.mxu0 %v1267_v37 }
  0x25   :  { %600 = vmatprep.mubr.bf16.mxu0 %v1268_v38  ;;  %1223 = vmatpush3.bf16.msra.mxu1 %v1267_v37 }
  0x26   :  { %688 = vmatprep.mubr.bf16.mxu1 %v1270_v39  ;;  %1185 = vmatprep.subr.bf16.mxu0 %v1312_v1 }
  0x27   :  { %1220 = vmatprep.subr.bf16.mxu1 %v1312_v1 }
  0x28   :  { %1186 = vmatpush3.bf16.msra.mxu0 %v1278_v43 }
  0x29   :  { %1224 = vmatpush3.bf16.msra.mxu1 %v1278_v43  ;;  %1187 = vmatprep.subr.bf16.mxu0 %v1312_v1 }
  0x2a   :  { %1221 = vmatprep.subr.bf16.mxu1 %v1312_v1 }
  0x2b   :  { %601 = vmatmul.mubr.bf16.gmra.mrb[4].mxu0 %v1272_v40 }
  0x2c   :  { %689 = vmatmul.mubr.bf16.gmra.mrb[4].mxu1 %v1273_v41  ;;  %608 = vmatprep.mubr.bf16.mxu0 %v1274_v42 }
  0x2d   :  { %696 = vmatprep.mubr.bf16.mxu1 %v1276_v44  ;;  %1188 = vmatpush3.bf16.msra.mxu0 %v1287_v45 }
  0x2e   :  { %1225 = vmatpush3.bf16.msra.mxu1 %v1287_v45  ;;  %1189 = vmatprep.subr.bf16.mxu0 %v1312_v1 }
  0x2f   :  { %1222 = vmatprep.subr.bf16.mxu1 %v1312_v1 }
  0x31   :  { %1190 = vmatpush3.bf16.msra.mxu0 %v1300_v50 }
  0x32   :  { %1226 = vmatpush3.bf16.msra.mxu1 %v1300_v50 }
  0x33   :  { %609 = vmatmul.mubr.bf16.gmra.mrb[8].mxu0 %v1279_v46 }
  0x34   :  { %697 = vmatmul.mubr.bf16.gmra.mrb[8].mxu1 %v1280_v47  ;;  %616 = vmatprep.mubr.bf16.mxu0 %v1281_v48 }
  0x35   :  { %704 = vmatprep.mubr.bf16.mxu1 %v1283_v49 }
  0x3b   :  { %617 = vmatmul.mubr.bf16.gmra.mrb[12].mxu0 %v1285_v51 }
  0x3c   :  { %705 = vmatmul.mubr.bf16.gmra.mrb[12].mxu1 %v1286_v52  ;;  %624 = vmatprep.mubr.bf16.mxu0 %v1288_v53 }
  0x3d   :  { %712 = vmatprep.mubr.bf16.mxu1 %v1290_v54 }
  0x43   :  { %625 = vmatmul.mubr.bf16.gmra.mrb[16].mxu0 %v1292_v55 }
  0x44   :  { %713 = vmatmul.mubr.bf16.gmra.mrb[16].mxu1 %v1293_v56  ;;  %632 = vmatprep.mubr.bf16.mxu0 %v1294_v57 }
  0x45   :  { %720 = vmatprep.mubr.bf16.mxu1 %v1296_v58 }
  0x4b   :  { %633 = vmatmul.mubr.bf16.gmra.mrb[20].mxu0 %v1298_v61 }
  0x4c   :  { %721 = vmatmul.mubr.bf16.gmra.mrb[20].mxu1 %v1299_v62  ;;  %640 = vmatprep.mubr.bf16.mxu0 %v983_v63 }
  0x4d   :  { %728 = vmatprep.mubr.bf16.mxu1 %v985_v0 }
  0x53   :  { %641 = vmatmul.mubr.bf16.gmra.mrb[24].mxu0 %v982_v2 }
  0x54   :  { %729 = vmatmul.mubr.bf16.gmra.mrb[24].mxu1 %v984_v3  ;;  %1191 = vmatprep.mubr.msk.bf16.mxu0 %vm1313_vm1, %v1312_v1 }
  0x55   :  { %1207 = vmatprep.mubr.msk.bf16.mxu1 %vm1313_vm1, %v1312_v1 }
  0x5b   :  { %1192 = vmatmul.mubr.msk.bf16.vlgmr.msra.gmra.mrb[28].mxu0 %vm16_vm0, %v1305_v4 }
  0x5c   :  { %1208 = vmatmul.mubr.msk.bf16.vlgmr.msra.gmra.mrb[28].mxu1 %vm16_vm0, %v1306_v5  ;;  %1195 = vmatprep.mubr.msk.bf16.mxu0 %vm1313_vm1, %v1312_v1 }
  0x5d   :  { %1211 = vmatprep.mubr.msk.bf16.mxu1 %vm1313_vm1, %v1312_v1 }
  0x63   :  { %1196 = vmatmul.mubr.msk.bf16.gmra.mrb[32].mxu0 %vm16_vm0, %v1307_v6 }
  0x64   :  { %1212 = vmatmul.mubr.msk.bf16.gmra.mrb[32].mxu1 %vm16_vm0, %v1308_v7  ;;  %1199 = vmatprep.mubr.msk.bf16.mxu0 %vm1313_vm1, %v1312_v1 }
  0x65   :  { %1215 = vmatprep.mubr.msk.bf16.mxu1 %vm1313_vm1, %v1312_v1 }
  0x6b   :  { %1200 = vmatmul.mubr.msk.bf16.gmra.mrb[36].mxu0 %vm16_vm0, %v1309_v8 }
  0x6c   :  { %1216 = vmatmul.mubr.msk.bf16.gmra.mrb[36].mxu1 %vm16_vm0, %v1310_v9  ;;  %1203 = vmatprep.mubr.msk.bf16.mxu0 %vm1313_vm1, %v1312_v1 }
  0x73   :  { %1204 = vmatmul.mubr.msk.bf16.gmra.mrb[40].mxu0 %vm16_vm0, %v1311_v10 }
  0xf6   :  { %v1072_v11 = vpop.f32.mrb[0].mxu0 }
  0xf7   :  { %v1130_v12 = vpop.f32.mrb[0].mxu1  ;;  %v1073_v13 = vpop.f32.mrb[1].mxu0 }
  0xf8   :  { %v1074_v14 = vadd.f32 %v1073_v13, %v1072_v11  ;;  %v1131_v15 = vpop.f32.mrb[1].mxu1  ;;  %v1075_v16 = vpop.f32.mrb[2].mxu0 }
  0xf9   :  { %v1132_v17 = vadd.f32 %v1131_v15, %v1130_v12  ;;  %v1133_v18 = vpop.f32.mrb[2].mxu1  ;;  %v1076_v19 = vpop.f32.mrb[3].mxu0 }
  0xfa   :  { %v1077_v20 = vadd.f32 %v1076_v19, %v1075_v16  ;;  %v1134_v21 = vpop.f32.mrb[3].mxu1 }
  0xfb   :  { %v1135_v22 = vadd.f32 %v1134_v21, %v1133_v18  ;;  %v1591_v23 = vadd.f32 %v1132_v17, %v1074_v14 }
  0xfd   :  { %v1593_v24 = vadd.f32 %v1135_v22, %v1077_v20 }
  0xfe   :  { %v1078_v25 = vpop.f32.mrb[4].mxu0 }
  0xff   :  { %v1136_v26 = vpop.f32.mrb[4].mxu1  ;;  %v1079_v27 = vpop.f32.mrb[5].mxu0 }
 0x100   :  { %v1080_v1 = vadd.f32 %v1079_v27, %v1078_v25  ;;  %v1137_v28 = vpop.f32.mrb[5].mxu1  ;;  %v1081_v29 = vpop.f32.mrb[6].mxu0 }
 0x101   :  { %v1138_v30 = vadd.f32 %v1137_v28, %v1136_v26  ;;  %v1139_v31 = vpop.f32.mrb[6].mxu1  ;;  %v1082_v32 = vpop.f32.mrb[7].mxu0 }
 0x102   :  { %v1083_v33 = vadd.f32 %v1082_v32, %v1081_v29  ;;  %v1140_v34 = vpop.f32.mrb[7].mxu1 }
 0x103   :  { %v1141_v35 = vadd.f32 %v1140_v34, %v1139_v31  ;;  %v1595_v36 = vadd.f32 %v1138_v30, %v1080_v1 }
 0x105   :  { %v1597_v37 = vadd.f32 %v1141_v35, %v1083_v33 }
 0x106   :  { %v1084_v38 = vpop.f32.mrb[8].mxu0 }
 0x107   :  { %v1142_v39 = vpop.f32.mrb[8].mxu1  ;;  %v1085_v40 = vpop.f32.mrb[9].mxu0 }
 0x108   :  { %v1086_v41 = vadd.f32 %v1085_v40, %v1084_v38  ;;  %v1143_v42 = vpop.f32.mrb[9].mxu1  ;;  %v1087_v43 = vpop.f32.mrb[10].mxu0 }
 0x109   :  { %v1144_v44 = vadd.f32 %v1143_v42, %v1142_v39  ;;  %v1145_v45 = vpop.f32.mrb[10].mxu1  ;;  %v1088_v46 = vpop.f32.mrb[11].mxu0 }
 0x10a   :  { %v1089_v47 = vadd.f32 %v1088_v46, %v1087_v43  ;;  %v1146_v48 = vpop.f32.mrb[11].mxu1 }
 0x10b   :  { %v1147_v49 = vadd.f32 %v1146_v48, %v1145_v45  ;;  %v1599_v50 = vadd.f32 %v1144_v44, %v1086_v41  ;;  %v70_v45 = vld [vmem:[#allocation2] sm:$0xff] }
 0x10c   :  { %v78_v48 = vld [vmem:[#allocation2 + $0x40] sm:$0xff] }
 0x10d   :  { %v1601_v51 = vadd.f32 %v1147_v49, %v1089_v47 }
 0x10e   :  { %v1090_v52 = vpop.f32.mrb[12].mxu0 }
 0x10f   :  { %v1148_v53 = vpop.f32.mrb[12].mxu1  ;;  %v1091_v54 = vpop.f32.mrb[13].mxu0 }
 0x110   :  { %v1092_v55 = vadd.f32 %v1091_v54, %v1090_v52  ;;  %v1149_v56 = vpop.f32.mrb[13].mxu1  ;;  %v1093_v57 = vpop.f32.mrb[14].mxu0 }
 0x111   :  { %v1150_v58 = vadd.f32 %v1149_v56, %v1148_v53  ;;  %v1151_v59 = vpop.f32.mrb[14].mxu1  ;;  %v1094_v60 = vpop.f32.mrb[15].mxu0 }
 0x112   :  { %v1095_v61 = vadd.f32 %v1094_v60, %v1093_v57  ;;  %v1152_v62 = vpop.f32.mrb[15].mxu1 }
 0x113   :  { %v1153_v63 = vadd.f32 %v1152_v62, %v1151_v59  ;;  %v1603_v0 = vadd.f32 %v1150_v58, %v1092_v55  ;;  %v71_v55 = vld [vmem:[#allocation2 + $0x8] sm:$0xff] }
 0x114   :  { %v79_v59 = vld [vmem:[#allocation2 + $0x48] sm:$0xff] }
 0x115   :  { %v1605_v2 = vadd.f32 %v1153_v63, %v1095_v61 }
 0x116   :  { %v1096_v3 = vpop.f32.mrb[16].mxu0 }
 0x117   :  { %v1154_v4 = vpop.f32.mrb[16].mxu1  ;;  %v1097_v5 = vpop.f32.mrb[17].mxu0 }
 0x118   :  { %v1098_v6 = vadd.f32 %v1097_v5, %v1096_v3  ;;  %v1155_v7 = vpop.f32.mrb[17].mxu1  ;;  %v1099_v8 = vpop.f32.mrb[18].mxu0  ;;  %v72_v5 = vld [vmem:[#allocation2 + $0x10] sm:$0xff] }
 0x119   :  { %v1156_v9 = vadd.f32 %v1155_v7, %v1154_v4  ;;  %v1157_v10 = vpop.f32.mrb[18].mxu1  ;;  %v1100_v11 = vpop.f32.mrb[19].mxu0  ;;  %v80_v7 = vld [vmem:[#allocation2 + $0x50] sm:$0xff] }
 0x11a   :  { %v1101_v12 = vadd.f32 %v1100_v11, %v1099_v8  ;;  %v1158_v13 = vpop.f32.mrb[19].mxu1 }
 0x11b   :  { %v1159_v14 = vadd.f32 %v1158_v13, %v1157_v10  ;;  %v715_v15 = vadd.f32 %v1156_v9, %v1098_v6 }
 0x11d   :  { %v718_v16 = vadd.f32 %v1159_v14, %v1101_v12  ;;  %v73_v12 = vld [vmem:[#allocation2 + $0x18] sm:$0xff] }
 0x11e   :  { %v1102_v17 = vpop.f32.mrb[20].mxu0 }
 0x11f   :  { %v1160_v18 = vpop.f32.mrb[20].mxu1  ;;  %v1103_v19 = vpop.f32.mrb[21].mxu0 }
 0x120   :  { %v1104_v20 = vadd.f32 %v1103_v19, %v1102_v17  ;;  %v1161_v21 = vpop.f32.mrb[21].mxu1  ;;  %v1105_v22 = vpop.f32.mrb[22].mxu0 }
 0x121   :  { %v1162_v25 = vadd.f32 %v1161_v21, %v1160_v18  ;;  %v1163_v26 = vpop.f32.mrb[22].mxu1  ;;  %v1106_v27 = vpop.f32.mrb[23].mxu0 }
 0x122   :  { %v1107_v1 = vadd.f32 %v1106_v27, %v1105_v22  ;;  %v1164_v28 = vpop.f32.mrb[23].mxu1 }
 0x123   :  { %v1165_v29 = vadd.f32 %v1164_v28, %v1163_v26  ;;  %v723_v30 = vadd.f32 %v1162_v25, %v1104_v20 }
 0x125   :  { %v726_v31 = vadd.f32 %v1165_v29, %v1107_v1 }
 0x126   :  { %v1108_v32 = vpop.f32.mrb[24].mxu0 }
 0x127   :  { %v1166_v33 = vpop.f32.mrb[24].mxu1  ;;  %v1109_v34 = vpop.f32.mrb[25].mxu0 }
 0x128   :  { %v1110_v35 = vadd.f32 %v1109_v34, %v1108_v32  ;;  %v1167_v38 = vpop.f32.mrb[25].mxu1  ;;  %v1111_v39 = vpop.f32.mrb[26].mxu0 }
 0x129   :  { %v1168_v40 = vadd.f32 %v1167_v38, %v1166_v33  ;;  %v1112_v41 = vpop.f32.mrb[27].mxu0  ;;  %v1169_v42 = vpop.f32.mrb[26].mxu1  ;;  %v82_v39 = vld [vmem:[#allocation2 + $0x60] sm:$0x3] }
 0x12a   :  { %v1170_v43 = vpop.f32.mrb[27].mxu1 }
 0x12b   :  { %v1607_v44 = vadd.f32 %v1168_v40, %v1110_v35 }
 0x12e   :  { %v770_v46 = vpop.f32.mrb[28].mxu0 }
 0x12f   :  { %v771_v47 = vadd.f32 %v770_v46, %v1591_v23  ;;  %v802_v49 = vpop.f32.mrb[28].mxu1  ;;  %v1193_v52 = vpop.f32.mrb[29].mxu0 }
 0x130   :  { %v803_v53 = vadd.f32 %v802_v49, %v715_v15  ;;  %v1209_v54 = vpop.f32.mrb[29].mxu1  ;;  %v773_v56 = vpop.f32.mrb[30].mxu0 }
 0x131   :  { %v824_v57 = vadd.f32 %v771_v47, %v70_v45  ;;  %v774_v58 = vadd.f32 %v773_v56, %v1593_v24  ;;  %v805_v60 = vpop.f32.mrb[30].mxu1  ;;  %v1194_v61 = vpop.f32.mrb[31].mxu0  ;;  %v75_v45 = vld [vmem:[#allocation2 + $0x28] sm:$0xff] }
 0x132   :  { %v832_v62 = vadd.f32 %v803_v53, %v78_v48  ;;  %v806_v63 = vadd.f32 %v805_v60, %v718_v16  ;;  %v1210_v3 = vpop.f32.mrb[31].mxu1  ;;  %v81_v16 = vld [vmem:[#allocation2 + $0x58] sm:$0xff] }
 0x133   :  { %837 = vst.msk [vmem:[#allocation2] sm:$0xff] %vm16_vm0, %v824_v57  ;;  %v825_v4 = vadd.f32 %v774_v58, %v71_v55  ;;  %v76_v3 = vld [vmem:[#allocation2 + $0x30] sm:$0xff] }
 0x134   :  { %845 = vst.msk [vmem:[#allocation2 + $0x40] sm:$0xff] %vm16_vm0, %v832_v62  ;;  %v833_v23 = vadd.f32 %v806_v63, %v79_v59 }
 0x135   :  { %838 = vst.msk [vmem:[#allocation2 + $0x8] sm:$0xff] %vm16_vm0, %v825_v4 }
 0x136   :  { %846 = vst.msk [vmem:[#allocation2 + $0x48] sm:$0xff] %vm16_vm0, %v833_v23  ;;  %v778_v6 = vpop.f32.mrb[32].mxu0 }
 0x137   :  { %v779_v24 = vadd.f32 %v778_v6, %v1595_v36  ;;  %v810_v8 = vpop.f32.mrb[32].mxu1  ;;  %v1197_v9 = vpop.f32.mrb[33].mxu0 }
 0x138   :  { %v811_v10 = vadd.f32 %v810_v8, %v723_v30  ;;  %v1213_v11 = vpop.f32.mrb[33].mxu1  ;;  %v781_v13 = vpop.f32.mrb[34].mxu0 }
 0x139   :  { %v826_v14 = vadd.f32 %v779_v24, %v72_v5  ;;  %v782_v15 = vadd.f32 %v781_v13, %v1597_v37  ;;  %v813_v17 = vpop.f32.mrb[34].mxu1  ;;  %v1198_v18 = vpop.f32.mrb[35].mxu0 }
 0x13a   :  { %v854_v19 = vld [vmem:[#allocation2] sm:$0xff]  ;;  %v834_v20 = vadd.f32 %v811_v10, %v80_v7  ;;  %v814_v21 = vadd.f32 %v813_v17, %v726_v31  ;;  %v1214_v22 = vpop.f32.mrb[35].mxu1  ;;  %v77_v7 = vld [vmem:[#allocation2 + $0x38] sm:$0xff] }
 0x13b   :  { %v867_v25 = vmax.f32 %v854_v19, 0.0  ;;  %v862_v26 = vld [vmem:[#allocation2 + $0x40] sm:$0xff]  ;;  %839 = vst.msk [vmem:[#allocation2 + $0x10] sm:$0xff] %vm16_vm0, %v826_v14  ;;  %v827_v36 = vadd.f32 %v782_v15, %v73_v12 }
 0x13c   :  { %v875_v27 = vmax.f32 %v862_v26, 0.0  ;;  %v855_v1 = vld [vmem:[#allocation2 + $0x8] sm:$0xff]  ;;  %847 = vst.msk [vmem:[#allocation2 + $0x50] sm:$0xff] %vm16_vm0, %v834_v20  ;;  %v835_v28 = vadd.f32 %v814_v21, %v81_v16  ;;  %v74_v31 = vld [vmem:[#allocation2 + $0x20] sm:$0xff] }
 0x13d   :  { %v1043_v29 = vpack.c.bf16 %v867_v25, %v867_v25  ;;  %v868_v37 = vmax.f32 %v855_v1, 0.0  ;;  %v863_v30 = vld [vmem:[#allocation2 + $0x48] sm:$0xff]  ;;  %840 = vst.msk [vmem:[#allocation2 + $0x18] sm:$0xff] %vm16_vm0, %v827_v36 }
 0x13e   :  { %v1051_v32 = vpack.c.bf16 %v875_v27, %v875_v27  ;;  %v876_v33 = vmax.f32 %v863_v30, 0.0  ;;  %848 = vst.msk [vmem:[#allocation2 + $0x58] sm:$0xff] %vm16_vm0, %v835_v28  ;;  %v786_v34 = vpop.f32.mrb[36].mxu0 }
 0x13f   :  { %934 = vst.msk [vmem:[%s1684_s2] sm:$0xf] %vm933_vm3, %v1043_v29  ;;  %v1044_v35 = vpack.c.bf16 %v868_v37, %v868_v37  ;;  %v787_v38 = vadd.f32 %v786_v34, %v1599_v50  ;;  %v818_v40 = vpop.f32.mrb[36].mxu1  ;;  %v1201_v41 = vpop.f32.mrb[37].mxu0 }
 0x140   :  { %942 = vst.msk [vmem:[%s1684_s2 + $0x20] sm:$0xf] %vm933_vm3, %v1051_v32  ;;  %v1052_v42 = vpack.c.bf16 %v876_v33, %v876_v33  ;;  %v819_v43 = vadd.f32 %v818_v40, %v1607_v44  ;;  %v789_v46 = vpop.f32.mrb[38].mxu0  ;;  %v1217_v47 = vpop.f32.mrb[37].mxu1 }
 0x141   :  { %935 = vst.msk [vmem:[%s1684_s2 + $0x4] sm:$0xf] %vm933_vm3, %v1044_v35  ;;  %v828_v50 = vadd.f32 %v787_v38, %v74_v31  ;;  %v790_v48 = vadd.f32 %v789_v46, %v1601_v51  ;;  %v1202_v49 = vpop.f32.mrb[39].mxu0  ;;  %v821_v52 = vpop.f32.mrb[38].mxu1 }
 0x142   :  { %943 = vst.msk [vmem:[%s1684_s2 + $0x24] sm:$0xf] %vm933_vm3, %v1052_v42  ;;  %v856_v53 = vld [vmem:[#allocation2 + $0x10] sm:$0xff]  ;;  %v836_v44 = vadd.f32 %v819_v43, %v82_v39  ;;  %v1218_v54 = vpop.f32.mrb[39].mxu1 }
 0x143   :  { %v869_v55 = vmax.f32 %v856_v53, 0.0  ;;  %v864_v56 = vld [vmem:[#allocation2 + $0x50] sm:$0xff]  ;;  %841 = vst.msk [vmem:[#allocation2 + $0x20] sm:$0xff] %vm16_vm0, %v828_v50  ;;  %v829_v57 = vadd.f32 %v790_v48, %v75_v45 }
 0x144   :  { %v877_v58 = vmax.f32 %v864_v56, 0.0  ;;  %v857_v59 = vld [vmem:[#allocation2 + $0x18] sm:$0xff]  ;;  %850 = vst.msk [vmem:[#allocation2 + $0x60] sm:$0x3] %vm29_vm2, %v836_v44 }
 0x145   :  { %v1045_v51 = vpack.c.bf16 %v869_v55, %v869_v55  ;;  %v870_v60 = vmax.f32 %v857_v59, 0.0  ;;  %v865_v61 = vld [vmem:[#allocation2 + $0x58] sm:$0xff]  ;;  %842 = vst.msk [vmem:[#allocation2 + $0x28] sm:$0xff] %vm16_vm0, %v829_v57 }
 0x146   :  { %v1053_v62 = vpack.c.bf16 %v877_v58, %v877_v58  ;;  %v878_v63 = vmax.f32 %v865_v61, 0.0  ;;  %v794_v4 = vpop.f32.mrb[40].mxu0 }
 0x147   :  { %936 = vst.msk [vmem:[%s1684_s2 + $0x8] sm:$0xf] %vm933_vm3, %v1045_v51  ;;  %v1046_v23 = vpack.c.bf16 %v870_v60, %v870_v60  ;;  %v795_v5 = vadd.f32 %v794_v4, %v1603_v0  ;;  %v1205_v6 = vpop.f32.mrb[41].mxu0 }
 0x148   :  { %944 = vst.msk [vmem:[%s1684_s2 + $0x28] sm:$0xf] %vm933_vm3, %v1053_v62  ;;  %v1054_v24 = vpack.c.bf16 %v878_v63, %v878_v63  ;;  %v797_v8 = vpop.f32.mrb[42].mxu0 }
 0x149   :  { %937 = vst.msk [vmem:[%s1684_s2 + $0xc] sm:$0xf] %vm933_vm3, %v1046_v23  ;;  %v830_v9 = vadd.f32 %v795_v5, %v76_v3  ;;  %v798_v10 = vadd.f32 %v797_v8, %v1605_v2  ;;  %v1206_v11 = vpop.f32.mrb[43].mxu0 }
 0x14a   :  { %945 = vst.msk [vmem:[%s1684_s2 + $0x2c] sm:$0xf] %vm933_vm3, %v1054_v24  ;;  %v858_v0 = vld [vmem:[#allocation2 + $0x20] sm:$0xff] }
 0x14b   :  { %v871_v12 = vmax.f32 %v858_v0, 0.0  ;;  %v866_v13 = vld [vmem:[#allocation2 + $0x60] sm:$0x3]  ;;  %843 = vst.msk [vmem:[#allocation2 + $0x30] sm:$0xff] %vm16_vm0, %v830_v9  ;;  %v831_v14 = vadd.f32 %v798_v10, %v77_v7 }
 0x14c   :  { %v879_v15 = vmax.f32 %v866_v13, 0.0  ;;  %v859_v16 = vld [vmem:[#allocation2 + $0x28] sm:$0xff] }
 0x14d   :  { %v1047_v17 = vpack.c.bf16 %v871_v12, %v871_v12  ;;  %v872_v18 = vmax.f32 %v859_v16, 0.0  ;;  %844 = vst.msk [vmem:[#allocation2 + $0x38] sm:$0xff] %vm16_vm0, %v831_v14 }
 0x14e   :  { %v1055_v2 = vpack.c.bf16 %v879_v15, %v879_v15 }
 0x14f   :  { %938 = vst.msk [vmem:[%s1684_s2 + $0x10] sm:$0xf] %vm933_vm3, %v1047_v17  ;;  %v1048_v19 = vpack.c.bf16 %v872_v18, %v872_v18 }
 0x150   :  { %947 = vst.msk [vmem:[%s1684_s2 + $0x30] sm:$0x1] %vm946_vm4, %v1055_v2 }
 0x151   :  { %939 = vst.msk [vmem:[%s1684_s2 + $0x14] sm:$0xf] %vm933_vm3, %v1048_v19 }
 0x152   :  { %v860_v20 = vld [vmem:[#allocation2 + $0x30] sm:$0xff] }
 0x153   :  { %v873_v21 = vmax.f32 %v860_v20, 0.0 }
 0x154   :  { %v861_v22 = vld [vmem:[#allocation2 + $0x38] sm:$0xff] }
 0x155   :  { %v1049_v25 = vpack.c.bf16 %v873_v21, %v873_v21  ;;  %v874_v26 = vmax.f32 %v861_v22, 0.0 }
 0x157   :  { %940 = vst.msk [vmem:[%s1684_s2 + $0x18] sm:$0xf] %vm933_vm3, %v1049_v25  ;;  %v1050_v36 = vpack.c.bf16 %v874_v26, %v874_v26 }
 0x159   :  { %941 = vst.msk [vmem:[%s1684_s2 + $0x1c] sm:$0xf] %vm933_vm3, %v1050_v36 }

// kernel: function_approximation_forward.7
= control target key start
LH: loop header
LB: loop body
LE: loop exit
PB: predicated region body
PF: predicated region fallthrough
CT: control target
= control target key end

     0   :  { %8 = vsyncpa [#allocation4], 0  ;;  %s3153_s12 = smov 0   ;;  %s3563_s0 = inlined_call_operand.vmem [shape: bf16[2,3584], index: 0, kind: input, shape index: {}]   ;;  %s3564_s1 = inlined_call_operand.vmem [shape: bf16[3584,512], index: 1, kind: input, shape index: {}]   ;;  %s3565_s2 = inlined_call_operand.vmem [shape: bf16[512,128], index: 2, kind: input, shape index: {}]   ;;  %s3566_s3 = inlined_call_operand.hbm [shape: f32[2,128], index: 3, kind: output, shape index: {}]  }
   0x1 LB: > { %s3159_s13 = sadd.s32 4294967295, %s3126_s12   ;;  %p2368_p0 = scmp.ge.s32.totalorder %s3126_s12, 1  ;;  %s3126_s12 = sphi %s3153_s12, %s14_s12  }
   0x2   : > { %p145_p1 = scmp.lt.s32.totalorder %s3126_s12, 5 }
   0x4   : > { %p146_p2 = pnand %p2368_p0, %p145_p1 }
   0x5   : > { %s169_s14 = smul.u32 (!%p146_p2), 7, %s3159_s13  ;;  %p2371_p5 = scmp.ne.s32.totalorder (!%p146_p2), %s3159_s13, 0 }
   0x6   : > { %149 = sbr.rel (%p146_p2) target bundleno = 730 (0x2da), region = 32 }
   0x7   : > { %s174_s15 = smul.u32 (!%p146_p2), 112, %s3159_s13  ;;  %p170_p3 = scmp.lt.s32.totalorder (!%p146_p2), %s169_s14, 27 }
   0x9   : > { %p175_p4 = scmp.lt.s32.totalorder (!%p146_p2), %s174_s15, 447 }
   0xd   : > { %s3568_s14 = smov (!%p170_p3, %s169_s14), 27  ;;  %s3570_s15 = smov (!%p175_p4, %s174_s15), 447 }
   0xe   : > { %s172_s18 = scalar_lea.vmem %s3563_s0, %s3568_s14  ;;  %s2633_s19 = sshll.u32 %s3570_s15, 4  ;;  %v3128_v0 = vmov (!%p2371_p5), 0.0  }
   0xf   : > { %s3174_s22 = scalar_lea.vmem %s3564_s1, %s2633_s19  ;;  %185 = sbr.rel (%p2371_p5) target bundleno = 22 (0x16), region = 36  ;;  %186 = vst [vmem:[#allocation2] sm:$0xff] (!%p2371_p5), %v3128_v0 }
  0x16 PF: > { %v2721_v1 = vld [vmem:[%s3174_s22 + $0x4] ss:$16 sps:$4 sm:$0xff]   ;;  %v2723_v2 = vld [vmem:[%s3174_s22 + $0xc] ss:$16 sps:$4 sm:$0xff]   ;;  %v2725_v3 = vld [vmem:[%s3174_s22] ss:$16 sps:$4 sm:$0xff]   ;;  %v418_v39 = vlaneseq }
  0x17   : > { %1589 = vmatprep.subr.bf16.mxu0 %v2721_v1  ;;  %v2726_v4 = vld [vmem:[%s3174_s22 + $0x8] ss:$16 sps:$4 sm:$0xff]   ;;  %1753 = vmatprep.subr.bf16.mxu1 %v2723_v2  ;;  %v2727_v5 = vld [vmem:[%s3174_s22 + $0x24] ss:$16 sps:$4 sm:$0xff]   ;;  %v2729_v6 = vld [vmem:[%s3174_s22 + $0x2c] ss:$16 sps:$4 sm:$0xff]  }
  0x18   : > { %1590 = vmatpush1.bf16.msra.mxu0 %v2725_v3  ;;  %1754 = vmatpush1.bf16.msra.mxu1 %v2726_v4  ;;  %v2731_v7 = vld [vmem:[%s3174_s22 + $0x20] ss:$16 sps:$4 sm:$0xff]   ;;  %v2732_v8 = vld [vmem:[%s3174_s22 + $0x28] ss:$16 sps:$4 sm:$0xff]   ;;  %v2733_v9 = vld [vmem:[%s3174_s22 + $0x44] ss:$16 sps:$4 sm:$0xff]  }
  0x19   : > { %1591 = vmatprep.subr.bf16.mxu0 %v2727_v5  ;;  %1755 = vmatprep.subr.bf16.mxu1 %v2729_v6  ;;  %v2735_v10 = vld [vmem:[%s3174_s22 + $0x4c] ss:$16 sps:$4 sm:$0xff]   ;;  %v2737_v11 = vld [vmem:[%s3174_s22 + $0x40] ss:$16 sps:$4 sm:$0xff]   ;;  %v2738_v12 = vld [vmem:[%s3174_s22 + $0x48] ss:$16 sps:$4 sm:$0xff]  }
  0x1a   : > { %v2739_v13 = vld [vmem:[%s3174_s22 + $0x64] ss:$16 sps:$4 sm:$0xff]   ;;  %v2741_v14 = vld [vmem:[%s3174_s22 + $0x6c] ss:$16 sps:$4 sm:$0xff]   ;;  %v2743_v15 = vld [vmem:[%s3174_s22 + $0x60] ss:$16 sps:$4 sm:$0xff]  }
  0x1b   : > { %v2744_v16 = vld [vmem:[%s3174_s22 + $0x68] ss:$16 sps:$4 sm:$0xff]   ;;  %v2745_v17 = vld [vmem:[%s3174_s22 + $0x84] ss:$16 sps:$4 sm:$0xff]   ;;  %v2747_v18 = vld [vmem:[%s3174_s22 + $0x8c] ss:$16 sps:$4 sm:$0xff]  }
  0x1c   : > { %1592 = vmatpush1.bf16.msra.mxu0 %v2731_v7  ;;  %1756 = vmatpush1.bf16.msra.mxu1 %v2732_v8  ;;  %v2749_v19 = vld [vmem:[%s3174_s22 + $0x80] ss:$16 sps:$4 sm:$0xff]   ;;  %v2750_v20 = vld [vmem:[%s3174_s22 + $0x88] ss:$16 sps:$4 sm:$0xff]   ;;  %v2751_v21 = vld [vmem:[%s3174_s22 + $0xa4] ss:$16 sps:$4 sm:$0xff]  }
  0x1d   : > { %1593 = vmatprep.subr.bf16.mxu0 %v2733_v9  ;;  %1757 = vmatprep.subr.bf16.mxu1 %v2735_v10  ;;  %v2753_v22 = vld [vmem:[%s3174_s22 + $0xac] ss:$16 sps:$4 sm:$0xff]   ;;  %v2755_v23 = vld [vmem:[%s3174_s22 + $0xa0] ss:$16 sps:$4 sm:$0xff]   ;;  %v2756_v24 = vld [vmem:[%s3174_s22 + $0xa8] ss:$16 sps:$4 sm:$0xff]  }
  0x1e   : > { %v2757_v25 = vld [vmem:[%s3174_s22 + $0xc4] ss:$16 sps:$4 sm:$0xff]   ;;  %v2759_v26 = vld [vmem:[%s3174_s22 + $0xcc] ss:$16 sps:$4 sm:$0xff]   ;;  %v2761_v27 = vld [vmem:[%s3174_s22 + $0xc0] ss:$16 sps:$4 sm:$0xff]  }
  0x1f   : > { %v2762_v28 = vld [vmem:[%s3174_s22 + $0xc8] ss:$16 sps:$4 sm:$0xff]   ;;  %v2763_v29 = vld [vmem:[%s3174_s22 + $0xe4] ss:$16 sps:$4 sm:$0xff]   ;;  %v2765_v30 = vld [vmem:[%s3174_s22 + $0xec] ss:$16 sps:$4 sm:$0xff]  }
  0x20   : > { %1594 = vmatpush1.bf16.msra.mxu0 %v2737_v11  ;;  %1758 = vmatpush1.bf16.msra.mxu1 %v2738_v12  ;;  %v2767_v31 = vld [vmem:[%s3174_s22 + $0xe0] ss:$16 sps:$4 sm:$0xff]   ;;  %v2768_v32 = vld [vmem:[%s3174_s22 + $0xe8] ss:$16 sps:$4 sm:$0xff]   ;;  %v2769_v33 = vld [vmem:[%s3174_s22 + $0x104] ss:$16 sps:$4 sm:$0xff]  }
  0x21   : > { %1595 = vmatprep.subr.bf16.mxu0 %v2739_v13  ;;  %1759 = vmatprep.subr.bf16.mxu1 %v2741_v14  ;;  %v2771_v34 = vld [vmem:[%s3174_s22 + $0x10c] ss:$16 sps:$4 sm:$0xff]   ;;  %v2773_v35 = vld [vmem:[%s3174_s22 + $0x100] ss:$16 sps:$4 sm:$0xff]   ;;  %v2774_v36 = vld [vmem:[%s3174_s22 + $0x108] ss:$16 sps:$4 sm:$0xff]  }
  0x22   : > { %v3129_v37 = vmov 1966171168   ;;  %v2775_v40 = vld [vmem:[%s3174_s22 + $0x124] ss:$16 sps:$4 sm:$0xff]   ;;  %v2777_v41 = vld [vmem:[%s3174_s22 + $0x12c] ss:$16 sps:$4 sm:$0xff]  }
  0x23   : > { %v416_v38 = vunpack.c.l.s4 %v3129_v37  ;;  %v2779_v42 = vld [vmem:[%s3174_s22 + $0x120] ss:$16 sps:$4 sm:$0xff]   ;;  %v3216_v44 = vshrl.u32 %v418_v39, 7  ;;  %v2780_v45 = vld [vmem:[%s3174_s22 + $0x128] ss:$16 sps:$4 sm:$0xff]   ;;  %p2596_p6 = scmp.ne.s32.totalorder %s3159_s13, 3 }
  0x24   : > { %1596 = vmatpush1.bf16.msra.mxu0 %v2743_v15  ;;  %1760 = vmatpush1.bf16.msra.mxu1 %v2744_v16  ;;  %v2781_v46 = vld [vmem:[%s3174_s22 + $0x144] ss:$16 sps:$4 sm:$0xff]   ;;  %v2783_v47 = vld [vmem:[%s3174_s22 + $0x14c] ss:$16 sps:$4 sm:$0xff]   ;;  %v2785_v48 = vld [vmem:[%s3174_s22 + $0x140] ss:$16 sps:$4 sm:$0xff]  }
  0x25   : > { %1597 = vmatprep.subr.bf16.mxu0 %v2745_v17  ;;  %1761 = vmatprep.subr.bf16.mxu1 %v2747_v18  ;;  %v417_v43 = vunpack.c.0.s8 %v416_v38  ;;  %v2786_v49 = vld [vmem:[%s3174_s22 + $0x148] ss:$16 sps:$4 sm:$0xff]   ;;  %v2787_v51 = vld [vmem:[%s3174_s22 + $0x164] ss:$16 sps:$4 sm:$0xff]   ;;  %v2789_v52 = vld [vmem:[%s3174_s22 + $0x16c] ss:$16 sps:$4 sm:$0xff]  }
  0x26   : > { %v187_v53 = vld [vmem:[%s172_s18] sm:$0x7f]  ;;  %v2792_v56 = vld [vmem:[%s3174_s22 + $0x168] ss:$16 sps:$4 sm:$0xff]   ;;  %v2795_v58 = vld [vmem:[%s3174_s22 + $0x18c] ss:$16 sps:$4 sm:$0xff]  }
  0x27   : > { %v3224_v50 = vsub.s32 %v417_v43, %v3216_v44  ;;  %v2791_v54 = vld [vmem:[%s3174_s22 + $0x160] ss:$16 sps:$4 sm:$0xff]   ;;  %v2793_v57 = vld [vmem:[%s3174_s22 + $0x184] ss:$16 sps:$4 sm:$0xff]   ;;  %v2798_v62 = vld [vmem:[%s3174_s22 + $0x188] ss:$16 sps:$4 sm:$0xff]   ;;  %v414_v10 = vcombine.high %v187_v53, %v187_v53 }
  0x28   : > { %1598 = vmatpush1.bf16.msra.mxu0 %v2749_v19  ;;  %1762 = vmatpush1.bf16.msra.mxu1 %v2750_v20  ;;  %v2797_v60 = vld [vmem:[%s3174_s22 + $0x180] ss:$16 sps:$4 sm:$0xff]   ;;  %v2799_v63 = vld [vmem:[%s3174_s22 + $0x1a4] ss:$16 sps:$4 sm:$0xff]   ;;  %v2801_v0 = vld [vmem:[%s3174_s22 + $0x1ac] ss:$16 sps:$4 sm:$0xff]  }
  0x29   : > { %1599 = vmatprep.subr.bf16.mxu0 %v2751_v21  ;;  %1763 = vmatprep.subr.bf16.mxu1 %v2753_v22  ;;  %v421_v55 = vrot.slane %v187_v53, %v3224_v50  ;;  %v2803_v1 = vld [vmem:[%s3174_s22 + $0x1a0] ss:$16 sps:$4 sm:$0xff]   ;;  %v2804_v2 = vld [vmem:[%s3174_s22 + $0x1a8] ss:$16 sps:$4 sm:$0xff]   ;;  %v2805_v3 = vld [vmem:[%s3174_s22 + $0x1c4] ss:$16 sps:$4 sm:$0xff]   ;;  %v428_v14 = vrot.slane %v414_v10, %v3224_v50 }
  0x2a   : > { %v2807_v4 = vld [vmem:[%s3174_s22 + $0x1cc] ss:$16 sps:$4 sm:$0xff]   ;;  %v2809_v5 = vld [vmem:[%s3174_s22 + $0x1c0] ss:$16 sps:$4 sm:$0xff]   ;;  %v2810_v6 = vld [vmem:[%s3174_s22 + $0x1c8] ss:$16 sps:$4 sm:$0xff]  }
  0x2b   : > { %v429_v59 = vcombine.high %v421_v55, %v421_v55  ;;  %v2811_v7 = vld [vmem:[%s3174_s22 + $0x1e4] ss:$16 sps:$4 sm:$0xff]   ;;  %v2813_v8 = vld [vmem:[%s3174_s22 + $0x1ec] ss:$16 sps:$4 sm:$0xff]   ;;  %v2815_v9 = vld [vmem:[%s3174_s22 + $0x1e0] ss:$16 sps:$4 sm:$0xff]   ;;  %v3258_v16 = vrot.slane %v421_v55, %v3224_v50  ;;  %v430_v17 = vcombine.high %v428_v14, %v428_v14  ;;  %v3267_v22 = vrot.slane %v428_v14, %v3224_v50 }
  0x2c   : > { %1600 = vmatpush1.bf16.msra.mxu0 %v2755_v23  ;;  %1764 = vmatpush1.bf16.msra.mxu1 %v2756_v24  ;;  %v2816_v11 = vld [vmem:[%s3174_s22 + $0x1e8] ss:$16 sps:$4 sm:$0xff]   ;;  %v2819_v12 = vld [vmem:[%s3174_s22 + $0x204] ss:$16 sps:$4 sm:$0xff]   ;;  %v2822_v13 = vld [vmem:[%s3174_s22 + $0x20c] ss:$16 sps:$4 sm:$0xff]  }
  0x2d   : > { %1601 = vmatprep.subr.bf16.mxu0 %v2757_v25  ;;  %1765 = vmatprep.subr.bf16.mxu1 %v2759_v26  ;;  %v451_v61 = vrot.slane %v429_v59, %v3224_v50  ;;  %v2817_v15 = vld [vmem:[%s3174_s22 + $0x200] ss:$16 sps:$4 sm:$0xff]   ;;  %v2820_v18 = vld [vmem:[%s3174_s22 + $0x208] ss:$16 sps:$4 sm:$0xff]   ;;  %v2825_v19 = vld [vmem:[%s3174_s22 + $0x224] ss:$16 sps:$4 sm:$0xff]   ;;  %v3264_v21 = vrot.slane %v430_v17, %v3224_v50 }
  0x2e   : > { %v2828_v20 = vld [vmem:[%s3174_s22 + $0x22c] ss:$16 sps:$4 sm:$0xff]   ;;  %v2823_v24 = vld [vmem:[%s3174_s22 + $0x220] ss:$16 sps:$4 sm:$0xff]   ;;  %v2826_v25 = vld [vmem:[%s3174_s22 + $0x228] ss:$16 sps:$4 sm:$0xff]  }
  0x2f   : > { %1621 = vmatprep.mubr.bf16.mxu0 %v451_v61  ;;  %1785 = vmatprep.mubr.bf16.mxu1 %v451_v61  ;;  %v461_v23 = vcombine.high %v451_v61, %v451_v61  ;;  %v2831_v26 = vld [vmem:[%s3174_s22 + $0x244] ss:$16 sps:$4 sm:$0xff]   ;;  %v2844_v37 = vld [vmem:[%s3174_s22 + $0x288] ss:$16 sps:$4 sm:$0xff]   ;;  %v2852_v39 = vld [vmem:[%s3174_s22 + $0x2ac] ss:$16 sps:$4 sm:$0xff]  }
  0x30   : > { %1602 = vmatpush1.bf16.msra.mxu0 %v2761_v27  ;;  %1766 = vmatpush1.bf16.msra.mxu1 %v2762_v28  ;;  %v2834_v27 = vld [vmem:[%s3174_s22 + $0x24c] ss:$16 sps:$4 sm:$0xff]   ;;  %v2829_v28 = vld [vmem:[%s3174_s22 + $0x240] ss:$16 sps:$4 sm:$0xff]   ;;  %v2849_v38 = vld [vmem:[%s3174_s22 + $0x2a4] ss:$16 sps:$4 sm:$0xff]  }
  0x31   : > { %1603 = vmatprep.subr.bf16.mxu0 %v2763_v29  ;;  %1767 = vmatprep.subr.bf16.mxu1 %v2765_v30  ;;  %v2832_v29 = vld [vmem:[%s3174_s22 + $0x248] ss:$16 sps:$4 sm:$0xff]   ;;  %v2837_v30 = vld [vmem:[%s3174_s22 + $0x264] ss:$16 sps:$4 sm:$0xff]   ;;  %v2858_v43 = vld [vmem:[%s3174_s22 + $0x2cc] ss:$16 sps:$4 sm:$0xff]  }
  0x32   : > { %v2862_v50 = vld [vmem:[%s3174_s22 + $0x2e8] ss:$16 sps:$4 sm:$0xff]   ;;  %v2865_v53 = vld [vmem:[%s3174_s22 + $0x300] ss:$16 sps:$4 sm:$0xff]   ;;  %v2873_v55 = vld [vmem:[%s3174_s22 + $0x324] ss:$16 sps:$4 sm:$0xff]  }
  0x33   : > { %v2879_v59 = vld [vmem:[%s3174_s22 + $0x344] ss:$16 sps:$4 sm:$0xff]   ;;  %v2877_v61 = vld [vmem:[%s3174_s22 + $0x340] ss:$16 sps:$4 sm:$0xff]   ;;  %v2898_v10 = vld [vmem:[%s3174_s22 + $0x3a8] ss:$16 sps:$4 sm:$0xff]  }
  0x34   : > { %1604 = vmatpush1.bf16.msra.mxu0 %v2767_v31  ;;  %1768 = vmatpush1.bf16.msra.mxu1 %v2768_v32  ;;  %v2840_v31 = vld [vmem:[%s3174_s22 + $0x26c] ss:$16 sps:$4 sm:$0xff]   ;;  %v2835_v32 = vld [vmem:[%s3174_s22 + $0x260] ss:$16 sps:$4 sm:$0xff]   ;;  %v2904_v14 = vld [vmem:[%s3174_s22 + $0x3c8] ss:$16 sps:$4 sm:$0xff]  }
  0x35   : > { %1605 = vmatprep.subr.bf16.mxu0 %v2769_v33  ;;  %1769 = vmatprep.subr.bf16.mxu1 %v2771_v34  ;;  %v2838_v33 = vld [vmem:[%s3174_s22 + $0x268] ss:$16 sps:$4 sm:$0xff]   ;;  %v2843_v34 = vld [vmem:[%s3174_s22 + $0x284] ss:$16 sps:$4 sm:$0xff]   ;;  %v2912_v17 = vld [vmem:[%s3174_s22 + $0x3ec] ss:$16 sps:$4 sm:$0xff]  }
  0x38   : > { %1606 = vmatpush1.bf16.msra.mxu0 %v2773_v35  ;;  %1770 = vmatpush1.bf16.msra.mxu1 %v2774_v36  ;;  %v2846_v35 = vld [vmem:[%s3174_s22 + $0x28c] ss:$16 sps:$4 sm:$0xff]   ;;  %v2841_v36 = vld [vmem:[%s3174_s22 + $0x280] ss:$16 sps:$4 sm:$0xff]  }
  0x39   : > { %1607 = vmatprep.subr.bf16.mxu0 %v2775_v40  ;;  %1771 = vmatprep.subr.bf16.mxu1 %v2777_v41  ;;  %v2847_v40 = vld [vmem:[%s3174_s22 + $0x2a0] ss:$16 sps:$4 sm:$0xff]   ;;  %v2850_v41 = vld [vmem:[%s3174_s22 + $0x2a8] ss:$16 sps:$4 sm:$0xff]  }
  0x3c   : > { %1608 = vmatpush1.bf16.msra.mxu0 %v2779_v42  ;;  %1772 = vmatpush1.bf16.msra.mxu1 %v2780_v45  ;;  %v2855_v42 = vld [vmem:[%s3174_s22 + $0x2c4] ss:$16 sps:$4 sm:$0xff]   ;;  %v2853_v45 = vld [vmem:[%s3174_s22 + $0x2c0] ss:$16 sps:$4 sm:$0xff]  }
  0x3d   : > { %1609 = vmatprep.subr.bf16.mxu0 %v2781_v46  ;;  %1773 = vmatprep.subr.bf16.mxu1 %v2783_v47  ;;  %v2856_v46 = vld [vmem:[%s3174_s22 + $0x2c8] ss:$16 sps:$4 sm:$0xff]   ;;  %v2861_v47 = vld [vmem:[%s3174_s22 + $0x2e4] ss:$16 sps:$4 sm:$0xff]  }
  0x40   : > { %1610 = vmatpush1.bf16.msra.mxu0 %v2785_v48  ;;  %1774 = vmatpush1.bf16.msra.mxu1 %v2786_v49  ;;  %v2864_v48 = vld [vmem:[%s3174_s22 + $0x2ec] ss:$16 sps:$4 sm:$0xff]   ;;  %v2859_v49 = vld [vmem:[%s3174_s22 + $0x2e0] ss:$16 sps:$4 sm:$0xff]  }
  0x41   : > { %1611 = vmatprep.subr.bf16.mxu0 %v2787_v51  ;;  %1775 = vmatprep.subr.bf16.mxu1 %v2789_v52  ;;  %v2867_v51 = vld [vmem:[%s3174_s22 + $0x304] ss:$16 sps:$4 sm:$0xff]   ;;  %v2870_v52 = vld [vmem:[%s3174_s22 + $0x30c] ss:$16 sps:$4 sm:$0xff]  }
  0x44   : > { %1612 = vmatpush1.bf16.msra.mxu0 %v2791_v54  ;;  %1776 = vmatpush1.bf16.msra.mxu1 %v2792_v56  ;;  %v2868_v54 = vld [vmem:[%s3174_s22 + $0x308] ss:$16 sps:$4 sm:$0xff]   ;;  %v2876_v56 = vld [vmem:[%s3174_s22 + $0x32c] ss:$16 sps:$4 sm:$0xff]  }
  0x45   : > { %1613 = vmatprep.subr.bf16.mxu0 %v2793_v57  ;;  %1777 = vmatprep.subr.bf16.mxu1 %v2795_v58  ;;  %v2871_v57 = vld [vmem:[%s3174_s22 + $0x320] ss:$16 sps:$4 sm:$0xff]   ;;  %v2874_v58 = vld [vmem:[%s3174_s22 + $0x328] ss:$16 sps:$4 sm:$0xff]  }
  0x48   : > { %1614 = vmatpush1.bf16.msra.mxu0 %v2797_v60  ;;  %1778 = vmatpush1.bf16.msra.mxu1 %v2798_v62  ;;  %v2882_v60 = vld [vmem:[%s3174_s22 + $0x34c] ss:$16 sps:$4 sm:$0xff]   ;;  %v2880_v62 = vld [vmem:[%s3174_s22 + $0x348] ss:$16 sps:$4 sm:$0xff]  }
  0x49   : > { %1615 = vmatprep.subr.bf16.mxu0 %v2799_v63  ;;  %1779 = vmatprep.subr.bf16.mxu1 %v2801_v0  ;;  %v2885_v63 = vld [vmem:[%s3174_s22 + $0x364] ss:$16 sps:$4 sm:$0xff]   ;;  %v2888_v0 = vld [vmem:[%s3174_s22 + $0x36c] ss:$16 sps:$4 sm:$0xff]  }
  0x4c   : > { %1616 = vmatpush1.bf16.msra.mxu0 %v2803_v1  ;;  %1780 = vmatpush1.bf16.msra.mxu1 %v2804_v2  ;;  %v2883_v1 = vld [vmem:[%s3174_s22 + $0x360] ss:$16 sps:$4 sm:$0xff]   ;;  %v2886_v2 = vld [vmem:[%s3174_s22 + $0x368] ss:$16 sps:$4 sm:$0xff]  }
  0x4d   : > { %1617 = vmatprep.subr.bf16.mxu0 %v2805_v3  ;;  %1781 = vmatprep.subr.bf16.mxu1 %v2807_v4  ;;  %v2891_v3 = vld [vmem:[%s3174_s22 + $0x384] ss:$16 sps:$4 sm:$0xff]   ;;  %v2894_v4 = vld [vmem:[%s3174_s22 + $0x38c] ss:$16 sps:$4 sm:$0xff]  }
  0x50   : > { %1618 = vmatpush1.bf16.msra.mxu0 %v2809_v5  ;;  %1782 = vmatpush1.bf16.msra.mxu1 %v2810_v6  ;;  %v2889_v5 = vld [vmem:[%s3174_s22 + $0x380] ss:$16 sps:$4 sm:$0xff]   ;;  %v2892_v6 = vld [vmem:[%s3174_s22 + $0x388] ss:$16 sps:$4 sm:$0xff]  }
  0x51   : > { %1619 = vmatprep.subr.bf16.mxu0 %v2811_v7  ;;  %1783 = vmatprep.subr.bf16.mxu1 %v2813_v8  ;;  %v2897_v7 = vld [vmem:[%s3174_s22 + $0x3a4] ss:$16 sps:$4 sm:$0xff]   ;;  %v2900_v8 = vld [vmem:[%s3174_s22 + $0x3ac] ss:$16 sps:$4 sm:$0xff]  }
  0x54   : > { %1620 = vmatpush1.bf16.msra.mxu0 %v2815_v9  ;;  %1784 = vmatpush1.bf16.msra.mxu1 %v2816_v11  ;;  %v2895_v9 = vld [vmem:[%s3174_s22 + $0x3a0] ss:$16 sps:$4 sm:$0xff]   ;;  %v2903_v11 = vld [vmem:[%s3174_s22 + $0x3c4] ss:$16 sps:$4 sm:$0xff]  }
  0x55   : > { %1630 = vmatprep.subr.bf16.mxu0 %v2819_v12  ;;  %1794 = vmatprep.subr.bf16.mxu1 %v2822_v13  ;;  %v2906_v12 = vld [vmem:[%s3174_s22 + $0x3cc] ss:$16 sps:$4 sm:$0xff]   ;;  %v2901_v13 = vld [vmem:[%s3174_s22 + $0x3c0] ss:$16 sps:$4 sm:$0xff]  }
  0x57   : > { %1622 = vmatmul.mubr.bf16.vlgmr.msra.gmra.mrb[0].mxu0 %v3258_v16  ;;  %1786 = vmatmul.mubr.bf16.vlgmr.msra.gmra.mrb[0].mxu1 %v3258_v16 }
  0x58   : > { %1631 = vmatpush1.bf16.msra.mxu0 %v2817_v15  ;;  %1795 = vmatpush1.bf16.msra.mxu1 %v2820_v18  ;;  %v2909_v15 = vld [vmem:[%s3174_s22 + $0x3e4] ss:$16 sps:$4 sm:$0xff]   ;;  %v2907_v18 = vld [vmem:[%s3174_s22 + $0x3e0] ss:$16 sps:$4 sm:$0xff]  }
  0x59   : > { %1632 = vmatprep.subr.bf16.mxu0 %v2825_v19  ;;  %1796 = vmatprep.subr.bf16.mxu1 %v2828_v20  ;;  %v2910_v19 = vld [vmem:[%s3174_s22 + $0x3e8] ss:$16 sps:$4 sm:$0xff]   ;;  %v2915_v20 = vld [vmem:[%s3174_s22 + $0x404] ss:$16 sps:$4 sm:$0xff]  }
  0x5a   : > { %1662 = vmatprep.mubr.bf16.mxu0 %v461_v23  ;;  %1826 = vmatprep.mubr.bf16.mxu1 %v461_v23  ;;  %v2918_v23 = vld [vmem:[%s3174_s22 + $0x40c] ss:$16 sps:$4 sm:$0xff]  }
  0x5c   : > { %1633 = vmatpush1.bf16.msra.mxu0 %v2823_v24  ;;  %1797 = vmatpush1.bf16.msra.mxu1 %v2826_v25  ;;  %v2913_v24 = vld [vmem:[%s3174_s22 + $0x400] ss:$16 sps:$4 sm:$0xff]   ;;  %v459_v25 = vcombine.high %v3258_v16, %v3258_v16  ;;  %v2922_v16 = vld [vmem:[%s3174_s22 + $0x428] ss:$16 sps:$4 sm:$0xff]  }
  0x5d   : > { %1634 = vmatprep.subr.bf16.mxu0 %v2831_v26  ;;  %1798 = vmatprep.subr.bf16.mxu1 %v2834_v27  ;;  %v2916_v26 = vld [vmem:[%s3174_s22 + $0x408] ss:$16 sps:$4 sm:$0xff]   ;;  %v2921_v27 = vld [vmem:[%s3174_s22 + $0x424] ss:$16 sps:$4 sm:$0xff]  }
  0x60   : > { %1635 = vmatpush1.bf16.msra.mxu0 %v2829_v28  ;;  %1799 = vmatpush1.bf16.msra.mxu1 %v2832_v29  ;;  %v2924_v28 = vld [vmem:[%s3174_s22 + $0x42c] ss:$16 sps:$4 sm:$0xff]   ;;  %v2919_v29 = vld [vmem:[%s3174_s22 + $0x420] ss:$16 sps:$4 sm:$0xff]  }
  0x61   : > { %1636 = vmatprep.subr.bf16.mxu0 %v2837_v30  ;;  %1800 = vmatprep.subr.bf16.mxu1 %v2840_v31  ;;  %v2927_v30 = vld [vmem:[%s3174_s22 + $0x444] ss:$16 sps:$4 sm:$0xff]   ;;  %v2930_v31 = vld [vmem:[%s3174_s22 + $0x44c] ss:$16 sps:$4 sm:$0xff]  }
  0x64   : > { %1637 = vmatpush1.bf16.msra.mxu0 %v2835_v32  ;;  %1801 = vmatpush1.bf16.msra.mxu1 %v2838_v33  ;;  %v2925_v32 = vld [vmem:[%s3174_s22 + $0x440] ss:$16 sps:$4 sm:$0xff]   ;;  %v2928_v33 = vld [vmem:[%s3174_s22 + $0x448] ss:$16 sps:$4 sm:$0xff]  }
  0x65   : > { %1638 = vmatprep.subr.bf16.mxu0 %v2843_v34  ;;  %1802 = vmatprep.subr.bf16.mxu1 %v2846_v35  ;;  %v2933_v34 = vld [vmem:[%s3174_s22 + $0x464] ss:$16 sps:$4 sm:$0xff]   ;;  %v2936_v35 = vld [vmem:[%s3174_s22 + $0x46c] ss:$16 sps:$4 sm:$0xff]  }
  0x68   : > { %1639 = vmatpush1.bf16.msra.mxu0 %v2841_v36  ;;  %1803 = vmatpush1.bf16.msra.mxu1 %v2844_v37  ;;  %v2931_v36 = vld [vmem:[%s3174_s22 + $0x460] ss:$16 sps:$4 sm:$0xff]   ;;  %v2934_v37 = vld [vmem:[%s3174_s22 + $0x468] ss:$16 sps:$4 sm:$0xff]  }
  0x69   : > { %1640 = vmatprep.subr.bf16.mxu0 %v2849_v38  ;;  %1804 = vmatprep.subr.bf16.mxu1 %v2852_v39  ;;  %v2942_v38 = vld [vmem:[%s3174_s22 + $0x48c] ss:$16 sps:$4 sm:$0xff]   ;;  %v2937_v39 = vld [vmem:[%s3174_s22 + $0x480] ss:$16 sps:$4 sm:$0xff]  }
  0x6c   : > { %1641 = vmatpush1.bf16.msra.mxu0 %v2847_v40  ;;  %1805 = vmatpush1.bf16.msra.mxu1 %v2850_v41  ;;  %v2940_v40 = vld [vmem:[%s3174_s22 + $0x488] ss:$16 sps:$4 sm:$0xff]   ;;  %v2945_v41 = vld [vmem:[%s3174_s22 + $0x4a4] ss:$16 sps:$4 sm:$0xff]  }
  0x6d   : > { %1642 = vmatprep.subr.bf16.mxu0 %v2855_v42  ;;  %1806 = vmatprep.subr.bf16.mxu1 %v2858_v43  ;;  %v2948_v42 = vld [vmem:[%s3174_s22 + $0x4ac] ss:$16 sps:$4 sm:$0xff]   ;;  %v2943_v43 = vld [vmem:[%s3174_s22 + $0x4a0] ss:$16 sps:$4 sm:$0xff]  }
  0x70   : > { %1643 = vmatpush1.bf16.msra.mxu0 %v2853_v45  ;;  %1807 = vmatpush1.bf16.msra.mxu1 %v2856_v46  ;;  %v2946_v45 = vld [vmem:[%s3174_s22 + $0x4a8] ss:$16 sps:$4 sm:$0xff]   ;;  %v2951_v46 = vld [vmem:[%s3174_s22 + $0x4c4] ss:$16 sps:$4 sm:$0xff]  }
  0x71   : > { %1644 = vmatprep.subr.bf16.mxu0 %v2861_v47  ;;  %1808 = vmatprep.subr.bf16.mxu1 %v2864_v48  ;;  %v2954_v47 = vld [vmem:[%s3174_s22 + $0x4cc] ss:$16 sps:$4 sm:$0xff]   ;;  %v2949_v48 = vld [vmem:[%s3174_s22 + $0x4c0] ss:$16 sps:$4 sm:$0xff]  }
  0x74   : > { %1645 = vmatpush1.bf16.msra.mxu0 %v2859_v49  ;;  %1809 = vmatpush1.bf16.msra.mxu1 %v2862_v50  ;;  %v2952_v49 = vld [vmem:[%s3174_s22 + $0x4c8] ss:$16 sps:$4 sm:$0xff]   ;;  %v2957_v50 = vld [vmem:[%s3174_s22 + $0x4e4] ss:$16 sps:$4 sm:$0xff]  }
  0x75   : > { %1646 = vmatprep.subr.bf16.mxu0 %v2867_v51  ;;  %1810 = vmatprep.subr.bf16.mxu1 %v2870_v52  ;;  %v2960_v51 = vld [vmem:[%s3174_s22 + $0x4ec] ss:$16 sps:$4 sm:$0xff]   ;;  %v2955_v52 = vld [vmem:[%s3174_s22 + $0x4e0] ss:$16 sps:$4 sm:$0xff]  }
  0x78   : > { %1647 = vmatpush1.bf16.msra.mxu0 %v2865_v53  ;;  %1811 = vmatpush1.bf16.msra.mxu1 %v2868_v54  ;;  %v2958_v53 = vld [vmem:[%s3174_s22 + $0x4e8] ss:$16 sps:$4 sm:$0xff]   ;;  %v2963_v54 = vld [vmem:[%s3174_s22 + $0x504] ss:$16 sps:$4 sm:$0xff]  }
  0x79   : > { %1648 = vmatprep.subr.bf16.mxu0 %v2873_v55  ;;  %1812 = vmatprep.subr.bf16.mxu1 %v2876_v56  ;;  %v2966_v55 = vld [vmem:[%s3174_s22 + $0x50c] ss:$16 sps:$4 sm:$0xff]   ;;  %v2961_v56 = vld [vmem:[%s3174_s22 + $0x500] ss:$16 sps:$4 sm:$0xff]  }
  0x7c   : > { %1649 = vmatpush1.bf16.msra.mxu0 %v2871_v57  ;;  %1813 = vmatpush1.bf16.msra.mxu1 %v2874_v58  ;;  %v2964_v57 = vld [vmem:[%s3174_s22 + $0x508] ss:$16 sps:$4 sm:$0xff]   ;;  %v2969_v58 = vld [vmem:[%s3174_s22 + $0x524] ss:$16 sps:$4 sm:$0xff]  }
  0x7d   : > { %1650 = vmatprep.subr.bf16.mxu0 %v2879_v59  ;;  %1814 = vmatprep.subr.bf16.mxu1 %v2882_v60  ;;  %v2972_v59 = vld [vmem:[%s3174_s22 + $0x52c] ss:$16 sps:$4 sm:$0xff]   ;;  %v2967_v60 = vld [vmem:[%s3174_s22 + $0x520] ss:$16 sps:$4 sm:$0xff]  }
  0x80   : > { %1651 = vmatpush1.bf16.msra.mxu0 %v2877_v61  ;;  %1815 = vmatpush1.bf16.msra.mxu1 %v2880_v62  ;;  %v2970_v61 = vld [vmem:[%s3174_s22 + $0x528] ss:$16 sps:$4 sm:$0xff]   ;;  %v2975_v62 = vld [vmem:[%s3174_s22 + $0x544] ss:$16 sps:$4 sm:$0xff]  }
  0x81   : > { %1652 = vmatprep.subr.bf16.mxu0 %v2885_v63  ;;  %1816 = vmatprep.subr.bf16.mxu1 %v2888_v0  ;;  %v2978_v63 = vld [vmem:[%s3174_s22 + $0x54c] ss:$16 sps:$4 sm:$0xff]   ;;  %v2973_v0 = vld [vmem:[%s3174_s22 + $0x540] ss:$16 sps:$4 sm:$0xff]  }
  0x84   : > { %1653 = vmatpush1.bf16.msra.mxu0 %v2883_v1  ;;  %1817 = vmatpush1.bf16.msra.mxu1 %v2886_v2  ;;  %v2976_v1 = vld [vmem:[%s3174_s22 + $0x548] ss:$16 sps:$4 sm:$0xff]   ;;  %v2981_v2 = vld [vmem:[%s3174_s22 + $0x564] ss:$16 sps:$4 sm:$0xff]  }
  0x85   : > { %1654 = vmatprep.subr.bf16.mxu0 %v2891_v3  ;;  %1818 = vmatprep.subr.bf16.mxu1 %v2894_v4  ;;  %v2984_v3 = vld [vmem:[%s3174_s22 + $0x56c] ss:$16 sps:$4 sm:$0xff]   ;;  %v2979_v4 = vld [vmem:[%s3174_s22 + $0x560] ss:$16 sps:$4 sm:$0xff]  }
  0x88   : > { %1655 = vmatpush1.bf16.msra.mxu0 %v2889_v5  ;;  %1819 = vmatpush1.bf16.msra.mxu1 %v2892_v6  ;;  %v2982_v5 = vld [vmem:[%s3174_s22 + $0x568] ss:$16 sps:$4 sm:$0xff]   ;;  %v2987_v6 = vld [vmem:[%s3174_s22 + $0x584] ss:$16 sps:$4 sm:$0xff]  }
  0x89   : > { %1656 = vmatprep.subr.bf16.mxu0 %v2897_v7  ;;  %1820 = vmatprep.subr.bf16.mxu1 %v2900_v8  ;;  %v2990_v7 = vld [vmem:[%s3174_s22 + $0x58c] ss:$16 sps:$4 sm:$0xff]   ;;  %v2985_v8 = vld [vmem:[%s3174_s22 + $0x580] ss:$16 sps:$4 sm:$0xff]  }
  0x8c   : > { %1657 = vmatpush1.bf16.msra.mxu0 %v2895_v9  ;;  %1821 = vmatpush1.bf16.msra.mxu1 %v2898_v10  ;;  %v2988_v9 = vld [vmem:[%s3174_s22 + $0x588] ss:$16 sps:$4 sm:$0xff]   ;;  %v2993_v10 = vld [vmem:[%s3174_s22 + $0x5a4] ss:$16 sps:$4 sm:$0xff]  }
  0x8d   : > { %1658 = vmatprep.subr.bf16.mxu0 %v2903_v11  ;;  %1822 = vmatprep.subr.bf16.mxu1 %v2906_v12  ;;  %v2996_v11 = vld [vmem:[%s3174_s22 + $0x5ac] ss:$16 sps:$4 sm:$0xff]   ;;  %v2991_v12 = vld [vmem:[%s3174_s22 + $0x5a0] ss:$16 sps:$4 sm:$0xff]  }
  0x90   : > { %1659 = vmatpush1.bf16.msra.mxu0 %v2901_v13  ;;  %1823 = vmatpush1.bf16.msra.mxu1 %v2904_v14  ;;  %v2994_v13 = vld [vmem:[%s3174_s22 + $0x5a8] ss:$16 sps:$4 sm:$0xff]   ;;  %v2999_v14 = vld [vmem:[%s3174_s22 + $0x5c4] ss:$16 sps:$4 sm:$0xff]  }
  0x91   : > { %1660 = vmatprep.subr.bf16.mxu0 %v2909_v15  ;;  %1824 = vmatprep.subr.bf16.mxu1 %v2912_v17  ;;  %v3002_v15 = vld [vmem:[%s3174_s22 + $0x5cc] ss:$16 sps:$4 sm:$0xff]   ;;  %v2997_v17 = vld [vmem:[%s3174_s22 + $0x5c0] ss:$16 sps:$4 sm:$0xff]  }
  0x94   : > { %1661 = vmatpush1.bf16.msra.mxu0 %v2907_v18  ;;  %1825 = vmatpush1.bf16.msra.mxu1 %v2910_v19  ;;  %v3000_v18 = vld [vmem:[%s3174_s22 + $0x5c8] ss:$16 sps:$4 sm:$0xff]   ;;  %v3005_v19 = vld [vmem:[%s3174_s22 + $0x5e4] ss:$16 sps:$4 sm:$0xff]  }
  0x95   : > { %1671 = vmatprep.subr.bf16.mxu0 %v2915_v20  ;;  %1835 = vmatprep.subr.bf16.mxu1 %v2918_v23  ;;  %v3008_v20 = vld [vmem:[%s3174_s22 + $0x5ec] ss:$16 sps:$4 sm:$0xff]   ;;  %v3003_v23 = vld [vmem:[%s3174_s22 + $0x5e0] ss:$16 sps:$4 sm:$0xff]  }
  0x97   : > { %1663 = vmatmul.mubr.bf16.vlgmr.msra.gmra.mrb[0].mxu0 %v459_v25  ;;  %1827 = vmatmul.mubr.bf16.vlgmr.msra.gmra.mrb[0].mxu1 %v459_v25  ;;  %v3012_v25 = vld [vmem:[%s3174_s22 + $0x604] ss:$16 sps:$4 sm:$0xff]  }
  0x98   : > { %1672 = vmatpush1.bf16.msra.mxu0 %v2913_v24  ;;  %1836 = vmatpush1.bf16.msra.mxu1 %v2916_v26  ;;  %v3006_v24 = vld [vmem:[%s3174_s22 + $0x5e8] ss:$16 sps:$4 sm:$0xff]   ;;  %v3015_v26 = vld [vmem:[%s3174_s22 + $0x60c] ss:$16 sps:$4 sm:$0xff]  }
  0x99   : > { %1673 = vmatprep.subr.bf16.mxu0 %v2921_v27  ;;  %1837 = vmatprep.subr.bf16.mxu1 %v2924_v28  ;;  %v3010_v27 = vld [vmem:[%s3174_s22 + $0x600] ss:$16 sps:$4 sm:$0xff]   ;;  %v3013_v28 = vld [vmem:[%s3174_s22 + $0x608] ss:$16 sps:$4 sm:$0xff]  }
  0x9a   : > { %1703 = vmatprep.mubr.bf16.mxu0 %v3264_v21  ;;  %1867 = vmatprep.mubr.bf16.mxu1 %v3264_v21  ;;  %v2939_v21 = vld [vmem:[%s3174_s22 + $0x484] ss:$16 sps:$4 sm:$0xff]  }
  0x9c   : > { %1674 = vmatpush1.bf16.msra.mxu0 %v2919_v29  ;;  %1838 = vmatpush1.bf16.msra.mxu1 %v2922_v16  ;;  %v3018_v29 = vld [vmem:[%s3174_s22 + $0x624] ss:$16 sps:$4 sm:$0xff]   ;;  %v3021_v16 = vld [vmem:[%s3174_s22 + $0x62c] ss:$16 sps:$4 sm:$0xff]  }
  0x9d   : > { %1675 = vmatprep.subr.bf16.mxu0 %v2927_v30  ;;  %1839 = vmatprep.subr.bf16.mxu1 %v2930_v31  ;;  %v3016_v30 = vld [vmem:[%s3174_s22 + $0x620] ss:$16 sps:$4 sm:$0xff]   ;;  %v3019_v31 = vld [vmem:[%s3174_s22 + $0x628] ss:$16 sps:$4 sm:$0xff]  }
  0xa0   : > { %1676 = vmatpush1.bf16.msra.mxu0 %v2925_v32  ;;  %1840 = vmatpush1.bf16.msra.mxu1 %v2928_v33  ;;  %v3024_v32 = vld [vmem:[%s3174_s22 + $0x644] ss:$16 sps:$4 sm:$0xff]   ;;  %v3027_v33 = vld [vmem:[%s3174_s22 + $0x64c] ss:$16 sps:$4 sm:$0xff]  }
  0xa1   : > { %1677 = vmatprep.subr.bf16.mxu0 %v2933_v34  ;;  %1841 = vmatprep.subr.bf16.mxu1 %v2936_v35  ;;  %v3130_v34 = vmov 0   ;;  %v3022_v35 = vld [vmem:[%s3174_s22 + $0x640] ss:$16 sps:$4 sm:$0xff]  }
  0xa4   : > { %1678 = vmatpush1.bf16.msra.mxu0 %v2931_v36  ;;  %1842 = vmatpush1.bf16.msra.mxu1 %v2934_v37  ;;  %v3025_v36 = vld [vmem:[%s3174_s22 + $0x648] ss:$16 sps:$4 sm:$0xff]   ;;  %v3030_v37 = vld [vmem:[%s3174_s22 + $0x664] ss:$16 sps:$4 sm:$0xff]  }
  0xa5   : > { %1679 = vmatprep.subr.bf16.mxu0 %v2939_v21  ;;  %1843 = vmatprep.subr.bf16.mxu1 %v2942_v38  ;;  %v3033_v21 = vld [vmem:[%s3174_s22 + $0x66c] ss:$16 sps:$4 sm:$0xff]   ;;  %v3028_v38 = vld [vmem:[%s3174_s22 + $0x660] ss:$16 sps:$4 sm:$0xff]  }
  0xa8   : > { %1680 = vmatpush1.bf16.msra.mxu0 %v2937_v39  ;;  %1844 = vmatpush1.bf16.msra.mxu1 %v2940_v40  ;;  %v3031_v39 = vld [vmem:[%s3174_s22 + $0x668] ss:$16 sps:$4 sm:$0xff]   ;;  %v3036_v40 = vld [vmem:[%s3174_s22 + $0x684] ss:$16 sps:$4 sm:$0xff]  }
  0xa9   : > { %1681 = vmatprep.subr.bf16.mxu0 %v2945_v41  ;;  %1845 = vmatprep.subr.bf16.mxu1 %v2948_v42  ;;  %v3039_v41 = vld [vmem:[%s3174_s22 + $0x68c] ss:$16 sps:$4 sm:$0xff]   ;;  %v3034_v42 = vld [vmem:[%s3174_s22 + $0x680] ss:$16 sps:$4 sm:$0xff]  }
  0xac   : > { %1682 = vmatpush1.bf16.msra.mxu0 %v2943_v43  ;;  %1846 = vmatpush1.bf16.msra.mxu1 %v2946_v45  ;;  %v3037_v43 = vld [vmem:[%s3174_s22 + $0x688] ss:$16 sps:$4 sm:$0xff]   ;;  %v3042_v45 = vld [vmem:[%s3174_s22 + $0x6a4] ss:$16 sps:$4 sm:$0xff]  }
  0xad   : > { %1683 = vmatprep.subr.bf16.mxu0 %v2951_v46  ;;  %1847 = vmatprep.subr.bf16.mxu1 %v2954_v47  ;;  %v3045_v46 = vld [vmem:[%s3174_s22 + $0x6ac] ss:$16 sps:$4 sm:$0xff]   ;;  %v3040_v47 = vld [vmem:[%s3174_s22 + $0x6a0] ss:$16 sps:$4 sm:$0xff]  }
  0xb0   : > { %1684 = vmatpush1.bf16.msra.mxu0 %v2949_v48  ;;  %1848 = vmatpush1.bf16.msra.mxu1 %v2952_v49  ;;  %v3043_v48 = vld [vmem:[%s3174_s22 + $0x6a8] ss:$16 sps:$4 sm:$0xff]   ;;  %v3048_v49 = vld [vmem:[%s3174_s22 + $0x6c4] ss:$16 sps:$4 sm:$0xff]  }
  0xb1   : > { %1685 = vmatprep.subr.bf16.mxu0 %v2957_v50  ;;  %1849 = vmatprep.subr.bf16.mxu1 %v2960_v51  ;;  %v3051_v50 = vld [vmem:[%s3174_s22 + $0x6cc] ss:$16 sps:$4 sm:$0xff]   ;;  %v3046_v51 = vld [vmem:[%s3174_s22 + $0x6c0] ss:$16 sps:$4 sm:$0xff]  }
  0xb4   : > { %1686 = vmatpush1.bf16.msra.mxu0 %v2955_v52  ;;  %1850 = vmatpush1.bf16.msra.mxu1 %v2958_v53  ;;  %v3049_v52 = vld [vmem:[%s3174_s22 + $0x6c8] ss:$16 sps:$4 sm:$0xff]   ;;  %v3054_v53 = vld [vmem:[%s3174_s22 + $0x6e4] ss:$16 sps:$4 sm:$0xff]  }
  0xb5   : > { %1687 = vmatprep.subr.bf16.mxu0 %v2963_v54  ;;  %1851 = vmatprep.subr.bf16.mxu1 %v2966_v55  ;;  %v3057_v54 = vld [vmem:[%s3174_s22 + $0x6ec] ss:$16 sps:$4 sm:$0xff]   ;;  %v3052_v55 = vld [vmem:[%s3174_s22 + $0x6e0] ss:$16 sps:$4 sm:$0xff]  }
  0xb8   : > { %1688 = vmatpush1.bf16.msra.mxu0 %v2961_v56  ;;  %1852 = vmatpush1.bf16.msra.mxu1 %v2964_v57  ;;  %v3055_v56 = vld [vmem:[%s3174_s22 + $0x6e8] ss:$16 sps:$4 sm:$0xff]   ;;  %v460_v57 = vcombine.high %v3267_v22, %v3267_v22 }
  0xb9   : > { %1689 = vmatprep.subr.bf16.mxu0 %v2969_v58  ;;  %1853 = vmatprep.subr.bf16.mxu1 %v2972_v59  ;;  %v3131_v58 = vmov 1983009808  }
  0xba   : > { %v1924_v59 = vunpack.c.l.s4 %v3131_v58 }
  0xbc   : > { %1690 = vmatpush1.bf16.msra.mxu0 %v2967_v60  ;;  %1854 = vmatpush1.bf16.msra.mxu1 %v2970_v61  ;;  %v1925_v60 = vunpack.c.0.s8 %v1924_v59 }
  0xbd   : > { %1691 = vmatprep.subr.bf16.mxu0 %v2975_v62  ;;  %1855 = vmatprep.subr.bf16.mxu1 %v2978_v63 }
  0xbe   : > { %v3434_v63 = vsub.s32 %v1925_v60, %v3216_v44  ;;  %v3058_v44 = vld [vmem:[%s3565_s2 + $0x40] sm:$0xff] (!%p2596_p6)  }
  0xc0   : > { %1692 = vmatpush1.bf16.msra.mxu0 %v2973_v0  ;;  %1856 = vmatpush1.bf16.msra.mxu1 %v2976_v1 }
  0xc1   : > { %1693 = vmatprep.subr.bf16.mxu0 %v2981_v2  ;;  %1857 = vmatprep.subr.bf16.mxu1 %v2984_v3 }
  0xc4   : > { %1694 = vmatpush1.bf16.msra.mxu0 %v2979_v4  ;;  %1858 = vmatpush1.bf16.msra.mxu1 %v2982_v5 }
  0xc5   : > { %1695 = vmatprep.subr.bf16.mxu0 %v2987_v6  ;;  %1859 = vmatprep.subr.bf16.mxu1 %v2990_v7 }
  0xc8   : > { %1696 = vmatpush1.bf16.msra.mxu0 %v2985_v8  ;;  %1860 = vmatpush1.bf16.msra.mxu1 %v2988_v9  ;;  %v188_v9 = vld [vmem:[#allocation2] sm:$0xff] }
  0xc9   : > { %1697 = vmatprep.subr.bf16.mxu0 %v2993_v10  ;;  %1861 = vmatprep.subr.bf16.mxu1 %v2996_v11 }
  0xcc   : > { %1698 = vmatpush1.bf16.msra.mxu0 %v2991_v12  ;;  %1862 = vmatpush1.bf16.msra.mxu1 %v2994_v13  ;;  %v3059_v12 = vld [vmem:[%s3565_s2 + $0xc0] sm:$0xff] (!%p2596_p6)  }
  0xcd   : > { %1699 = vmatprep.subr.bf16.mxu0 %v2999_v14  ;;  %1863 = vmatprep.subr.bf16.mxu1 %v3002_v15  ;;  %v3060_v13 = vld [vmem:[%s3565_s2] sm:$0xff] (!%p2596_p6)   ;;  %v3062_v15 = vld [vmem:[%s3565_s2 + $0x48] sm:$0xff] (!%p2596_p6)  }
  0xce   : > { %v3061_v14 = vld [vmem:[%s3565_s2 + $0x80] sm:$0xff] (!%p2596_p6)  }
  0xd0   : > { %1700 = vmatpush1.bf16.msra.mxu0 %v2997_v17  ;;  %1864 = vmatpush1.bf16.msra.mxu1 %v3000_v18  ;;  %v3063_v17 = vld [vmem:[%s3565_s2 + $0xc8] sm:$0xff] (!%p2596_p6)  }
  0xd1   : > { %1701 = vmatprep.subr.bf16.mxu0 %v3005_v19  ;;  %1865 = vmatprep.subr.bf16.mxu1 %v3008_v20  ;;  %v3064_v18 = vld [vmem:[%s3565_s2 + $0x8] sm:$0xff] (!%p2596_p6)   ;;  %v3066_v20 = vld [vmem:[%s3565_s2 + $0x50] sm:$0xff] (!%p2596_p6)  }
  0xd2   : > { %v3065_v19 = vld [vmem:[%s3565_s2 + $0x88] sm:$0xff] (!%p2596_p6)  }
  0xd4   : > { %1702 = vmatpush1.bf16.msra.mxu0 %v3003_v23  ;;  %1866 = vmatpush1.bf16.msra.mxu1 %v3006_v24  ;;  %v3067_v23 = vld [vmem:[%s3565_s2 + $0xd0] sm:$0xff] (!%p2596_p6)  }
  0xd5   : > { %1712 = vmatprep.subr.bf16.mxu0 %v3012_v25  ;;  %1876 = vmatprep.subr.bf16.mxu1 %v3015_v26  ;;  %v3068_v24 = vld [vmem:[%s3565_s2 + $0x10] sm:$0xff] (!%p2596_p6)   ;;  %v3070_v26 = vld [vmem:[%s3565_s2 + $0x58] sm:$0xff] (!%p2596_p6)  }
  0xd6   : > { %v3069_v25 = vld [vmem:[%s3565_s2 + $0x90] sm:$0xff] (!%p2596_p6)  }
  0xd7   : > { %1704 = vmatmul.mubr.bf16.vlgmr.msra.gmra.mrb[0].mxu0 %v3267_v22  ;;  %1868 = vmatmul.mubr.bf16.vlgmr.msra.gmra.mrb[0].mxu1 %v3267_v22 }
  0xd8   : > { %1713 = vmatpush1.bf16.msra.mxu0 %v3010_v27  ;;  %1877 = vmatpush1.bf16.msra.mxu1 %v3013_v28  ;;  %v3071_v27 = vld [vmem:[%s3565_s2 + $0xd8] sm:$0xff] (!%p2596_p6)  }
  0xd9   : > { %1714 = vmatprep.subr.bf16.mxu0 %v3018_v29  ;;  %1878 = vmatprep.subr.bf16.mxu1 %v3021_v16  ;;  %v3072_v28 = vld [vmem:[%s3565_s2 + $0x18] sm:$0xff] (!%p2596_p6)   ;;  %v3074_v16 = vld [vmem:[%s3565_s2 + $0x60] sm:$0xff] (!%p2596_p6)  }
  0xda   : > { %1744 = vmatprep.mubr.bf16.mxu0 %v3130_v34  ;;  %1908 = vmatprep.mubr.bf16.mxu1 %v3130_v34  ;;  %v3073_v29 = vld [vmem:[%s3565_s2 + $0x98] sm:$0xff] (!%p2596_p6)   ;;  %v3079_v34 = vld [vmem:[%s3565_s2 + $0xe8] sm:$0xff] (!%p2596_p6)  }
  0xdc   : > { %1715 = vmatpush1.bf16.msra.mxu0 %v3016_v30  ;;  %1879 = vmatpush1.bf16.msra.mxu1 %v3019_v31  ;;  %v3075_v30 = vld [vmem:[%s3565_s2 + $0xe0] sm:$0xff] (!%p2596_p6)  }
  0xdd   : > { %1716 = vmatprep.subr.bf16.mxu0 %v3024_v32  ;;  %1880 = vmatprep.subr.bf16.mxu1 %v3027_v33  ;;  %v3076_v31 = vld [vmem:[%s3565_s2 + $0x20] sm:$0xff] (!%p2596_p6)   ;;  %v3078_v33 = vld [vmem:[%s3565_s2 + $0x68] sm:$0xff] (!%p2596_p6)  }
  0xde   : > { %v3077_v32 = vld [vmem:[%s3565_s2 + $0xa0] sm:$0xff] (!%p2596_p6)  }
  0xe0   : > { %1717 = vmatpush1.bf16.msra.mxu0 %v3022_v35  ;;  %1881 = vmatpush1.bf16.msra.mxu1 %v3025_v36  ;;  %v3080_v35 = vld [vmem:[%s3565_s2 + $0x28] sm:$0xff] (!%p2596_p6)  }
  0xe1   : > { %1718 = vmatprep.subr.bf16.mxu0 %v3030_v37  ;;  %1882 = vmatprep.subr.bf16.mxu1 %v3033_v21  ;;  %v3081_v36 = vld [vmem:[%s3565_s2 + $0xa8] sm:$0xff] (!%p2596_p6)   ;;  %v3082_v37 = vld [vmem:[%s3565_s2 + $0x70] sm:$0xff] (!%p2596_p6)  }
  0xe2   : > { %v3083_v21 = vld [vmem:[%s3565_s2 + $0xf0] sm:$0xff] (!%p2596_p6)  }
  0xe4   : > { %1719 = vmatpush1.bf16.msra.mxu0 %v3028_v38  ;;  %1883 = vmatpush1.bf16.msra.mxu1 %v3031_v39  ;;  %v3084_v38 = vld [vmem:[%s3565_s2 + $0x30] sm:$0xff] (!%p2596_p6)  }
  0xe5   : > { %1720 = vmatprep.subr.bf16.mxu0 %v3036_v40  ;;  %1884 = vmatprep.subr.bf16.mxu1 %v3039_v41  ;;  %v3085_v39 = vld [vmem:[%s3565_s2 + $0xb0] sm:$0xff] (!%p2596_p6)   ;;  %v3086_v40 = vld [vmem:[%s3565_s2 + $0x78] sm:$0xff] (!%p2596_p6)  }
  0xe6   : > { %v3087_v41 = vld [vmem:[%s3565_s2 + $0xf8] sm:$0xff] (!%p2596_p6)  }
  0xe8   : > { %1721 = vmatpush1.bf16.msra.mxu0 %v3034_v42  ;;  %1885 = vmatpush1.bf16.msra.mxu1 %v3037_v43  ;;  %v3088_v42 = vld [vmem:[%s3565_s2 + $0x38] sm:$0xff] (!%p2596_p6)  }
  0xe9   : > { %1722 = vmatprep.subr.bf16.mxu0 %v3042_v45  ;;  %1886 = vmatprep.subr.bf16.mxu1 %v3045_v46  ;;  %v3089_v43 = vld [vmem:[%s3565_s2 + $0xb8] sm:$0xff] (!%p2596_p6)  }
  0xec   : > { %1723 = vmatpush1.bf16.msra.mxu0 %v3040_v47  ;;  %1887 = vmatpush1.bf16.msra.mxu1 %v3043_v48 }
  0xed   : > { %1724 = vmatprep.subr.bf16.mxu0 %v3048_v49  ;;  %1888 = vmatprep.subr.bf16.mxu1 %v3051_v50 }
  0xf0   : > { %1725 = vmatpush1.bf16.msra.mxu0 %v3046_v51  ;;  %1889 = vmatpush1.bf16.msra.mxu1 %v3049_v52 }
  0xf1   : > { %1726 = vmatprep.subr.bf16.mxu0 %v3054_v53  ;;  %1890 = vmatprep.subr.bf16.mxu1 %v3057_v54 }
  0xf4   : > { %1727 = vmatpush1.bf16.msra.mxu0 %v3052_v55  ;;  %1891 = vmatpush1.bf16.msra.mxu1 %v3055_v56 }
  0xf5   : > { %2634 = vmatprep.subr.bf16.mxu0 (!%p2596_p6), %v3058_v44  ;;  %2656 = vmatprep.subr.bf16.mxu1 (!%p2596_p6), %v3059_v12 }
  0xf7   : > { %1745 = vmatmul.mubr.bf16.vlgmr.msra.gmra.mrb[0].mxu0 %v460_v57  ;;  %1909 = vmatmul.mubr.bf16.vlgmr.msra.gmra.mrb[0].mxu1 %v460_v57 }
  0xf8   : > { %2635 = vmatpush3.bf16.msra.mxu0 (!%p2596_p6), %v3060_v13  ;;  %2657 = vmatpush3.bf16.msra.mxu1 (!%p2596_p6), %v3061_v14 }
  0xf9   : > { %2636 = vmatprep.subr.bf16.mxu0 (!%p2596_p6), %v3062_v15  ;;  %2658 = vmatprep.subr.bf16.mxu1 (!%p2596_p6), %v3063_v17 }
  0xfc   : > { %2637 = vmatpush3.bf16.msra.mxu0 (!%p2596_p6), %v3064_v18  ;;  %2659 = vmatpush3.bf16.msra.mxu1 (!%p2596_p6), %v3065_v19 }
  0xfd   : > { %2638 = vmatprep.subr.bf16.mxu0 (!%p2596_p6), %v3066_v20  ;;  %2660 = vmatprep.subr.bf16.mxu1 (!%p2596_p6), %v3067_v23 }
 0x100   : > { %2639 = vmatpush3.bf16.msra.mxu0 (!%p2596_p6), %v3068_v24  ;;  %2661 = vmatpush3.bf16.msra.mxu1 (!%p2596_p6), %v3069_v25 }
 0x101   : > { %2640 = vmatprep.subr.bf16.mxu0 (!%p2596_p6), %v3070_v26  ;;  %2662 = vmatprep.subr.bf16.mxu1 (!%p2596_p6), %v3071_v27 }
 0x104   : > { %2641 = vmatpush3.bf16.msra.mxu0 (!%p2596_p6), %v3072_v28  ;;  %2663 = vmatpush3.bf16.msra.mxu1 (!%p2596_p6), %v3073_v29 }
 0x105   : > { %2642 = vmatprep.subr.bf16.mxu0 (!%p2596_p6), %v3074_v16  ;;  %2664 = vmatprep.subr.bf16.mxu1 (!%p2596_p6), %v3075_v30 }
 0x108   : > { %2643 = vmatpush3.bf16.msra.mxu0 (!%p2596_p6), %v3076_v31  ;;  %2665 = vmatpush3.bf16.msra.mxu1 (!%p2596_p6), %v3077_v32 }
 0x109   : > { %2644 = vmatprep.subr.bf16.mxu0 (!%p2596_p6), %v3078_v33  ;;  %2666 = vmatprep.subr.bf16.mxu1 (!%p2596_p6), %v3079_v34 }
 0x10c   : > { %2645 = vmatpush3.bf16.msra.mxu0 (!%p2596_p6), %v3080_v35  ;;  %2667 = vmatpush3.bf16.msra.mxu1 (!%p2596_p6), %v3081_v36 }
 0x10d   : > { %2646 = vmatprep.subr.bf16.mxu0 (!%p2596_p6), %v3082_v37  ;;  %2668 = vmatprep.subr.bf16.mxu1 (!%p2596_p6), %v3083_v21 }
 0x110   : > { %2647 = vmatpush3.bf16.msra.mxu0 (!%p2596_p6), %v3084_v38  ;;  %2669 = vmatpush3.bf16.msra.mxu1 (!%p2596_p6), %v3085_v39 }
 0x111   : > { %2648 = vmatprep.subr.bf16.mxu0 (!%p2596_p6), %v3086_v40  ;;  %2670 = vmatprep.subr.bf16.mxu1 (!%p2596_p6), %v3087_v41 }
 0x114   : > { %2649 = vmatpush3.bf16.msra.mxu0 (!%p2596_p6), %v3088_v42  ;;  %2671 = vmatpush3.bf16.msra.mxu1 (!%p2596_p6), %v3089_v43 }
 0x1ca   : > { %v1746_v61 = vpop.f32.mrb[0].mxu0  ;;  %v1910_v62 = vpop.f32.mrb[0].mxu1 }
 0x1cb   : > { %v1748_v0 = vpop.f32.mrb[1].mxu0  ;;  %v1912_v1 = vpop.f32.mrb[1].mxu1 }
 0x1cc   : > { %v1921_v2 = vcombine.low %v1746_v61, %v1748_v0  ;;  %v1922_v3 = vcombine.low %v1910_v62, %v1912_v1  ;;  %v1750_v4 = vpop.f32.mrb[2].mxu0  ;;  %v1914_v5 = vpop.f32.mrb[2].mxu1 }
 0x1cd   : > { %v1751_v6 = vpop.f32.mrb[3].mxu0  ;;  %v1915_v22 = vpop.f32.mrb[3].mxu1 }
 0x1ce   : > { %v1929_v7 = vrot.slane %v1921_v2, %v3434_v63  ;;  %v1936_v8 = vrot.slane %v1922_v3, %v3434_v63  ;;  %1944 = sbr.rel (%p2596_p6) target bundleno = 705 (0x2c1), region = 40 }
 0x1d0   : > { %v1937_v10 = vcombine.low %v1929_v7, %v1936_v8 }
 0x1d2   : > { %v1939_v11 = vadd.f32 %v1937_v10, %v188_v9 }
 0x1d4   : > { %1940 = vst [vmem:[#allocation2] sm:$0xff] %v1939_v11 }
 0x1db   : > { %v1945_v45 = vld [vmem:[#allocation2] sm:$0xff] }
 0x1dc   : > { %v1946_v46 = vmax.f32 %v1945_v45, 0.0 }
 0x1de   : > { %v1955_v47 = vrot.slane %v1946_v46, %v3434_v63  ;;  %v1948_v48 = vcombine.high %v1946_v46, %v1946_v46 }
 0x1e0   : > { %v1963_v49 = vcombine.high %v1955_v47, %v1955_v47  ;;  %v1962_v50 = vrot.slane %v1948_v48, %v3434_v63  ;;  %v1969_v51 = vpack.c.bf16 %v1955_v47, %v1955_v47 }
 0x1e2   : > { %v1970_v52 = vpack.c.bf16 %v1963_v49, %v1963_v49  ;;  %v1964_v53 = vcombine.high %v1962_v50, %v1962_v50  ;;  %v1971_v54 = vpack.c.bf16 %v1962_v50, %v1962_v50 }
 0x1e4   : > { %2261 = vmatprep.mubr.bf16.mxu0 %v1970_v52  ;;  %v1972_v55 = vpack.c.bf16 %v1964_v53, %v1964_v53 }
 0x1e5   : > { %2262 = vmatmul.mubr.bf16.vlgmr.msra.gmra.mrb[0].mxu0 %v1969_v51 }
 0x1e6   : > { %2301 = vmatprep.mubr.bf16.mxu1 %v1972_v55 }
 0x1e7   : > { %2302 = vmatmul.mubr.bf16.vlgmr.msra.gmra.mrb[0].mxu1 %v1971_v54 }
 0x2b8   : > { %v2650_v56 = vpop.f32.mrb[0].mxu0 }
 0x2b9   : > { %v2651_v57 = vpop.f32.mrb[1].mxu0 }
 0x2ba   : > { %v2672_v58 = vpop.f32.mrb[0].mxu1  ;;  %v2652_v59 = vadd.f32 %v2651_v57, %v2650_v56  ;;  %v2653_v60 = vpop.f32.mrb[2].mxu0 }
 0x2bb   : > { %v2673_v61 = vpop.f32.mrb[1].mxu1  ;;  %v2654_v62 = vpop.f32.mrb[3].mxu0 }
 0x2bc   : > { %v2674_v0 = vadd.f32 %v2673_v61, %v2672_v58  ;;  %v2675_v1 = vpop.f32.mrb[2].mxu1 }
 0x2bd   : > { %v2676_v2 = vpop.f32.mrb[3].mxu1 }
 0x2be   : > { %v2304_v63 = vadd.f32 %v2674_v0, %v2652_v59 }
 0x2c0   : > { %2309 = vst [vmem:[#allocation3] sm:$0x3] %v2304_v63 }
 0x2c1 PF: > { %p2706_p7 = scmp.eq.s32.totalorder %s3159_s13, 3  ;;  %s3132_s14 = smov [#allocation3]  }
 0x2c2   : > { %s2317_s15 = sshll.u32 %s3132_s14, 4  ;;  %s2318_s15 = int_to_ptr.vmem [resolvable:$true] %s2317_s15 }
 0x2c3   : > { %s3090_s16 = scalar_lea.vmem %s2318_s15, 32  ;;  %p3097_p11 = scmp.lt.s32.totalorder %s2318_s15, %s2318_s15 }
 0x2c4   : > { %p3091_p8 = scmp.ne.s32.totalorder %s2318_s15, %s3090_s16  ;;  %p3098_p12 = scmp.lt.s32.totalorder %s3090_s16, %s3090_s16 }
 0x2c6   : > { %p3092_p9 = pnand %p3091_p8, %p2706_p7  ;;  %p3099_p13 = por %p3098_p12, %p3097_p11 }
 0x2c8   : > { %p3093_p10 = pneg %p3092_p9 }
 0x2ca   : > { %p3100_p0 = pnand %p3099_p13, %p3093_p10 }
 0x2cc   : > { %3103 = shalt.err (!%p3100_p0)
}
 0x2cd   : > { %s3104_s19 = scalar_lea.hbm %s3566_s3, 32 }
 0x2ce   : > { %p3105_p1 = scmp.ne.s32.totalorder %s3566_s3, %s3104_s19  ;;  %p3110_p4 = scmp.lt.u32.totalorder %s3104_s19, %s3566_s3 }
 0x2d0   : > { %p3106_p2 = pnand %p3105_p1, %p2706_p7 }
 0x2d2   : > { %p3107_p3 = pneg %p3106_p2 }
 0x2d4   : > { %p3112_p5 = pnand %p3110_p4, %p3107_p3 }
 0x2d6   : > { %3115 = shalt.err (!%p3112_p5)
}
 0x2d7   : > { %2703 = dma.vmem_to_hbm [thread:$0]  (%p2706_p7), %s2318_s15, 32, %s3566_s3, [#allocation4]  }
 0x2d8   : > { %3121 = dma.done.wait (%p2706_p7), [#allocation4], 32  }
 0x2d9   : > { %3123 = vsyncadd (%p2706_p7), [#allocation4], 4294967264 }
 0x2da PF: > { %s14_s12 = sadd.s32 1, %s3126_s12  }
 0x2db   : > { %p11_p6 = scmp.ge.s32.totalorder %s14_s12, 6  }
 0x2dd   :  { %13 = sbr.rel (!%p11_p6) target bundleno = 1 (0x1), region = 70 }
 0x2e4   :  { %2330 = vsyncpa [#allocation4], 1 }
 0x2e5   :  { %2332 = vsyncpa [#allocation4 + $0x1], 1 }

</bundles_post_ra>
